<compile_context>
chip_gen: v7x
topology: tpu7x:2x2x1
jax: 0.10.0
libtpu: 0.0.40
codegen_flags: <defaults>
</compile_context>

<pallas_src>
import math

import jax
import jax.numpy as jnp
from jax.experimental import pallas as pl
from jax.experimental.pallas import tpu as pltpu


def _detect_vmem_limit():
    """Generation-aware scoped-VMEM limit (leave 25% headroom)."""
    try:
        cap = int(pltpu.get_tpu_info().vmem_capacity_bytes)
        if cap < (16 << 20):
            raise ValueError("implausible VMEM capacity")
        return min(cap * 3 // 4, 96 * 1024 * 1024)
    except Exception:
        return 32 * 1024 * 1024


_VMEM_LIMIT = _detect_vmem_limit()


# ----------------------------------------------------------------------------
# Kernel 1 (fused bottleneck): conv1+bn1+relu -> VMEM halo scratch ->
# conv2(3x3, 9 shifted-view matmuls)+bn2+relu -> conv3+bn3 -> +identity ->
# relu -> write bf16 directly into ctx slot t (aliased) + fused GAP.
# ----------------------------------------------------------------------------
def _fused_bottleneck_kernel(x_ref, w1_ref, b1_ref, w2_ref, b2_ref,
                             w3_ref, b3_ref, ctx_hbm_ref, ctx_out_ref,
                             gap_ref, h1p_ref):
    del ctx_hbm_ref  # present only so the ctx buffer can be input/output aliased
    H, W, C = x_ref.shape
    width = w1_ref.shape[1]

    x_flat = x_ref[...].reshape(H * W, C)                       # f32, reused as identity

    # conv1 (1x1) + bn1 + ReLU  -- result never leaves VMEM
    h1 = jnp.dot(x_flat.astype(jnp.bfloat16), w1_ref[...],
                 preferred_element_type=jnp.float32)
    h1 = jnp.maximum(h1 + b1_ref[...], 0.0)

    # pad=1 halo built in VMEM (bf16 scratch): zero, then overwrite interior
    h1p_ref[...] = jnp.zeros_like(h1p_ref)
    h1p_ref[1:H + 1, 1:W + 1, :] = h1.astype(jnp.bfloat16).reshape(H, W, width)

    # conv2 (3x3): nine shifted-view MXU matmuls accumulated in f32
    hp = h1p_ref[...]                                           # (H+2, W+2, width) bf16
    acc = jnp.zeros((H * W, width), jnp.float32)
    for ky in range(3):
        for kx in range(3):
            tap = hp[ky:ky + H, kx:kx + W, :].reshape(H * W, width)
            acc = acc + jnp.dot(tap, w2_ref[ky * 3 + kx],
                                preferred_element_type=jnp.float32)
    h2 = jnp.maximum(acc + b2_ref[...], 0.0)

    # conv3 (1x1) + bn3, residual add, ReLU
    h3 = jnp.dot(h2.astype(jnp.bfloat16), w3_ref[...],
                 preferred_element_type=jnp.float32) + b3_ref[...]
    out = jnp.maximum(h3 + x_flat, 0.0)

    # bf16 write straight into the persistent layer-memory slot (lane-dense)
    ctx_out_ref[...] = out.astype(jnp.bfloat16).reshape(H, W, C)
    # fused GAP: cached per-layer attention descriptor (no feature-map re-read)
    gap_ref[...] = jnp.mean(out, axis=0, keepdims=True)


def _fused_bottleneck(x_nhwc, ctx_buf, layer_slot, params):
    B, H, W, C = x_nhwc.shape
    T_max = ctx_buf.shape[1]
    width = params["b1"].shape[1]

    return pl.pallas_call(
        _fused_bottleneck_kernel,
        out_shape=(jax.ShapeDtypeStruct((B, T_max, H, W, C), jnp.bfloat16),
                   jax.ShapeDtypeStruct((B, 1, C), jnp.float32)),
        grid=(B,),
        in_specs=[
            pl.BlockSpec((None, H, W, C), lambda b: (b, 0, 0, 0)),
            pl.BlockSpec((C, width), lambda b: (0, 0)),
            pl.BlockSpec((1, width), lambda b: (0, 0)),
            pl.BlockSpec((9, width, width), lambda b: (0, 0, 0)),
            pl.BlockSpec((1, width), lambda b: (0, 0)),
            pl.BlockSpec((width, C), lambda b: (0, 0)),
            pl.BlockSpec((1, C), lambda b: (0, 0)),
            pl.BlockSpec(memory_space=pl.ANY),       # persistent ctx buffer (aliased)
        ],
        out_specs=(
            pl.BlockSpec((None, None, H, W, C), lambda b: (b, layer_slot, 0, 0, 0)),
            pl.BlockSpec((None, 1, C), lambda b: (b, 0, 0)),
        ),
        scratch_shapes=[pltpu.VMEM((H + 2, W + 2, width), jnp.bfloat16)],
        input_output_aliases={7: 0},                 # write slot t in-place, keep 0..t-1
        compiler_params=pltpu.CompilerParams(
            dimension_semantics=("parallel",),
            vmem_limit_bytes=_VMEM_LIMIT),
    )(x_nhwc, params["w1"], params["b1"], params["w2"], params["b2"],
      params["w3"], params["b3"], ctx_buf)


# ----------------------------------------------------------------------------
# Kernel 2 (layer attention): stream ctx (bf16) once, accumulate per-head
# weighted context sums on the VPU, then one MXU projection by the
# block-masked Wv at the end (+ bn_la bias).  grid = (batch, row-band, layer).
# ----------------------------------------------------------------------------
def _la_kernel(ctx_ref, p_ref, wvb_ref, bla_ref, y_ref, acc_ref):
    t = pl.program_id(2)

    @pl.when(t == 0)
    def _():
        acc_ref[...] = jnp.zeros_like(acc_ref)

    Hb, W, C = ctx_ref.shape
    nh = acc_ref.shape[-1] // C
    ctx_hw = ctx_ref[...].reshape(Hb * W, C).astype(jnp.float32)

    # per-head weighted accumulation: softmax weight is constant within a head,
    # so this is a lane-aligned scalar-broadcast FMA per head (pure VPU work).
    for h in range(nh):
        acc_ref[:, h * C:(h + 1) * C] += ctx_hw * p_ref[:, h * C:(h + 1) * C]

    @pl.when(t == pl.num_programs(2) - 1)
    def _():
        y = jnp.dot(acc_ref[...].astype(jnp.bfloat16), wvb_ref[...],
                    preferred_element_type=jnp.float32) + bla_ref[...]
        y_ref[...] = y.reshape(Hb, W, C)


def _ctx_block_spec(Hb, W, C):
    idx = lambda b, r, t: (b, t, r, 0, 0)
    try:
        # triple-buffer the small ctx blocks so DMA latency stays hidden
        return pl.BlockSpec((None, None, Hb, W, C), idx,
                            pipeline_mode=pl.Buffered(3))
    except Exception:
        return pl.BlockSpec((None, None, Hb, W, C), idx)


def _la_apply(ctx_buf, p_exp, wv_blk, b_la, t_count):
    B, T_max, H, W, C = ctx_buf.shape
    nhC = wv_blk.shape[0]
    bands = 2 if (H % 2 == 0 and (H // 2) * W >= 8) else 1   # v7x: feed both cores
    Hb = H // bands

    return pl.pallas_call(
        _la_kernel,
        out_shape=jax.ShapeDtypeStruct((B, H, W, C), jnp.float32),
        grid=(B, bands, t_count),
        in_specs=[
            _ctx_block_spec(Hb, W, C),
            pl.BlockSpec((None, None, 1, nhC), lambda b, r, t: (b, t, 0, 0)),
            pl.BlockSpec((nhC, C), lambda b, r, t: (0, 0)),
            pl.BlockSpec((1, C), lambda b, r, t: (0, 0)),
        ],
        out_specs=pl.BlockSpec((None, Hb, W, C), lambda b, r, t: (b, r, 0, 0)),
        scratch_shapes=[pltpu.VMEM((Hb * W, nhC), jnp.float32)],
        compiler_params=pltpu.CompilerParams(
            dimension_semantics=("parallel", "parallel", "arbitrary"),
            vmem_limit_bytes=_VMEM_LIMIT),
    )(ctx_buf, p_exp, wv_blk, b_la)


# ----------------------------------------------------------------------------
# Attention weights (tiny: operates on cached (B, T, C) GAP descriptors only)
# ----------------------------------------------------------------------------
def _attention_probs(gaps, wq, wk, dim_per_head):
    B, T, C = gaps.shape
    nh = C // dim_per_head
    q = jnp.dot(gaps[:, -1, :], wq)                       # query from the new layer
    k = jnp.einsum("btc,cd->btd", gaps, wk)
    qh = q.reshape(B, nh, dim_per_head)
    kh = k.reshape(B, T, nh, dim_per_head)
    logits = jnp.einsum("bnd,btnd->bnt", qh, kh) / math.sqrt(dim_per_head)
    p = jax.nn.softmax(logits, axis=-1)                   # (B, nh, T)
    p_layers = jnp.transpose(p, (0, 2, 1))                # (B, T, nh)
    # h*C + k layout expected by the LA kernel's per-head accumulator slabs
    p_exp = jnp.repeat(p_layers, C, axis=-1)              # (B, T, nh*C)
    return p_exp.reshape(B, T, 1, nh * C).astype(jnp.float32)


# ----------------------------------------------------------------------------
# Forward passes
# ----------------------------------------------------------------------------
def la_bottleneck_forward_nhwc(x_nhwc, ctx_buf, gaps, layer_slot, params,
                               dim_per_head=32):
    """NHWC forward.  ctx_buf: persistent (B, T_max, H, W, C) bf16 layer memory
    (slots [0, layer_slot) hold previous blocks); gaps: (B, layer_slot, C) f32
    cached GAP descriptors.  Returns (y, ctx_buf_updated, gaps_updated)."""
    B, H, W, C = x_nhwc.shape
    assert C == params["b3"].shape[1], "identity residual needs inplanes == planes*4"
    assert layer_slot < ctx_buf.shape[1], "persistent layer memory is full"

    ctx_new, gap = _fused_bottleneck(x_nhwc, ctx_buf, layer_slot, params)
    gaps_new = jnp.concatenate([gaps, gap.reshape(B, 1, C)], axis=1)

    p_exp = _attention_probs(gaps_new, params["wq"], params["wk"], dim_per_head)
    y = _la_apply(ctx_new, p_exp, params["wv_blk"], params["b_la"], layer_slot + 1)
    return y, ctx_new, gaps_new


def la_bottleneck_forward(x_nchw, mem, params, dim_per_head=32):
    """NCHW drop-in wrapper.  mem = (ctx_buf bf16, gaps f32, count).  In a full
    network keep everything NHWC and call la_bottleneck_forward_nhwc directly
    to avoid per-block layout round-trips."""
    ctx_buf, gaps, count = mem
    x_nhwc = jnp.transpose(x_nchw, (0, 2, 3, 1))
    y, ctx_new, gaps_new = la_bottleneck_forward_nhwc(
        x_nhwc, ctx_buf, gaps, count, params, dim_per_head)
    return jnp.transpose(y, (0, 3, 1, 2)), (ctx_new, gaps_new, count + 1)


# ----------------------------------------------------------------------------
# Deterministic parameters (BN folded host-side) + pure-jnp reference
# ----------------------------------------------------------------------------
def make_params(key, inplanes, planes, dim_per_head=32, base_width=64,
                groups=1, eps=1e-5):
    width = int(planes * (base_width / 64.0)) * groups
    cout = planes * 4
    nh = cout // dim_per_head
    ks = jax.random.split(key, 16)

    def conv_w(k, kh, kw, cin, co):
        fan_in = cin * kh * kw
        return jax.random.normal(k, (kh, kw, cin, co), jnp.float32) / math.sqrt(fan_in)

    def bn_fold(kg, kb, c):
        gamma = 1.0 + 0.1 * jax.random.normal(kg, (c,), jnp.float32)
        beta = 0.1 * jax.random.normal(kb, (c,), jnp.float32)
        return gamma / jnp.sqrt(1.0 + eps), beta

    s1, b1 = bn_fold(ks[3], ks[4], width)
    s2, b2 = bn_fold(ks[5], ks[6], width)
    s3, b3 = bn_fold(ks[7], ks[8], cout)
    s_la, b_la = bn_fold(ks[9], ks[10], cout)

    w1 = conv_w(ks[0], 1, 1, inplanes, width)[0, 0]
    w2 = conv_w(ks[1], 3, 3, width, width)
    w3 = conv_w(ks[2], 1, 1, width, cout)[0, 0]
    wq = jax.random.normal(ks[11], (cout, cout), jnp.float32) / math.sqrt(cout)
    wk = jax.random.normal(ks[12], (cout, cout), jnp.float32) / math.sqrt(cout)
    wv = jax.random.normal(ks[13], (cout, cout), jnp.float32) / math.sqrt(cout)

    wv_s = wv * s_la[None, :]                               # bn_la scale folded into Wv
    # block-masked Wv so a single (HW, nh*C)@(nh*C, C) matmul applies each
    # head's value projection to that head's weighted context sum only.
    wv_blk = jnp.zeros((nh * cout, cout), jnp.float32)
    for h in range(nh):
        wv_blk = wv_blk.at[h * cout:(h + 1) * cout,
                           h * dim_per_head:(h + 1) * dim_per_head].set(
            wv_s[:, h * dim_per_head:(h + 1) * dim_per_head])

    return {
        "w1": (w1 * s1[None, :]).astype(jnp.bfloat16),
        "b1": b1.reshape(1, width),
        "w2": (w2 * s2[None, None, None, :]).reshape(9, width, width).astype(jnp.bfloat16),
        "b2": b2.reshape(1, width),
        "w3": (w3 * s3[None, :]).astype(jnp.bfloat16),
        "b3": b3.reshape(1, cout),
        "wq": wq,
        "wk": wk,
        "wv_blk": wv_blk.astype(jnp.bfloat16),
        "b_la": b_la.reshape(1, cout),
        "wv_full": wv_s,                                    # reference check only
    }


def _reference_forward(x_nhwc, prev_feats, params, dim_per_head):
    """Pure-jnp f32 reference of the same forward (BN already folded)."""
    w1 = params["w1"].astype(jnp.float32)
    w2 = params["w2"].astype(jnp.float32)
    w3 = params["w3"].astype(jnp.float32)
    width = w1.shape[1]
    C = w3.shape[1]

    h1 = jnp.maximum(jnp.einsum("bhwc,cf->bhwf", x_nhwc, w1)
                     + params["b1"].reshape(-1), 0.0)
    h2 = jax.lax.conv_general_dilated(
        h1, w2.reshape(3, 3, width, width), (1, 1), "SAME",
        dimension_numbers=("NHWC", "HWIO", "NHWC"))
    h2 = jnp.maximum(h2 + params["b2"].reshape(-1), 0.0)
    h3 = jnp.einsum("bhwf,fc->bhwc", h2, w3) + params["b3"].reshape(-1)
    out = jnp.maximum(h3 + x_nhwc, 0.0)

    ctx = jnp.stack(prev_feats + [out], axis=1)             # (B, T, H, W, C)
    gaps = jnp.mean(ctx, axis=(2, 3))
    B, T, _ = gaps.shape
    nh = C // dim_per_head
    q = gaps[:, -1, :] @ params["wq"]
    k = jnp.einsum("btc,cd->btd", gaps, params["wk"])
    logits = jnp.einsum("bnd,btnd->bnt",
                        q.reshape(B, nh, dim_per_head),
                        k.reshape(B, T, nh, dim_per_head)) / math.sqrt(dim_per_head)
    p = jax.nn.softmax(logits, axis=-1)
    p_c = jnp.repeat(jnp.transpose(p, (0, 2, 1)), dim_per_head, axis=-1)  # (B, T, C)
    v = jnp.einsum("bthwc,cf->bthwf", ctx, params["wv_full"])
    return jnp.sum(p_c[:, :, None, None, :] * v, axis=1) + params["b_la"].reshape(-1)


if __name__ == "__main__":
    B, H, W = 2, 16, 16
    planes = 32
    inplanes = planes * 4          # 128: identity residual, lane-dense channels
    dim_per_head = 32              # 4 heads over C = 128
    T_max = 4                      # persistent layer-memory capacity

    key = jax.random.PRNGKey(0)
    k_x, k_m1, k_m2, k_p = jax.random.split(key, 4)

    params = make_params(k_p, inplanes, planes, dim_per_head=dim_per_head)
    cout = planes * 4

    # two previous blocks' outputs stored bf16 in the persistent ctx buffer
    ctx_buf = jnp.zeros((B, T_max, H, W, cout), jnp.bfloat16)
    prev_feats = []
    for i, km in enumerate((k_m1, k_m2)):
        f = jax.random.normal(km, (B, H, W, cout), jnp.float32).astype(jnp.bfloat16)
        ctx_buf = ctx_buf.at[:, i].set(f)
        prev_feats.append(f.astype(jnp.float32))
    gaps = jnp.stack([jnp.mean(f, axis=(1, 2)) for f in prev_feats], axis=1)
    mem = (ctx_buf, gaps, 2)

    x = jax.random.normal(k_x, (B, inplanes, H, W), jnp.float32)   # NCHW like PyTorch

    y_nchw, (ctx_new, gaps_new, t_count) = la_bottleneck_forward(
        x, mem, params, dim_per_head)
    jax.block_until_ready(y_nchw)
    jax.block_until_ready(ctx_new)

    assert y_nchw.shape == (B, cout, H, W)
    assert t_count == 3 and gaps_new.shape == (B, 3, cout)
    # aliased slot write must leave the previous layers' memory untouched
    assert bool(jnp.array_equal(ctx_new[:, :2], ctx_buf[:, :2]))

    # numerical sanity vs. the pure-jnp f32 reference (bf16 matmul tolerance)
    x_nhwc = jnp.transpose(x, (0, 2, 3, 1))
    y_ref = _reference_forward(x_nhwc, prev_feats, params, dim_per_head)
    y_nhwc = jnp.transpose(y_nchw, (0, 2, 3, 1))
    rel = float(jnp.linalg.norm(y_nhwc - y_ref) / (jnp.linalg.norm(y_ref) + 1e-6))
    assert rel < 5e-2, f"relative error too large: {rel}"

    print("KERNEL_OK")
</pallas_src>

<mosaic_0001>
module attributes {stable_mosaic.version = 11 : i64} {
  func.func @_fused_bottleneck_kernel(%arg0: i32, %arg1: memref<1x16x16x128xf32, #tpu.memory_space<vmem>>, %arg2: memref<128x32xbf16, #tpu.memory_space<vmem>>, %arg3: memref<1x32xf32, #tpu.memory_space<vmem>>, %arg4: memref<9x32x32xbf16, #tpu.memory_space<vmem>>, %arg5: memref<1x32xf32, #tpu.memory_space<vmem>>, %arg6: memref<32x128xbf16, #tpu.memory_space<vmem>>, %arg7: memref<1x128xf32, #tpu.memory_space<vmem>>, %arg8: memref<2x4x16x16x128xbf16, #tpu.memory_space<any>>, %arg9: memref<1x1x16x16x128xbf16, #tpu.memory_space<vmem>>, %arg10: memref<1x1x128xf32, #tpu.memory_space<vmem>>, %arg11: memref<18x18x32xbf16, #tpu.memory_space<vmem>>) attributes {dimension_semantics = [#tpu.dimension_semantics<parallel>], iteration_bounds = array<i64: 2>, scalar_prefetch = 0 : i64, scratch_operands = 1 : i64, tpu.core_type = #tpu.core_type<tc>, window_params = [{transform_indices = @transform_0, window_bounds = array<i64: 1, 16, 16, 128>}, {pipeline_mode = #tpu.pipeline_mode<synchronous>, transform_indices = @transform_1, window_bounds = array<i64: 128, 32>}, {pipeline_mode = #tpu.pipeline_mode<synchronous>, transform_indices = @transform_2, window_bounds = array<i64: 1, 32>}, {pipeline_mode = #tpu.pipeline_mode<synchronous>, transform_indices = @transform_3, window_bounds = array<i64: 9, 32, 32>}, {pipeline_mode = #tpu.pipeline_mode<synchronous>, transform_indices = @transform_4, window_bounds = array<i64: 1, 32>}, {pipeline_mode = #tpu.pipeline_mode<synchronous>, transform_indices = @transform_5, window_bounds = array<i64: 32, 128>}, {pipeline_mode = #tpu.pipeline_mode<synchronous>, transform_indices = @transform_6, window_bounds = array<i64: 1, 128>}, {}, {transform_indices = @transform_8, window_bounds = array<i64: 1, 1, 16, 16, 128>}, {transform_indices = @transform_9, window_bounds = array<i64: 1, 1, 128>}]} {
    %c0 = arith.constant 0 : index
    %c0_0 = arith.constant 0 : index
    %c0_1 = arith.constant 0 : index
    %c0_2 = arith.constant 0 : index
    %0 = vector.load %arg1[%c0, %c0_0, %c0_1, %c0_2] : memref<1x16x16x128xf32, #tpu.memory_space<vmem>>, vector<1x16x16x128xf32>
    %1 = vector.shape_cast %0 : vector<1x16x16x128xf32> to vector<16x16x128xf32>
    %2 = vector.shape_cast %1 : vector<16x16x128xf32> to vector<256x128xf32>
    %3 = arith.truncf %2 : vector<256x128xf32> to vector<256x128xbf16>
    %c0_3 = arith.constant 0 : index
    %c0_4 = arith.constant 0 : index
    %4 = vector.load %arg2[%c0_3, %c0_4] : memref<128x32xbf16, #tpu.memory_space<vmem>>, vector<128x32xbf16>
    %cst = arith.constant dense<0.000000e+00> : vector<256x32xf32>
    %5 = tpu.matmul %3, %4, %cst {dimension_numbers = #tpu.dot_dimension_numbers<[1], [0], [0], [1], [0, 0, 1, 1], [], []>} : vector<256x128xbf16>, vector<128x32xbf16>, vector<256x32xf32> -> vector<256x32xf32>
    %c0_5 = arith.constant 0 : index
    %c0_6 = arith.constant 0 : index
    %6 = vector.load %arg3[%c0_5, %c0_6] : memref<1x32xf32, #tpu.memory_space<vmem>>, vector<1x32xf32>
    %7 = vector.broadcast %6 : vector<1x32xf32> to vector<256x32xf32>
    %8 = arith.addf %5, %7 : vector<256x32xf32>
    %cst_7 = arith.constant 0.000000e+00 : f32
    %9 = vector.broadcast %cst_7 : f32 to vector<256x32xf32>
    %10 = arith.maximumf %8, %9 : vector<256x32xf32>
    %cst_8 = arith.constant 0.000000e+00 : bf16
    %11 = vector.broadcast %cst_8 : bf16 to vector<18x18x32xbf16>
    %c0_9 = arith.constant 0 : index
    %c0_10 = arith.constant 0 : index
    %c0_11 = arith.constant 0 : index
    %12 = vector.load %arg11[%c0_9, %c0_10, %c0_11] : memref<18x18x32xbf16, #tpu.memory_space<vmem>>, vector<18x18x32xbf16>
    tpu.vector_store %arg11[%c0_9, %c0_10, %c0_11], %11 {strides = array<i32>} : memref<18x18x32xbf16, #tpu.memory_space<vmem>>, vector<18x18x32xbf16>,
    %13 = arith.truncf %10 : vector<256x32xf32> to vector<256x32xbf16>
    %14 = vector.shape_cast %13 : vector<256x32xbf16> to vector<16x16x32xbf16>
    %c1 = arith.constant 1 : index
    %c1_12 = arith.constant 1 : index
    %c0_13 = arith.constant 0 : index
    %15 = vector.load %arg11[%c1, %c1_12, %c0_13] : memref<18x18x32xbf16, #tpu.memory_space<vmem>>, vector<16x16x32xbf16>
    tpu.vector_store %arg11[%c1, %c1_12, %c0_13], %14 {strides = array<i32>} : memref<18x18x32xbf16, #tpu.memory_space<vmem>>, vector<16x16x32xbf16>,
    %c0_14 = arith.constant 0 : index
    %c0_15 = arith.constant 0 : index
    %c0_16 = arith.constant 0 : index
    %16 = vector.load %arg11[%c0_14, %c0_15, %c0_16] : memref<18x18x32xbf16, #tpu.memory_space<vmem>>, vector<18x18x32xbf16>
    %cst_17 = arith.constant 0.000000e+00 : f32
    %17 = vector.broadcast %cst_17 : f32 to vector<256x32xf32>
    %18 = vector.extract_strided_slice %16 {offsets = [0, 0, 0], sizes = [16, 16, 32], strides = [1, 1, 1]} : vector<18x18x32xbf16> to vector<16x16x32xbf16>
    %19 = vector.shape_cast %18 : vector<16x16x32xbf16> to vector<256x32xbf16>
    %c0_18 = arith.constant 0 : index
    %c0_19 = arith.constant 0 : index
    %c0_20 = arith.constant 0 : index
    %20 = vector.load %arg4[%c0_18, %c0_19, %c0_20] : memref<9x32x32xbf16, #tpu.memory_space<vmem>>, vector<1x32x32xbf16>
    %21 = vector.shape_cast %20 : vector<1x32x32xbf16> to vector<32x32xbf16>
    %cst_21 = arith.constant dense<0.000000e+00> : vector<256x32xf32>
    %22 = tpu.matmul %19, %21, %cst_21 {dimension_numbers = #tpu.dot_dimension_numbers<[1], [0], [0], [1], [0, 0, 1, 1], [], []>} : vector<256x32xbf16>, vector<32x32xbf16>, vector<256x32xf32> -> vector<256x32xf32>
    %23 = arith.addf %17, %22 : vector<256x32xf32>
    %24 = vector.extract_strided_slice %16 {offsets = [0, 1, 0], sizes = [16, 16, 32], strides = [1, 1, 1]} : vector<18x18x32xbf16> to vector<16x16x32xbf16>
    %25 = vector.shape_cast %24 : vector<16x16x32xbf16> to vector<256x32xbf16>
    %c1_22 = arith.constant 1 : index
    %c0_23 = arith.constant 0 : index
    %c0_24 = arith.constant 0 : index
    %26 = vector.load %arg4[%c1_22, %c0_23, %c0_24] : memref<9x32x32xbf16, #tpu.memory_space<vmem>>, vector<1x32x32xbf16>
    %27 = vector.shape_cast %26 : vector<1x32x32xbf16> to vector<32x32xbf16>
    %cst_25 = arith.constant dense<0.000000e+00> : vector<256x32xf32>
    %28 = tpu.matmul %25, %27, %cst_25 {dimension_numbers = #tpu.dot_dimension_numbers<[1], [0], [0], [1], [0, 0, 1, 1], [], []>} : vector<256x32xbf16>, vector<32x32xbf16>, vector<256x32xf32> -> vector<256x32xf32>
    %29 = arith.addf %23, %28 : vector<256x32xf32>
    %30 = vector.extract_strided_slice %16 {offsets = [0, 2, 0], sizes = [16, 16, 32], strides = [1, 1, 1]} : vector<18x18x32xbf16> to vector<16x16x32xbf16>
    %31 = vector.shape_cast %30 : vector<16x16x32xbf16> to vector<256x32xbf16>
    %c2 = arith.constant 2 : index
    %c0_26 = arith.constant 0 : index
    %c0_27 = arith.constant 0 : index
    %32 = vector.load %arg4[%c2, %c0_26, %c0_27] : memref<9x32x32xbf16, #tpu.memory_space<vmem>>, vector<1x32x32xbf16>
    %33 = vector.shape_cast %32 : vector<1x32x32xbf16> to vector<32x32xbf16>
    %cst_28 = arith.constant dense<0.000000e+00> : vector<256x32xf32>
    %34 = tpu.matmul %31, %33, %cst_28 {dimension_numbers = #tpu.dot_dimension_numbers<[1], [0], [0], [1], [0, 0, 1, 1], [], []>} : vector<256x32xbf16>, vector<32x32xbf16>, vector<256x32xf32> -> vector<256x32xf32>
    %35 = arith.addf %29, %34 : vector<256x32xf32>
    %36 = vector.extract_strided_slice %16 {offsets = [1, 0, 0], sizes = [16, 16, 32], strides = [1, 1, 1]} : vector<18x18x32xbf16> to vector<16x16x32xbf16>
    %37 = vector.shape_cast %36 : vector<16x16x32xbf16> to vector<256x32xbf16>
    %c3 = arith.constant 3 : index
    %c0_29 = arith.constant 0 : index
    %c0_30 = arith.constant 0 : index
    %38 = vector.load %arg4[%c3, %c0_29, %c0_30] : memref<9x32x32xbf16, #tpu.memory_space<vmem>>, vector<1x32x32xbf16>
    %39 = vector.shape_cast %38 : vector<1x32x32xbf16> to vector<32x32xbf16>
    %cst_31 = arith.constant dense<0.000000e+00> : vector<256x32xf32>
    %40 = tpu.matmul %37, %39, %cst_31 {dimension_numbers = #tpu.dot_dimension_numbers<[1], [0], [0], [1], [0, 0, 1, 1], [], []>} : vector<256x32xbf16>, vector<32x32xbf16>, vector<256x32xf32> -> vector<256x32xf32>
    %41 = arith.addf %35, %40 : vector<256x32xf32>
    %42 = vector.extract_strided_slice %16 {offsets = [1, 1, 0], sizes = [16, 16, 32], strides = [1, 1, 1]} : vector<18x18x32xbf16> to vector<16x16x32xbf16>
    %43 = vector.shape_cast %42 : vector<16x16x32xbf16> to vector<256x32xbf16>
    %c4 = arith.constant 4 : index
    %c0_32 = arith.constant 0 : index
    %c0_33 = arith.constant 0 : index
    %44 = vector.load %arg4[%c4, %c0_32, %c0_33] : memref<9x32x32xbf16, #tpu.memory_space<vmem>>, vector<1x32x32xbf16>
    %45 = vector.shape_cast %44 : vector<1x32x32xbf16> to vector<32x32xbf16>
    %cst_34 = arith.constant dense<0.000000e+00> : vector<256x32xf32>
    %46 = tpu.matmul %43, %45, %cst_34 {dimension_numbers = #tpu.dot_dimension_numbers<[1], [0], [0], [1], [0, 0, 1, 1], [], []>} : vector<256x32xbf16>, vector<32x32xbf16>, vector<256x32xf32> -> vector<256x32xf32>
    %47 = arith.addf %41, %46 : vector<256x32xf32>
    %48 = vector.extract_strided_slice %16 {offsets = [1, 2, 0], sizes = [16, 16, 32], strides = [1, 1, 1]} : vector<18x18x32xbf16> to vector<16x16x32xbf16>
    %49 = vector.shape_cast %48 : vector<16x16x32xbf16> to vector<256x32xbf16>
    %c5 = arith.constant 5 : index
    %c0_35 = arith.constant 0 : index
    %c0_36 = arith.constant 0 : index
    %50 = vector.load %arg4[%c5, %c0_35, %c0_36] : memref<9x32x32xbf16, #tpu.memory_space<vmem>>, vector<1x32x32xbf16>
    %51 = vector.shape_cast %50 : vector<1x32x32xbf16> to vector<32x32xbf16>
    %cst_37 = arith.constant dense<0.000000e+00> : vector<256x32xf32>
    %52 = tpu.matmul %49, %51, %cst_37 {dimension_numbers = #tpu.dot_dimension_numbers<[1], [0], [0], [1], [0, 0, 1, 1], [], []>} : vector<256x32xbf16>, vector<32x32xbf16>, vector<256x32xf32> -> vector<256x32xf32>
    %53 = arith.addf %47, %52 : vector<256x32xf32>
    %54 = vector.extract_strided_slice %16 {offsets = [2, 0, 0], sizes = [16, 16, 32], strides = [1, 1, 1]} : vector<18x18x32xbf16> to vector<16x16x32xbf16>
    %55 = vector.shape_cast %54 : vector<16x16x32xbf16> to vector<256x32xbf16>
    %c6 = arith.constant 6 : index
    %c0_38 = arith.constant 0 : index
    %c0_39 = arith.constant 0 : index
    %56 = vector.load %arg4[%c6, %c0_38, %c0_39] : memref<9x32x32xbf16, #tpu.memory_space<vmem>>, vector<1x32x32xbf16>
    %57 = vector.shape_cast %56 : vector<1x32x32xbf16> to vector<32x32xbf16>
    %cst_40 = arith.constant dense<0.000000e+00> : vector<256x32xf32>
    %58 = tpu.matmul %55, %57, %cst_40 {dimension_numbers = #tpu.dot_dimension_numbers<[1], [0], [0], [1], [0, 0, 1, 1], [], []>} : vector<256x32xbf16>, vector<32x32xbf16>, vector<256x32xf32> -> vector<256x32xf32>
    %59 = arith.addf %53, %58 : vector<256x32xf32>
    %60 = vector.extract_strided_slice %16 {offsets = [2, 1, 0], sizes = [16, 16, 32], strides = [1, 1, 1]} : vector<18x18x32xbf16> to vector<16x16x32xbf16>
    %61 = vector.shape_cast %60 : vector<16x16x32xbf16> to vector<256x32xbf16>
    %c7 = arith.constant 7 : index
    %c0_41 = arith.constant 0 : index
    %c0_42 = arith.constant 0 : index
    %62 = vector.load %arg4[%c7, %c0_41, %c0_42] : memref<9x32x32xbf16, #tpu.memory_space<vmem>>, vector<1x32x32xbf16>
    %63 = vector.shape_cast %62 : vector<1x32x32xbf16> to vector<32x32xbf16>
    %cst_43 = arith.constant dense<0.000000e+00> : vector<256x32xf32>
    %64 = tpu.matmul %61, %63, %cst_43 {dimension_numbers = #tpu.dot_dimension_numbers<[1], [0], [0], [1], [0, 0, 1, 1], [], []>} : vector<256x32xbf16>, vector<32x32xbf16>, vector<256x32xf32> -> vector<256x32xf32>
    %65 = arith.addf %59, %64 : vector<256x32xf32>
    %66 = vector.extract_strided_slice %16 {offsets = [2, 2, 0], sizes = [16, 16, 32], strides = [1, 1, 1]} : vector<18x18x32xbf16> to vector<16x16x32xbf16>
    %67 = vector.shape_cast %66 : vector<16x16x32xbf16> to vector<256x32xbf16>
    %c8 = arith.constant 8 : index
    %c0_44 = arith.constant 0 : index
    %c0_45 = arith.constant 0 : index
    %68 = vector.load %arg4[%c8, %c0_44, %c0_45] : memref<9x32x32xbf16, #tpu.memory_space<vmem>>, vector<1x32x32xbf16>
    %69 = vector.shape_cast %68 : vector<1x32x32xbf16> to vector<32x32xbf16>
    %cst_46 = arith.constant dense<0.000000e+00> : vector<256x32xf32>
    %70 = tpu.matmul %67, %69, %cst_46 {dimension_numbers = #tpu.dot_dimension_numbers<[1], [0], [0], [1], [0, 0, 1, 1], [], []>} : vector<256x32xbf16>, vector<32x32xbf16>, vector<256x32xf32> -> vector<256x32xf32>
    %71 = arith.addf %65, %70 : vector<256x32xf32>
    %c0_47 = arith.constant 0 : index
    %c0_48 = arith.constant 0 : index
    %72 = vector.load %arg5[%c0_47, %c0_48] : memref<1x32xf32, #tpu.memory_space<vmem>>, vector<1x32xf32>
    %73 = vector.broadcast %72 : vector<1x32xf32> to vector<256x32xf32>
    %74 = arith.addf %71, %73 : vector<256x32xf32>
    %cst_49 = arith.constant 0.000000e+00 : f32
    %75 = vector.broadcast %cst_49 : f32 to vector<256x32xf32>
    %76 = arith.maximumf %74, %75 : vector<256x32xf32>
    %77 = arith.truncf %76 : vector<256x32xf32> to vector<256x32xbf16>
    %c0_50 = arith.constant 0 : index
    %c0_51 = arith.constant 0 : index
    %78 = vector.load %arg6[%c0_50, %c0_51] : memref<32x128xbf16, #tpu.memory_space<vmem>>, vector<32x128xbf16>
    %cst_52 = arith.constant dense<0.000000e+00> : vector<256x128xf32>
    %79 = tpu.matmul %77, %78, %cst_52 {dimension_numbers = #tpu.dot_dimension_numbers<[1], [0], [0], [1], [0, 0, 1, 1], [], []>} : vector<256x32xbf16>, vector<32x128xbf16>, vector<256x128xf32> -> vector<256x128xf32>
    %c0_53 = arith.constant 0 : index
    %c0_54 = arith.constant 0 : index
    %80 = vector.load %arg7[%c0_53, %c0_54] : memref<1x128xf32, #tpu.memory_space<vmem>>, vector<1x128xf32>
    %81 = vector.broadcast %80 : vector<1x128xf32> to vector<256x128xf32>
    %82 = arith.addf %79, %81 : vector<256x128xf32>
    %83 = arith.addf %82, %2 : vector<256x128xf32>
    %cst_55 = arith.constant 0.000000e+00 : f32
    %84 = vector.broadcast %cst_55 : f32 to vector<256x128xf32>
    %85 = arith.maximumf %83, %84 : vector<256x128xf32>
    %86 = arith.truncf %85 : vector<256x128xf32> to vector<256x128xbf16>
    %87 = vector.shape_cast %86 : vector<256x128xbf16> to vector<16x16x128xbf16>
    %c0_56 = arith.constant 0 : index
    %c0_57 = arith.constant 0 : index
    %c0_58 = arith.constant 0 : index
    %c0_59 = arith.constant 0 : index
    %c0_60 = arith.constant 0 : index
    %88 = vector.load %arg9[%c0_56, %c0_57, %c0_58, %c0_59, %c0_60] : memref<1x1x16x16x128xbf16, #tpu.memory_space<vmem>>, vector<1x1x16x16x128xbf16>
    %89 = vector.shape_cast %88 : vector<1x1x16x16x128xbf16> to vector<16x16x128xbf16>
    %90 = vector.shape_cast %87 : vector<16x16x128xbf16> to vector<1x1x16x16x128xbf16>
    tpu.vector_store %arg9[%c0_56, %c0_57, %c0_58, %c0_59, %c0_60], %90 {strides = array<i32>} : memref<1x1x16x16x128xbf16, #tpu.memory_space<vmem>>, vector<1x1x16x16x128xbf16>,
    %cst_61 = arith.constant dense<0.000000e+00> : vector<128xf32>
    %91 = vector.multi_reduction <add>, %85, %cst_61 [0] : vector<256x128xf32> to vector<128xf32>
    %92 = vector.shape_cast %91 : vector<128xf32> to vector<1x128xf32>
    %cst_62 = arith.constant 2.560000e+02 : f32
    %93 = vector.broadcast %cst_62 : f32 to vector<1x128xf32>
    %94 = arith.divf %92, %93 : vector<1x128xf32>
    %c0_63 = arith.constant 0 : index
    %c0_64 = arith.constant 0 : index
    %c0_65 = arith.constant 0 : index
    %95 = vector.load %arg10[%c0_63, %c0_64, %c0_65] : memref<1x1x128xf32, #tpu.memory_space<vmem>>, vector<1x1x128xf32>
    %96 = vector.shape_cast %95 : vector<1x1x128xf32> to vector<1x128xf32>
    %97 = vector.shape_cast %94 : vector<1x128xf32> to vector<1x1x128xf32>
    tpu.vector_store %arg10[%c0_63, %c0_64, %c0_65], %97 {strides = array<i32>} : memref<1x1x128xf32, #tpu.memory_space<vmem>>, vector<1x1x128xf32>,
    return
  }
  func.func @transform_0(%arg0: i32) -> (i32, i32, i32, i32) {
    %c0_i32 = arith.constant 0 : i32
    %c0_i32_0 = arith.constant 0 : i32
    %c0_i32_1 = arith.constant 0 : i32
    %c0_i32_2 = arith.constant 0 : i32
    return %arg0, %c0_i32, %c0_i32_0, %c0_i32_1 : i32, i32, i32, i32
  }
  func.func @transform_1(%arg0: i32) -> (i32, i32) {
    %c0_i32 = arith.constant 0 : i32
    %c0_i32_0 = arith.constant 0 : i32
    %c0_i32_1 = arith.constant 0 : i32
    return %c0_i32, %c0_i32_0 : i32, i32
  }
  func.func @transform_2(%arg0: i32) -> (i32, i32) {
    %c0_i32 = arith.constant 0 : i32
    %c0_i32_0 = arith.constant 0 : i32
    %c0_i32_1 = arith.constant 0 : i32
    return %c0_i32, %c0_i32_0 : i32, i32
  }
  func.func @transform_3(%arg0: i32) -> (i32, i32, i32) {
    %c0_i32 = arith.constant 0 : i32
    %c0_i32_0 = arith.constant 0 : i32
    %c0_i32_1 = arith.constant 0 : i32
    %c0_i32_2 = arith.constant 0 : i32
    return %c0_i32, %c0_i32_0, %c0_i32_1 : i32, i32, i32
  }
  func.func @transform_4(%arg0: i32) -> (i32, i32) {
    %c0_i32 = arith.constant 0 : i32
    %c0_i32_0 = arith.constant 0 : i32
    %c0_i32_1 = arith.constant 0 : i32
    return %c0_i32, %c0_i32_0 : i32, i32
  }
  func.func @transform_5(%arg0: i32) -> (i32, i32) {
    %c0_i32 = arith.constant 0 : i32
    %c0_i32_0 = arith.constant 0 : i32
    %c0_i32_1 = arith.constant 0 : i32
    return %c0_i32, %c0_i32_0 : i32, i32
  }
  func.func @transform_6(%arg0: i32) -> (i32, i32) {
    %c0_i32 = arith.constant 0 : i32
    %c0_i32_0 = arith.constant 0 : i32
    %c0_i32_1 = arith.constant 0 : i32
    return %c0_i32, %c0_i32_0 : i32, i32
  }
  func.func @transform_8(%arg0: i32) -> (i32, i32, i32, i32, i32) {
    %c2_i32 = arith.constant 2 : i32
    %c0_i32 = arith.constant 0 : i32
    %c0_i32_0 = arith.constant 0 : i32
    %c0_i32_1 = arith.constant 0 : i32
    %c0_i32_2 = arith.constant 0 : i32
    return %arg0, %c2_i32, %c0_i32, %c0_i32_0, %c0_i32_1 : i32, i32, i32, i32, i32
  }
  func.func @transform_9(%arg0: i32) -> (i32, i32, i32) {
    %c0_i32 = arith.constant 0 : i32
    %c0_i32_0 = arith.constant 0 : i32
    %c0_i32_1 = arith.constant 0 : i32
    return %arg0, %c0_i32, %c0_i32_0 : i32, i32, i32
  }
}

</mosaic_0001>

<bundles_post_ra>
// kernel: tpu_custom_call.1
= control target key start
LH: loop header
LB: loop body
LE: loop exit
PB: predicated region body
PF: predicated region fallthrough
CT: control target
= control target key end

     0   :  { %15 = vsyncpa [#allocation4], 0  ;;  %s8019_s0 = inlined_call_operand.vmem [shape: f32[2,16,16,128], index: 0, kind: input, shape index: {}]   ;;  %s8020_s1 = inlined_call_operand.vmem [shape: bf16[128,32], index: 1, kind: input, shape index: {}]   ;;  %s8021_s2 = inlined_call_operand.vmem [shape: f32[1,32], index: 2, kind: input, shape index: {}]   ;;  %s8022_s3 = inlined_call_operand.vmem [shape: bf16[9,32,32], index: 3, kind: input, shape index: {}]   ;;  %s8023_s4 = inlined_call_operand.vmem [shape: f32[1,32], index: 4, kind: input, shape index: {}]   ;;  %s8024_s5 = inlined_call_operand.vmem [shape: bf16[32,128], index: 5, kind: input, shape index: {}]   ;;  %s8025_s6 = inlined_call_operand.vmem [shape: f32[1,128], index: 6, kind: input, shape index: {}]   ;;  %s8026_s7 = inlined_call_operand.hbm [shape: bf16[2,4,16,16,128], index: 7, kind: input, shape index: {}, may-alias: {7,8}]   ;;  %s8027_s8 = inlined_call_operand.hbm [shape: bf16[2,4,16,16,128], index: 8, kind: output, shape index: {0}, may-alias: {7,8}]   ;;  %s8028_s9 = inlined_call_operand.hbm [shape: f32[2,1,128], index: 9, kind: output, shape index: {1}]  }
   0x1   :  { %17 = vsyncpa [#allocation4 + $0x1], 0 }
   0x2   :  { %18 = vsyncpa [#allocation6], 0 }
   0x3   :  { %20 = vsyncpa [#allocation6 + $0x1], 0  ;;  %s6448_s30 = smov 0   ;;  %s6450_s10 = smov 0  }
   0x4   :  { %s6452_s11 = smov 0   ;;  %s6454_s12 = smov 0  }
   0x5 LB: > { %s6469_s7 = sadd.s32 4294967295, %s6391_s12   ;;  %s4750_s13 = sadd.s32 4294967294, %s6391_s12   ;;  %s6391_s12 = sphi %s6454_s12, %s8127_s12   ;;  %s6387_s11 = sphi %s6452_s11, %s8126_s11   ;;  %s6383_s10 = sphi %s6450_s10, %s8125_s10   ;;  %s6379_s30 = sphi %s6448_s30, %s8124_s30  }
   0x6   : > { %s6473_s14 = sadd.s32 1, %s6391_s12   ;;  %s185_s15 = sadd.s32 1, %s6387_s11 }
   0x7   : > { %s182_s16 = ssub.s32 %s6391_s12, %s6473_s14  ;;  %p195_p0 = scmp.ne.s32.totalorder %s6387_s11, %s6383_s10 }
   0x8   : > { %p183_p1 = scmp.eq.s32.totalorder %s182_s16, 0  ;;  %p196_p2 = scmp.eq.s32.totalorder %s6469_s7, 1 }
   0x9   : > { %p201_p3 = scmp.ne.s32.totalorder %s6383_s10, %s6379_s30  ;;  %p202_p4 = scmp.eq.s32.totalorder %s4750_s13, 1 }
   0xa   : > { %s6484_s17 = scalar_select %p183_p1, %s6387_s11, %s185_s15  }
   0xb   : > { %p6486_p5 = por %p196_p2, %p195_p0  ;;  %p6490_p6 = por %p202_p4, %p201_p3 }
   0xc   : > { %p4753_p7 = scmp.ge.s32.totalorder %s6391_s12, 1  ;;  %p272_p8 = scmp.lt.s32.totalorder %s6391_s12, 3 }
   0xe   : > { %p273_p9 = pnand %p4753_p7, %p272_p8 }
  0x10   : > { %276 = sbr.rel (%p273_p9) target bundleno = 1218 (0x4c2), region = 48 }
  0x17   : > { %v6202_v0 = vld [vmem:[%s8020_s1] sm:$0xff]   ;;  %p310_p10 = scmp.lt.s32.totalorder %s6469_s7, 1  ;;  %v6203_v1 = vld [vmem:[%s8020_s1 + $0x8] sm:$0xff]   ;;  %v6204_v2 = vld [vmem:[%s8020_s1 + $0x10] sm:$0xff]   ;;  %vm628_vm0 = vcmask 257024   ;;  %v6393_v56 = vmov 0  }
  0x18   : > { %5487 = vmatprep.subr.bf16.mxu0 %v6202_v0  ;;  %v6205_v3 = vld [vmem:[%s8020_s1 + $0x18] sm:$0xff]   ;;  %v6206_v7 = vld [vmem:[%s8020_s1 + $0x20] sm:$0xff]   ;;  %v6207_v8 = vld [vmem:[%s8020_s1 + $0x28] sm:$0xff]   ;;  %636 = vst.msk [vmem:[#allocation2 + $0x18] sm:$0xf] %vm628_vm0, %v6393_v56  ;;  %vm631_vm1 = vcmask 253952  }
  0x19   : > { %s311_s24 = scalar_select %p310_p10, %s6469_s7, 1  ;;  %5488 = vmatpush3.bf16.msra.mxu0 %v6202_v0  ;;  %v6208_v9 = vld [vmem:[%s8020_s1 + $0x30] sm:$0xff]   ;;  %v6209_v10 = vld [vmem:[%s8020_s1 + $0x38] sm:$0xff]   ;;  %629 = vst.msk [vmem:[#allocation2] sm:$0xf] %vm628_vm0, %v6393_v56  ;;  %vm1731_vm5 = vcmask 261120  }
  0x1a   : > { %5489 = vmatprep.subr.bf16.mxu0 %v6203_v1  ;;  %630 = vst.msk [vmem:[#allocation2 + $0x4] sm:$0xf] %vm628_vm0, %v6393_v56  ;;  %633 = vst.msk [vmem:[#allocation2 + $0xc] sm:$0xf] %vm628_vm0, %v6393_v56  ;;  %v6210_v57 = vld [vmem:[%s8022_s3 + $0x10] sm:$0xff]   ;;  %v6211_v0 = vld [vmem:[%s8022_s3 + $0x18] sm:$0xff]  }
  0x1b   : > { %s5122_s27 = sshll.u32 %s311_s24, 8  ;;  %634 = vst.msk [vmem:[#allocation2 + $0x10] sm:$0xf] %vm628_vm0, %v6393_v56  ;;  %637 = vst.msk [vmem:[#allocation2 + $0x1c] sm:$0xf] %vm628_vm0, %v6393_v56  ;;  %vm2258_vm12 = vcmask 1042432  }
  0x1c   : > { %s6510_s13 = scalar_lea.vmem %s8019_s0, %s5122_s27  ;;  %639 = vst.msk [vmem:[#allocation2 + $0x24] sm:$0xf] %vm628_vm0, %v6393_v56  ;;  %640 = vst.msk [vmem:[#allocation2 + $0x28] sm:$0xf] %vm628_vm0, %v6393_v56  ;;  %vm1279_vm2 = vsmask.f32 3328 }
  0x1d   : > { %5490 = vmatpush3.bf16.msra.mxu0 %v6203_v1  ;;  %v316_v4 = vld [vmem:[%s6510_s13] sm:$0xff]  ;;  %v317_v5 = vld [vmem:[%s6510_s13 + $0x8] sm:$0xff]  ;;  %v318_v11 = vld [vmem:[%s6510_s13 + $0x10] sm:$0xff]  ;;  %642 = vst.msk [vmem:[#allocation2 + $0x30] sm:$0xf] %vm628_vm0, %v6393_v56  ;;  %vm2259_vm13 = vcmask 1046532  }
  0x1e   : > { %5491 = vmatprep.subr.bf16.mxu0 %v6204_v2  ;;  %v348_v6 = vpack.c.bf16 %v317_v5, %v316_v4  ;;  %v319_v12 = vld [vmem:[%s6510_s13 + $0x18] sm:$0xff]  ;;  %v320_v13 = vld [vmem:[%s6510_s13 + $0x20] sm:$0xff]  ;;  %v321_v14 = vld [vmem:[%s6510_s13 + $0x28] sm:$0xff]  ;;  %643 = vst.msk [vmem:[#allocation2 + $0x34] sm:$0xf] %vm628_vm0, %v6393_v56  ;;  %s7856_s20 = sand.u32 1, %s6383_s10  }
  0x1f   : > { %v349_v15 = vpack.c.bf16 %v319_v12, %v318_v11  ;;  %v350_v16 = vpack.c.bf16 %v321_v14, %v320_v13  ;;  %v322_v17 = vld [vmem:[%s6510_s13 + $0x30] sm:$0xff]  ;;  %v323_v18 = vld [vmem:[%s6510_s13 + $0x38] sm:$0xff]  ;;  %v324_v19 = vld [vmem:[%s6510_s13 + $0x40] sm:$0xff]  ;;  %645 = vst.msk [vmem:[#allocation2 + $0x3c] sm:$0xf] %vm628_vm0, %v6393_v56  ;;  %s4754_s21 = sshll.u32 %s7856_s20, 7 }
  0x20   : > { %5503 = vmatprep.mubr.bf16.mxu0 %v348_v6  ;;  %v325_v20 = vld [vmem:[%s6510_s13 + $0x48] sm:$0xff]  ;;  %v351_v21 = vpack.c.bf16 %v323_v18, %v322_v17  ;;  %v326_v23 = vld [vmem:[%s6510_s13 + $0x50] sm:$0xff]  ;;  %v327_v24 = vld [vmem:[%s6510_s13 + $0x58] sm:$0xff]  ;;  %646 = vst.msk [vmem:[#allocation2 + $0x40] sm:$0xf] %vm628_vm0, %v6393_v56  ;;  %s7867_s22 = scalar_lea.vmem [#allocation3], %s4754_s21 }
  0x21   : > { %5492 = vmatpush3.bf16.msra.mxu0 %v6204_v2  ;;  %v352_v22 = vpack.c.bf16 %v325_v20, %v324_v19  ;;  %v328_v25 = vld [vmem:[%s6510_s13 + $0x60] sm:$0xff]  ;;  %v329_v26 = vld [vmem:[%s6510_s13 + $0x68] sm:$0xff]  ;;  %v353_v27 = vpack.c.bf16 %v327_v24, %v326_v23  ;;  %v330_v29 = vld [vmem:[%s6510_s13 + $0x70] sm:$0xff]  ;;  %648 = vst.msk [vmem:[#allocation2 + $0x48] sm:$0xf] %vm628_vm0, %v6393_v56  ;;  %s5187_s23 = sshll.u32 %s6469_s7, 13 }
  0x22   : > { %5493 = vmatprep.subr.bf16.mxu0 %v6205_v3  ;;  %v354_v28 = vpack.c.bf16 %v329_v26, %v328_v25  ;;  %v331_v30 = vld [vmem:[%s6510_s13 + $0x78] sm:$0xff]  ;;  %v332_v31 = vld [vmem:[%s6510_s13 + $0x80] sm:$0xff]  ;;  %v333_v32 = vld [vmem:[%s6510_s13 + $0x88] sm:$0xff]  ;;  %649 = vst.msk [vmem:[#allocation2 + $0x4c] sm:$0xf] %vm628_vm0, %v6393_v56  ;;  %s4711_s26 = scalar_lea.hbm %s8027_s8, %s5187_s23  ;;  %s4645_s27 = sshll.u32 %s7867_s22, 4  ;;  %s7944_s27 = int_to_ptr.vmem [resolvable:$true] %s4645_s27 }
  0x23   : > { %v355_v33 = vpack.c.bf16 %v331_v30, %v330_v29  ;;  %v356_v34 = vpack.c.bf16 %v333_v32, %v332_v31  ;;  %v334_v35 = vld [vmem:[%s6510_s13 + $0x90] sm:$0xff]  ;;  %v335_v36 = vld [vmem:[%s6510_s13 + $0x98] sm:$0xff]  ;;  %v336_v37 = vld [vmem:[%s6510_s13 + $0xa0] sm:$0xff]  ;;  %651 = vst.msk [vmem:[#allocation2 + $0x54] sm:$0xf] %vm628_vm0, %v6393_v56  ;;  %s7942_s28 = scalar_lea.hbm %s4711_s26, 4096 }
  0x24   : > { %v337_v38 = vld [vmem:[%s6510_s13 + $0xa8] sm:$0xff]  ;;  %v357_v39 = vpack.c.bf16 %v335_v36, %v334_v35  ;;  %v338_v41 = vld [vmem:[%s6510_s13 + $0xb0] sm:$0xff]  ;;  %v339_v42 = vld [vmem:[%s6510_s13 + $0xb8] sm:$0xff]  ;;  %652 = vst.msk [vmem:[#allocation2 + $0x58] sm:$0xf] %vm628_vm0, %v6393_v56  ;;  %s6296_s29 = scalar_lea.vmem %s7944_s27, 2048 }
  0x25   : > { %5494 = vmatpush3.bf16.msra.mxu0 %v6205_v3  ;;  %v358_v40 = vpack.c.bf16 %v337_v38, %v336_v37  ;;  %v340_v43 = vld [vmem:[%s6510_s13 + $0xc0] sm:$0xff]  ;;  %v341_v44 = vld [vmem:[%s6510_s13 + $0xc8] sm:$0xff]  ;;  %v359_v45 = vpack.c.bf16 %v339_v42, %v338_v41  ;;  %v342_v47 = vld [vmem:[%s6510_s13 + $0xd0] sm:$0xff]  ;;  %654 = vst.msk [vmem:[#allocation2 + $0x60] sm:$0xf] %vm628_vm0, %v6393_v56  ;;  %p6297_p11 = scmp.ne.s32.totalorder %s7944_s27, %s6296_s29  ;;  %s6394_s15 = smov [#allocation3]  }
  0x26   : > { %5495 = vmatprep.subr.bf16.mxu0 %v6206_v7  ;;  %v360_v46 = vpack.c.bf16 %v341_v44, %v340_v43  ;;  %v343_v48 = vld [vmem:[%s6510_s13 + $0xd8] sm:$0xff]  ;;  %v344_v49 = vld [vmem:[%s6510_s13 + $0xe0] sm:$0xff]  ;;  %v345_v50 = vld [vmem:[%s6510_s13 + $0xe8] sm:$0xff]  ;;  %655 = vst.msk [vmem:[#allocation2 + $0x64] sm:$0xf] %vm628_vm0, %v6393_v56  ;;  %s6300_s16 = sshll.u32 %s6394_s15, 4  ;;  %s6301_s16 = int_to_ptr.vmem [resolvable:$false] %s6300_s16 }
  0x27   : > { %v361_v51 = vpack.c.bf16 %v343_v48, %v342_v47  ;;  %v362_v52 = vpack.c.bf16 %v345_v50, %v344_v49  ;;  %v346_v53 = vld [vmem:[%s6510_s13 + $0xf0] sm:$0xff]  ;;  %v347_v54 = vld [vmem:[%s6510_s13 + $0xf8] sm:$0xff]  ;;  %657 = vst.msk [vmem:[#allocation2 + $0x6c] sm:$0xf] %vm628_vm0, %v6393_v56  ;;  %658 = vst.msk [vmem:[#allocation2 + $0x70] sm:$0xf] %vm628_vm0, %v6393_v56  ;;  %p6298_p12 = pnand %p6297_p11, %p6486_p5  ;;  %p6303_p0 = scmp.lt.s32.totalorder %s7944_s27, %s6301_s16 }
  0x28   : > { %v363_v55 = vpack.c.bf16 %v347_v54, %v346_v53  ;;  %660 = vst.msk [vmem:[#allocation2 + $0x78] sm:$0xf] %vm628_vm0, %v6393_v56  ;;  %661 = vst.msk [vmem:[#allocation2 + $0x7c] sm:$0xf] %vm628_vm0, %v6393_v56  ;;  %v1221_v58 = vld [vmem:[#allocation2] sm:$0xf] }
  0x29   : > { %5496 = vmatpush3.bf16.msra.mxu0 %v6206_v7  ;;  %663 = vst.msk [vmem:[#allocation2 + $0x84] sm:$0xf] %vm628_vm0, %v6393_v56  ;;  %664 = vst.msk [vmem:[#allocation2 + $0x88] sm:$0xf] %vm628_vm0, %v6393_v56  ;;  %v1222_v59 = vld [vmem:[#allocation2 + $0x4] sm:$0xf]  ;;  %p6299_p13 = pneg %p6298_p12 }
  0x2a   : > { %5497 = vmatprep.subr.bf16.mxu0 %v6207_v8  ;;  %666 = vst.msk [vmem:[#allocation2 + $0x90] sm:$0xf] %vm628_vm0, %v6393_v56  ;;  %667 = vst.msk [vmem:[#allocation2 + $0x94] sm:$0xf] %vm628_vm0, %v6393_v56  ;;  %v1283_v60 = vshrl.u32 %v1221_v58, 16  ;;  %v1286_v61 = vshll.u32 %v1221_v58, 16 }
  0x2b   : > { %669 = vst.msk [vmem:[#allocation2 + $0x9c] sm:$0xf] %vm628_vm0, %v6393_v56  ;;  %670 = vst.msk [vmem:[#allocation2 + $0xa0] sm:$0xf] %vm628_vm0, %v6393_v56  ;;  %v1292_v62 = vshll.u32 %v1222_v59, 16  ;;  %v1296_v63 = vshrl.u32 %v1222_v59, 16 }
  0x2c   : > { %672 = vst.msk [vmem:[#allocation2 + $0xa8] sm:$0xf] %vm628_vm0, %v6393_v56  ;;  %673 = vst.msk [vmem:[#allocation2 + $0xac] sm:$0xf] %vm628_vm0, %v6393_v56  ;;  %v1285_v1 = vrot.slane %v1283_v60, 4  ;;  %v1288_v2 = vrot.slane %v1286_v61, 5 }
  0x2d   : > { %5498 = vmatpush3.bf16.msra.mxu0 %v6207_v8  ;;  %675 = vst.msk [vmem:[#allocation2 + $0xb4] sm:$0xf] %vm628_vm0, %v6393_v56  ;;  %676 = vst.msk [vmem:[#allocation2 + $0xb8] sm:$0xf] %vm628_vm0, %v6393_v56  ;;  %v1294_v3 = vrot.slane %v1292_v62, 5  ;;  %v1298_v5 = vrot.slane %v1296_v63, 4 }
  0x2e   : > { %5499 = vmatprep.subr.bf16.mxu0 %v6208_v9  ;;  %678 = vst.msk [vmem:[#allocation2 + $0xc0] sm:$0xf] %vm628_vm0, %v6393_v56  ;;  %679 = vst.msk [vmem:[#allocation2 + $0xc4] sm:$0xf] %vm628_vm0, %v6393_v56  ;;  %vm1280_vm3 = vsmask.f32 7440  ;;  %v1289_v6 = vor.u32 %v1288_v2, %v1285_v1 }
  0x2f   : > { %681 = vst.msk [vmem:[#allocation2 + $0xcc] sm:$0xf] %vm628_vm0, %v6393_v56  ;;  %682 = vst.msk [vmem:[#allocation2 + $0xd0] sm:$0xf] %vm628_vm0, %v6393_v56  ;;  %v1299_v7 = vor.u32 %v1298_v5, %v1294_v3  ;;  %v6213_v17 = vld [vmem:[%s8022_s3 + $0x38] sm:$0xff]   ;;  %v6637_v18 = vld [vmem:[%s8022_s3 + $0x40] sm:$0xff]  }
  0x30   : > { %638 = vst.msk [vmem:[#allocation2 + $0x20] sm:$0x1] %vm631_vm1, %v6393_v56  ;;  %632 = vst.msk [vmem:[#allocation2 + $0x8] sm:$0x1] %vm631_vm1, %v6393_v56  ;;  %v6643_v19 = vld [vmem:[%s8021_s2] ss:$0 sm:$0xff] }
  0x31   : > { %5500 = vmatpush3.bf16.msra.mxu0 %v6208_v9  ;;  %635 = vst.msk [vmem:[#allocation2 + $0x14] sm:$0x1] %vm631_vm1, %v6393_v56  ;;  %641 = vst.msk [vmem:[#allocation2 + $0x2c] sm:$0x1] %vm631_vm1, %v6393_v56  ;;  %v1290_v9 = vrot.slane %v1289_v6, 4  ;;  %v1300_v11 = vrot.slane %v1299_v7, 4 }
  0x32   : > { %5501 = vmatprep.subr.bf16.mxu0 %v6209_v10  ;;  %644 = vst.msk [vmem:[#allocation2 + $0x38] sm:$0x1] %vm631_vm1, %v6393_v56  ;;  %647 = vst.msk [vmem:[#allocation2 + $0x44] sm:$0x1] %vm631_vm1, %v6393_v56  ;;  %vm1105_vm6 = vsmask.f32 7938 }
  0x33   : > { %650 = vst.msk [vmem:[#allocation2 + $0x50] sm:$0x1] %vm631_vm1, %v6393_v56  ;;  %653 = vst.msk [vmem:[#allocation2 + $0x5c] sm:$0x1] %vm631_vm1, %v6393_v56  ;;  %vm780_vm7 = vsmask.f32 256 }
  0x34   : > { %656 = vst.msk [vmem:[#allocation2 + $0x68] sm:$0x1] %vm631_vm1, %v6393_v56  ;;  %659 = vst.msk [vmem:[#allocation2 + $0x74] sm:$0x1] %vm631_vm1, %v6393_v56  ;;  %vm781_vm8 = vsmask.f32 4368 }
  0x35   : > { %5502 = vmatpush3.bf16.msra.mxu0 %v6209_v10  ;;  %662 = vst.msk [vmem:[#allocation2 + $0x80] sm:$0x1] %vm631_vm1, %v6393_v56  ;;  %665 = vst.msk [vmem:[#allocation2 + $0x8c] sm:$0x1] %vm631_vm1, %v6393_v56  ;;  %v8067_v10 = vmov 0  ;;  %s6302_s21 = scalar_lea.vmem %s6301_s16, 4096 }
  0x36   : > { %668 = vst.msk [vmem:[#allocation2 + $0x98] sm:$0x1] %vm631_vm1, %v6393_v56  ;;  %671 = vst.msk [vmem:[#allocation2 + $0xa4] sm:$0x1] %vm631_vm1, %v6393_v56  ;;  %5535 = vmatprep.subr.bf16.mxu0 %v6210_v57  ;;  %v1116_v47 = vld [vmem:[#allocation2 + $0x18] sm:$0xf]  ;;  %p6304_p1 = scmp.lt.s32.totalorder %s6302_s21, %s6296_s29 }
  0x37   : > { %674 = vst.msk [vmem:[#allocation2 + $0xb0] sm:$0x1] %vm631_vm1, %v6393_v56  ;;  %677 = vst.msk [vmem:[#allocation2 + $0xbc] sm:$0x1] %vm631_vm1, %v6393_v56  ;;  %v1223_v4 = vld [vmem:[#allocation2 + $0x8] sm:$0x1] }
  0x38   : > { %5504 = vmatmul.mubr.bf16.vlgmr.msra.gmra.mrb[0].mxu0 %v349_v15  ;;  %680 = vst.msk [vmem:[#allocation2 + $0xc8] sm:$0x1] %vm631_vm1, %v6393_v56  ;;  %683 = vst.msk [vmem:[#allocation2 + $0xd4] sm:$0x1] %vm631_vm1, %v6393_v56  ;;  %v1302_v8 = vshll.u32 %v1223_v4, 16  ;;  %p6305_p2 = por %p6304_p1, %p6303_p0 }
  0x39   : > { %5507 = vmatprep.mubr.bf16.mxu0 %v350_v16  ;;  %5536 = vmatpush3.bf16.msra.mxu0 %v6210_v57  ;;  %vm6619_vm4 = vmor %vm1279_vm2, %vm1280_vm3  ;;  %v6212_v16 = vld [vmem:[%s8022_s3 + $0x30] sm:$0xff]   ;;  %v1120_v63 = vld [vmem:[#allocation2 + $0x20] sm:$0x1] }
  0x3a   : > { %5537 = vmatprep.subr.bf16.mxu0 %v6211_v0  ;;  %v8068_v10 = vsel %vm6619_vm4, 4294967295, %v8067_v10  ;;  %v1304_v12 = vrot.slane %v1302_v8, 5  ;;  %v1295_v13 = vsel %vm6619_vm4, %v1290_v9, %v1294_v3  ;;  %5895 = vmatprep.subr.bf16.mxu1 %v6212_v16  ;;  %vm6652_vm9 = vmand %vm628_vm0, %vm1105_vm6  ;;  %v1113_v5 = vld [vmem:[#allocation2 + $0x14] sm:$0x1]  ;;  %p6306_p3 = pnand %p6305_p2, %p6299_p13 }
  0x3b   : > { %8069 = vst [vmem:[#allocation9_spill] sm:$0xff] %v8068_v10  ;;  %5897 = vmatpush3.bf16.msra.mxu1 %v6212_v16  ;;  %vm6659_vm10 = vmor %vm780_vm7, %vm781_vm8 }
  0x3c   : > { %v1305_v14 = vsel %vm6619_vm4, %v1300_v11, %v1304_v12  ;;  %5896 = vmatprep.subr.bf16.mxu1 %v6213_v17  ;;  %vm6665_vm11 = vmand %vm631_vm1, %vm780_vm7 }
  0x3d   : > { %5538 = vmatpush3.bf16.msra.mxu0 %v6211_v0  ;;  %v4802_v15 = vcombine.low %v1295_v13, %v1305_v14  ;;  %vm7273_vm14 = vmor %vm2258_vm12, %vm2259_vm13 }
  0x3f   : > { %5898 = vmatpush3.bf16.msra.mxu1 %v6213_v17 }
  0x40   : > { %5508 = vmatmul.mubr.bf16.gmra.mrb[4].mxu0 %v351_v21  ;;  %5679 = vmatprep.subr.bf16.mxu1 %v6637_v18 }
  0x41   : > { %5511 = vmatprep.mubr.bf16.mxu0 %v352_v22 }
  0x48   : > { %5512 = vmatmul.mubr.bf16.gmra.mrb[8].mxu0 %v353_v27 }
  0x49   : > { %5515 = vmatprep.mubr.bf16.mxu0 %v354_v28 }
  0x50   : > { %5516 = vmatmul.mubr.bf16.gmra.mrb[12].mxu0 %v355_v33 }
  0x51   : > { %5519 = vmatprep.mubr.bf16.mxu0 %v356_v34 }
  0x58   : > { %5520 = vmatmul.mubr.bf16.gmra.mrb[16].mxu0 %v357_v39 }
  0x59   : > { %5523 = vmatprep.mubr.bf16.mxu0 %v358_v40 }
  0x60   : > { %5524 = vmatmul.mubr.bf16.gmra.mrb[20].mxu0 %v359_v45 }
  0x61   : > { %5527 = vmatprep.mubr.bf16.mxu0 %v360_v46 }
  0x68   : > { %5528 = vmatmul.mubr.bf16.gmra.mrb[24].mxu0 %v361_v51 }
  0x69   : > { %5531 = vmatprep.mubr.bf16.mxu0 %v362_v52 }
  0x70   : > { %5532 = vmatmul.mubr.bf16.gmra.mrb[28].mxu0 %v363_v55  ;;  %v1107_v55 = vld [vmem:[#allocation2 + $0xc] sm:$0xf] }
  0x71   : > { %5539 = vmatprep.mubr.msk.bf16.mxu0 %vm1731_vm5, %v4802_v15 }
 0x10b   : > { %v5505_v20 = vpop.f32.mrb[0].mxu0 }
 0x10c   : > { %v478_v21 = vadd.f32 %v5505_v20, %v6643_v19  ;;  %v469_v22 = vpop.f32.mrb[1].mxu0 }
 0x10d   : > { %v470_v23 = vadd.f32 %v6643_v19, %v469_v22  ;;  %v5506_v24 = vpop.f32.mrb[2].mxu0 }
 0x10e   : > { %v598_v25 = vmax.f32 %v478_v21, 0.0  ;;  %v481_v26 = vadd.f32 %v5506_v24, %v6643_v19  ;;  %v472_v27 = vpop.f32.mrb[3].mxu0 }
 0x10f   : > { %v596_v28 = vmax.f32 %v470_v23, 0.0  ;;  %v473_v29 = vadd.f32 %v6643_v19, %v472_v27  ;;  %v1130_v27 = vld [vmem:[#allocation2 + $0x30] sm:$0xf] }
 0x110   : > { %v5125_v30 = vpack.c.bf16 %v598_v25, %v598_v25  ;;  %v599_v31 = vmax.f32 %v481_v26, 0.0 }
 0x111   : > { %v5123_v32 = vpack.c.bf16 %v596_v28, %v596_v28  ;;  %v597_v33 = vmax.f32 %v473_v29, 0.0 }
 0x112   : > { %v801_v34 = vshrl.u32 %v5125_v30, 16  ;;  %v5126_v35 = vpack.c.bf16 %v599_v31, %v599_v31  ;;  %v804_v36 = vshll.u32 %v5125_v30, 16 }
 0x113   : > { %v784_v37 = vshrl.u32 %v5123_v32, 16  ;;  %v787_v38 = vshll.u32 %v5123_v32, 16  ;;  %v5124_v39 = vpack.c.bf16 %v597_v33, %v597_v33  ;;  %v5509_v40 = vpop.f32.mrb[4].mxu0 }
 0x114   : > { %v803_v41 = vrot.slane %v801_v34, 7  ;;  %v809_v42 = vshrl.u32 %v5126_v35, 16  ;;  %v812_v43 = vshll.u32 %v5126_v35, 16  ;;  %v494_v44 = vadd.f32 %v5509_v40, %v6643_v19  ;;  %v485_v45 = vpop.f32.mrb[5].mxu0  ;;  %v1123_v34 = vld [vmem:[#allocation2 + $0x24] sm:$0xf] }
 0x115   : > { %v786_v48 = vrot.slane %v784_v37, 7  ;;  %v792_v49 = vshrl.u32 %v5124_v39, 16  ;;  %v795_v50 = vshll.u32 %v5124_v39, 16  ;;  %v486_v51 = vadd.f32 %v6643_v19, %v485_v45  ;;  %v5510_v52 = vpop.f32.mrb[6].mxu0 }
 0x116   : > { %v806_v53 = vor.u32 %v804_v36, %v803_v41  ;;  %v807_v54 = vrot.slane %v803_v41, 4  ;;  %v811_v57 = vrot.slane %v809_v42, 7  ;;  %v602_v58 = vmax.f32 %v494_v44, 0.0  ;;  %v488_v59 = vpop.f32.mrb[7].mxu0 }
 0x117   : > { %v789_v60 = vor.u32 %v787_v38, %v786_v48  ;;  %v790_v61 = vrot.slane %v786_v48, 4  ;;  %v794_v0 = vrot.slane %v792_v49, 7  ;;  %v600_v1 = vmax.f32 %v486_v51, 0.0 }
 0x118   : > { %v1117_v2 = vsel %vm6652_vm9, %v806_v53, %v1116_v47  ;;  %v814_v3 = vor.u32 %v812_v43, %v811_v57  ;;  %v816_v4 = vrot.slane %v811_v57, 4  ;;  %v5129_v6 = vpack.c.bf16 %v602_v58, %v602_v58  ;;  %v1127_v57 = vld [vmem:[#allocation2 + $0x2c] sm:$0x1] }
 0x119   : > { %1118 = vst [vmem:[#allocation2 + $0x18] sm:$0xf] %v1117_v2  ;;  %v1108_v7 = vsel %vm6652_vm9, %v789_v60, %v1107_v55  ;;  %v797_v8 = vor.u32 %v795_v50, %v794_v0  ;;  %v799_v9 = vrot.slane %v794_v0, 4  ;;  %v5127_v11 = vpack.c.bf16 %v600_v1, %v600_v1  ;;  %v1134_v55 = vld [vmem:[#allocation2 + $0x38] sm:$0x1] }
 0x11a   : > { %1109 = vst [vmem:[#allocation2 + $0xc] sm:$0xf] %v1108_v7  ;;  %v815_v12 = vsel %vm6659_vm10, %v807_v54, %v814_v3  ;;  %v1121_v13 = vsel %vm6665_vm11, %v816_v4, %v1120_v63  ;;  %v835_v14 = vshrl.u32 %v5129_v6, 16  ;;  %v838_v17 = vshll.u32 %v5129_v6, 16  ;;  %v1144_v6 = vld [vmem:[#allocation2 + $0x48] sm:$0xf] }
 0x11b   : > { %1119 = vst.msk [vmem:[#allocation2 + $0x1c] sm:$0xf] %vm628_vm0, %v815_v12  ;;  %1122 = vst [vmem:[#allocation2 + $0x20] sm:$0x1] %v1121_v13  ;;  %v798_v15 = vsel %vm6659_vm10, %v790_v61, %v797_v8  ;;  %v1114_v16 = vsel %vm6665_vm11, %v799_v9, %v1113_v5  ;;  %v818_v20 = vshrl.u32 %v5127_v11, 16  ;;  %v5513_v21 = vpop.f32.mrb[8].mxu0  ;;  %v497_v23 = vadd.f32 %v5510_v52, %v6643_v19 }
 0x11c   : > { %1110 = vst.msk [vmem:[#allocation2 + $0x10] sm:$0xf] %vm628_vm0, %v798_v15  ;;  %1115 = vst [vmem:[#allocation2 + $0x14] sm:$0x1] %v1114_v16  ;;  %v6683_v22 = vrot.slane %v835_v14, 7  ;;  %v489_v24 = vadd.f32 %v6643_v19, %v488_v59  ;;  %v510_v25 = vadd.f32 %v5513_v21, %v6643_v19  ;;  %v501_v26 = vpop.f32.mrb[9].mxu0 }
 0x11d   : > { %v820_v28 = vrot.slane %v818_v20, 7  ;;  %v821_v29 = vshll.u32 %v5127_v11, 16  ;;  %v502_v30 = vadd.f32 %v6643_v19, %v501_v26  ;;  %v5514_v31 = vpop.f32.mrb[10].mxu0  ;;  %v603_v35 = vmax.f32 %v497_v23, 0.0  ;;  %v1137_v16 = vld [vmem:[#allocation2 + $0x3c] sm:$0xf] }
 0x11e   : > { %v840_v32 = vor.u32 %v838_v17, %v6683_v22  ;;  %v841_v33 = vrot.slane %v6683_v22, 4  ;;  %v601_v36 = vmax.f32 %v489_v24, 0.0  ;;  %v504_v37 = vpop.f32.mrb[11].mxu0  ;;  %v606_v40 = vmax.f32 %v510_v25, 0.0  ;;  %v6710_v24 = vld [vmem:[%s8022_s3] sm:$0xff]  }
 0x11f   : > { %v823_v38 = vor.u32 %v821_v29, %v820_v28  ;;  %v824_v39 = vrot.slane %v820_v28, 4  ;;  %v604_v41 = vmax.f32 %v502_v30, 0.0  ;;  %v5130_v43 = vpack.c.bf16 %v603_v35, %v603_v35  ;;  %5571 = vmatprep.subr.bf16.mxu0 %v6710_v24 }
 0x120   : > { %v1131_v42 = vsel %vm6652_vm9, %v840_v32, %v1130_v27  ;;  %v5128_v44 = vpack.c.bf16 %v601_v36, %v601_v36  ;;  %v513_v45 = vadd.f32 %v5514_v31, %v6643_v19  ;;  %v5133_v48 = vpack.c.bf16 %v606_v40, %v606_v40 }
 0x121   : > { %1132 = vst [vmem:[#allocation2 + $0x30] sm:$0xf] %v1131_v42  ;;  %v1124_v47 = vsel %vm6652_vm9, %v823_v38, %v1123_v34  ;;  %v5131_v49 = vpack.c.bf16 %v604_v41, %v604_v41  ;;  %v505_v50 = vadd.f32 %v6643_v19, %v504_v37  ;;  %v843_v51 = vshrl.u32 %v5130_v43, 16  ;;  %v1148_v42 = vld [vmem:[#allocation2 + $0x50] sm:$0x1] }
 0x122   : > { %1125 = vst [vmem:[#allocation2 + $0x24] sm:$0xf] %v1124_v47  ;;  %v846_v52 = vshll.u32 %v5130_v43, 16  ;;  %v826_v53 = vshrl.u32 %v5128_v44, 16  ;;  %v829_v54 = vshll.u32 %v5128_v44, 16  ;;  %v869_v58 = vshrl.u32 %v5133_v48, 16 }
 0x123   : > { %v872_v59 = vshll.u32 %v5133_v48, 16  ;;  %v852_v60 = vshrl.u32 %v5131_v49, 16  ;;  %v855_v61 = vshll.u32 %v5131_v49, 16  ;;  %v5517_v63 = vpop.f32.mrb[12].mxu0  ;;  %v845_v0 = vrot.slane %v843_v51, 7 }
 0x124   : > { %v828_v1 = vrot.slane %v826_v53, 7  ;;  %v607_v2 = vmax.f32 %v513_v45, 0.0  ;;  %v605_v3 = vmax.f32 %v505_v50, 0.0  ;;  %v517_v4 = vpop.f32.mrb[13].mxu0  ;;  %v6697_v5 = vrot.slane %v869_v58, 7 }
 0x125   : > { %v6699_v7 = vrot.slane %v852_v60, 7  ;;  %v526_v8 = vadd.f32 %v5517_v63, %v6643_v19  ;;  %v518_v9 = vadd.f32 %v6643_v19, %v517_v4  ;;  %v5518_v11 = vpop.f32.mrb[14].mxu0  ;;  %v848_v12 = vor.u32 %v846_v52, %v845_v0  ;;  %v1141_v51 = vld [vmem:[#allocation2 + $0x44] sm:$0x1] }
 0x126   : > { %v850_v13 = vrot.slane %v845_v0, 4  ;;  %v831_v14 = vor.u32 %v829_v54, %v828_v1  ;;  %v833_v15 = vrot.slane %v828_v1, 4  ;;  %v520_v17 = vpop.f32.mrb[15].mxu0  ;;  %v874_v20 = vor.u32 %v872_v59, %v6697_v5 }
 0x127   : > { %v875_v21 = vrot.slane %v6697_v5, 4  ;;  %v857_v22 = vor.u32 %v855_v61, %v6699_v7  ;;  %v858_v23 = vrot.slane %v6699_v7, 4  ;;  %v849_v25 = vsel %vm6659_vm10, %v841_v33, %v848_v12  ;;  %v1151_v12 = vld [vmem:[#allocation2 + $0x54] sm:$0xf] }
 0x128   : > { %v1135_v26 = vsel %vm6665_vm11, %v850_v13, %v1134_v55  ;;  %v832_v27 = vsel %vm6659_vm10, %v824_v39, %v831_v14  ;;  %v1128_v28 = vsel %vm6665_vm11, %v833_v15, %v1127_v57  ;;  %1133 = vst.msk [vmem:[#allocation2 + $0x34] sm:$0xf] %vm628_vm0, %v849_v25  ;;  %v1145_v29 = vsel %vm6652_vm9, %v874_v20, %v1144_v6 }
 0x129   : > { %1136 = vst [vmem:[#allocation2 + $0x38] sm:$0x1] %v1135_v26  ;;  %1126 = vst.msk [vmem:[#allocation2 + $0x28] sm:$0xf] %vm628_vm0, %v832_v27  ;;  %v1138_v30 = vsel %vm6652_vm9, %v857_v22, %v1137_v16  ;;  %v5134_v31 = vpack.c.bf16 %v607_v2, %v607_v2  ;;  %v5132_v32 = vpack.c.bf16 %v605_v3, %v605_v3  ;;  %v610_v33 = vmax.f32 %v526_v8, 0.0 }
 0x12a   : > { %1129 = vst [vmem:[#allocation2 + $0x2c] sm:$0x1] %v1128_v28  ;;  %1146 = vst [vmem:[#allocation2 + $0x48] sm:$0xf] %v1145_v29  ;;  %v608_v34 = vmax.f32 %v518_v9, 0.0  ;;  %v529_v35 = vadd.f32 %v5518_v11, %v6643_v19  ;;  %v521_v36 = vadd.f32 %v6643_v19, %v520_v17 }
 0x12b   : > { %1139 = vst [vmem:[#allocation2 + $0x3c] sm:$0xf] %v1138_v30  ;;  %v877_v37 = vshrl.u32 %v5134_v31, 16  ;;  %v880_v38 = vshll.u32 %v5134_v31, 16  ;;  %v860_v39 = vshrl.u32 %v5132_v32, 16  ;;  %v863_v40 = vshll.u32 %v5132_v32, 16 }
 0x12c   : > { %v5521_v41 = vpop.f32.mrb[16].mxu0  ;;  %v5137_v43 = vpack.c.bf16 %v610_v33, %v610_v33  ;;  %v5135_v44 = vpack.c.bf16 %v608_v34, %v608_v34  ;;  %v611_v45 = vmax.f32 %v529_v35, 0.0  ;;  %v609_v47 = vmax.f32 %v521_v36, 0.0  ;;  %v1158_v11 = vld [vmem:[#allocation2 + $0x60] sm:$0xf] }
 0x12d   : > { %v533_v48 = vpop.f32.mrb[17].mxu0  ;;  %v879_v49 = vrot.slane %v877_v37, 7  ;;  %v862_v50 = vrot.slane %v860_v39, 7  ;;  %v542_v52 = vadd.f32 %v5521_v41, %v6643_v19  ;;  %v1224_v17 = vld [vmem:[#allocation2 + $0xc] sm:$0xf] }
 0x12e   : > { %v534_v53 = vadd.f32 %v6643_v19, %v533_v48  ;;  %v5522_v54 = vpop.f32.mrb[18].mxu0  ;;  %v903_v55 = vshrl.u32 %v5137_v43, 16  ;;  %v906_v57 = vshll.u32 %v5137_v43, 16  ;;  %v886_v58 = vshrl.u32 %v5135_v44, 16  ;;  %v1162_v32 = vld [vmem:[#allocation2 + $0x68] sm:$0x1] }
 0x12f   : > { %v889_v59 = vshll.u32 %v5135_v44, 16  ;;  %v536_v60 = vpop.f32.mrb[19].mxu0  ;;  %v882_v61 = vor.u32 %v880_v38, %v879_v49  ;;  %v884_v63 = vrot.slane %v879_v49, 4  ;;  %v865_v0 = vor.u32 %v863_v40, %v862_v50  ;;  %v1155_v37 = vld [vmem:[#allocation2 + $0x5c] sm:$0x1] }
 0x130   : > { %v867_v1 = vrot.slane %v862_v50, 4  ;;  %v905_v2 = vrot.slane %v903_v55, 7  ;;  %v888_v3 = vrot.slane %v886_v58, 7  ;;  %v5138_v4 = vpack.c.bf16 %v611_v45, %v611_v45  ;;  %v1172_v58 = vld [vmem:[#allocation2 + $0x78] sm:$0xf] }
 0x131   : > { %v5136_v5 = vpack.c.bf16 %v609_v47, %v609_v47  ;;  %v883_v6 = vsel %vm6659_vm10, %v875_v21, %v882_v61  ;;  %v1149_v7 = vsel %vm6665_vm11, %v884_v63, %v1148_v42  ;;  %v866_v8 = vsel %vm6659_vm10, %v858_v23, %v865_v0 }
 0x132   : > { %v1142_v9 = vsel %vm6665_vm11, %v867_v1, %v1141_v51  ;;  %1147 = vst.msk [vmem:[#allocation2 + $0x4c] sm:$0xf] %vm628_vm0, %v883_v6  ;;  %1150 = vst [vmem:[#allocation2 + $0x50] sm:$0x1] %v1149_v7  ;;  %v908_v13 = vor.u32 %v906_v57, %v905_v2  ;;  %v909_v14 = vrot.slane %v905_v2, 4  ;;  %v891_v15 = vor.u32 %v889_v59, %v888_v3 }
 0x133   : > { %1140 = vst.msk [vmem:[#allocation2 + $0x40] sm:$0xf] %vm628_vm0, %v866_v8  ;;  %1143 = vst [vmem:[#allocation2 + $0x44] sm:$0x1] %v1142_v9  ;;  %v892_v16 = vrot.slane %v888_v3, 4  ;;  %v911_v20 = vshrl.u32 %v5138_v4, 16  ;;  %v545_v34 = vadd.f32 %v5522_v54, %v6643_v19  ;;  %v537_v35 = vadd.f32 %v6643_v19, %v536_v60 }
 0x134   : > { %v914_v21 = vshll.u32 %v5138_v4, 16  ;;  %v894_v22 = vshrl.u32 %v5136_v5, 16  ;;  %v897_v23 = vshll.u32 %v5136_v5, 16  ;;  %v6741_v25 = vpop.f32.mrb[20].mxu0  ;;  %v1159_v26 = vsel %vm6652_vm9, %v908_v13, %v1158_v11  ;;  %v1165_v59 = vld [vmem:[#allocation2 + $0x6c] sm:$0xf] }
 0x135   : > { %v1152_v27 = vsel %vm6652_vm9, %v891_v15, %v1151_v12  ;;  %v614_v28 = vmax.f32 %v542_v52, 0.0  ;;  %v612_v29 = vmax.f32 %v534_v53, 0.0  ;;  %v6747_v30 = vpop.f32.mrb[21].mxu0  ;;  %1160 = vst [vmem:[#allocation2 + $0x60] sm:$0xf] %v1159_v26  ;;  %v913_v31 = vrot.slane %v911_v20, 7 }
 0x136   : > { %1153 = vst [vmem:[#allocation2 + $0x54] sm:$0xf] %v1152_v27  ;;  %v896_v33 = vrot.slane %v894_v22, 7  ;;  %v6751_v36 = vpop.f32.mrb[22].mxu0  ;;  %v1307_v40 = vshrl.u32 %v1224_v17, 16  ;;  %v1310_v41 = vshll.u32 %v1224_v17, 16 }
 0x137   : > { %v5141_v38 = vpack.c.bf16 %v614_v28, %v614_v28  ;;  %v5139_v39 = vpack.c.bf16 %v612_v29, %v612_v29  ;;  %v6753_v42 = vpop.f32.mrb[23].mxu0  ;;  %v916_v43 = vor.u32 %v914_v21, %v913_v31  ;;  %v918_v44 = vrot.slane %v913_v31, 4  ;;  %v1225_v52 = vld [vmem:[#allocation2 + $0x10] sm:$0xf]  ;;  %v1226_v1 = vld [vmem:[#allocation2 + $0x14] sm:$0x1] }
 0x138   : > { %v899_v45 = vor.u32 %v897_v23, %v896_v33  ;;  %v901_v47 = vrot.slane %v896_v33, 4  ;;  %v615_v63 = vmax.f32 %v545_v34, 0.0  ;;  %v613_v0 = vmax.f32 %v537_v35, 0.0  ;;  %v1227_v17 = vld [vmem:[#allocation2 + $0x18] sm:$0xf] }
 0x139   : > { %v937_v48 = vshrl.u32 %v5141_v38, 16  ;;  %v940_v49 = vshll.u32 %v5141_v38, 16  ;;  %v920_v50 = vshrl.u32 %v5139_v39, 16  ;;  %v923_v51 = vshll.u32 %v5139_v39, 16  ;;  %v1228_v27 = vld [vmem:[#allocation2 + $0x1c] sm:$0xf] }
 0x13a   : > { %v917_v53 = vsel %vm6659_vm10, %v909_v14, %v916_v43  ;;  %v1163_v54 = vsel %vm6665_vm11, %v918_v44, %v1162_v32  ;;  %v900_v55 = vsel %vm6659_vm10, %v892_v16, %v899_v45  ;;  %v1156_v57 = vsel %vm6665_vm11, %v901_v47, %v1155_v37  ;;  %v1169_v45 = vld [vmem:[#allocation2 + $0x74] sm:$0x1] }
 0x13b   : > { %1161 = vst.msk [vmem:[#allocation2 + $0x64] sm:$0xf] %vm628_vm0, %v917_v53  ;;  %1164 = vst [vmem:[#allocation2 + $0x68] sm:$0x1] %v1163_v54  ;;  %v939_v60 = vrot.slane %v937_v48, 7  ;;  %v922_v61 = vrot.slane %v920_v50, 7  ;;  %v5142_v13 = vpack.c.bf16 %v615_v63, %v615_v63  ;;  %v5140_v14 = vpack.c.bf16 %v613_v0, %v613_v0 }
 0x13c   : > { %1154 = vst.msk [vmem:[#allocation2 + $0x58] sm:$0xf] %vm628_vm0, %v900_v55  ;;  %1157 = vst [vmem:[#allocation2 + $0x5c] sm:$0x1] %v1156_v57  ;;  %v1309_v2 = vrot.slane %v1307_v40, 4  ;;  %v1312_v3 = vrot.slane %v1310_v41, 5 }
 0x13d   : > { %v1316_v4 = vshll.u32 %v1225_v52, 16  ;;  %v1320_v5 = vshrl.u32 %v1225_v52, 16  ;;  %v6765_v6 = vpop.f32.mrb[24].mxu0  ;;  %v942_v7 = vor.u32 %v940_v49, %v939_v60  ;;  %v943_v8 = vrot.slane %v939_v60, 4  ;;  %v1176_v40 = vld [vmem:[#allocation2 + $0x80] sm:$0x1] }
 0x13e   : > { %v925_v9 = vor.u32 %v923_v51, %v922_v61  ;;  %v926_v11 = vrot.slane %v922_v61, 4  ;;  %v6767_v12 = vpop.f32.mrb[25].mxu0  ;;  %v1313_v15 = vor.u32 %v1312_v3, %v1309_v2  ;;  %v1326_v26 = vshll.u32 %v1226_v1, 16  ;;  %v1229_v55 = vld [vmem:[#allocation2 + $0x20] sm:$0x1] }
 0x13f   : > { %v1318_v16 = vrot.slane %v1316_v4, 5  ;;  %v6769_v20 = vpop.f32.mrb[26].mxu0  ;;  %v1173_v21 = vsel %vm6652_vm9, %v942_v7, %v1172_v58  ;;  %v1322_v23 = vrot.slane %v1320_v5, 4  ;;  %v945_v29 = vshrl.u32 %v5142_v13, 16 }
 0x140   : > { %v1166_v22 = vsel %vm6652_vm9, %v925_v9, %v1165_v59  ;;  %v6775_v28 = vpop.f32.mrb[27].mxu0  ;;  %1174 = vst [vmem:[#allocation2 + $0x78] sm:$0xf] %v1173_v21  ;;  %v948_v31 = vshll.u32 %v5142_v13, 16  ;;  %v928_v32 = vshrl.u32 %v5140_v14, 16  ;;  %v931_v33 = vshll.u32 %v5140_v14, 16 }
 0x141   : > { %1167 = vst [vmem:[#allocation2 + $0x6c] sm:$0xf] %v1166_v22  ;;  %v1314_v34 = vrot.slane %v1313_v15, 4  ;;  %v1323_v35 = vor.u32 %v1322_v23, %v1318_v16  ;;  %v1328_v37 = vrot.slane %v1326_v26, 5  ;;  %v1331_v38 = vshrl.u32 %v1227_v17, 16 }
 0x142   : > { %v947_v39 = vrot.slane %v945_v29, 7  ;;  %v930_v41 = vrot.slane %v928_v32, 7  ;;  %v1334_v43 = vshll.u32 %v1227_v17, 16  ;;  %v1340_v44 = vshll.u32 %v1228_v27, 16 }
 0x143   : > { %v1319_v47 = vsel %vm6619_vm4, %v1314_v34, %v1318_v16  ;;  %v1324_v48 = vrot.slane %v1323_v35, 4  ;;  %v1333_v49 = vrot.slane %v1331_v38, 4  ;;  %v1344_v50 = vshrl.u32 %v1228_v27, 16  ;;  %v6779_v57 = vpop.f32.mrb[28].mxu0  ;;  %v6808_v16 = vld [vmem:[#allocation2 + $0x3c] sm:$0xf] }
 0x144   : > { %v950_v51 = vor.u32 %v948_v31, %v947_v39  ;;  %v952_v52 = vrot.slane %v947_v39, 4  ;;  %v933_v53 = vor.u32 %v931_v33, %v930_v41  ;;  %v935_v54 = vrot.slane %v930_v41, 4  ;;  %v6783_v63 = vpop.f32.mrb[29].mxu0  ;;  %v6824_v38 = vld [vmem:[#allocation2 + $0x40] sm:$0xf] }
 0x145   : > { %v1329_v58 = vsel %vm6619_vm4, %v1324_v48, %v1328_v37  ;;  %v1336_v59 = vrot.slane %v1334_v43, 5  ;;  %v1342_v60 = vrot.slane %v1340_v44, 5  ;;  %v1346_v61 = vrot.slane %v1344_v50, 4  ;;  %v6793_v4 = vpop.f32.mrb[30].mxu0  ;;  %v1186_v41 = vld [vmem:[#allocation2 + $0x90] sm:$0xf] }
 0x146   : > { %v951_v0 = vsel %vm6659_vm10, %v943_v8, %v950_v51  ;;  %v1177_v1 = vsel %vm6665_vm11, %v952_v52, %v1176_v40  ;;  %v934_v2 = vsel %vm6659_vm10, %v926_v11, %v933_v53  ;;  %v1170_v3 = vsel %vm6665_vm11, %v935_v54, %v1169_v45  ;;  %v6799_v13 = vpop.f32.mrb[31].mxu0  ;;  %v6230_v11 = vld [vmem:[%s8022_s3 + $0x8] sm:$0xff]   ;;  %v1179_v50 = vld [vmem:[#allocation2 + $0x84] sm:$0xf] }
 0x147   : > { %1175 = vst.msk [vmem:[#allocation2 + $0x7c] sm:$0xf] %vm628_vm0, %v951_v0  ;;  %1178 = vst [vmem:[#allocation2 + $0x80] sm:$0x1] %v1177_v1  ;;  %v6797_v5 = vcombine.low %v1319_v47, %v1329_v58  ;;  %v1337_v7 = vor.u32 %v1336_v59, %v1333_v49  ;;  %v1347_v8 = vor.u32 %v1346_v61, %v1342_v60  ;;  %v1350_v9 = vshll.u32 %v1229_v55, 16 }
 0x148   : > { %1168 = vst.msk [vmem:[#allocation2 + $0x70] sm:$0xf] %vm628_vm0, %v934_v2  ;;  %1171 = vst [vmem:[#allocation2 + $0x74] sm:$0x1] %v1170_v3  ;;  %v558_v14 = vadd.f32 %v6741_v25, %v6643_v19  ;;  %v550_v15 = vadd.f32 %v6643_v19, %v6747_v30  ;;  %v561_v23 = vadd.f32 %v6751_v36, %v6643_v19  ;;  %v1403_v32 = vshrl.u32 %v6808_v16, 16 }
 0x149   : > { %5540 = vmatmul.mubr.msk.bf16.vlgmr.msra.gmra.mrb[32].mxu0 %vm1731_vm5, %v6797_v5  ;;  %v1338_v17 = vrot.slane %v1337_v7, 4  ;;  %v1348_v21 = vrot.slane %v1347_v8, 4  ;;  %v1352_v22 = vrot.slane %v1350_v9, 5  ;;  %v553_v29 = vadd.f32 %v6643_v19, %v6753_v42  ;;  %v6836_v58 = vld [vmem:[#allocation2 + $0x24] sm:$0xf] }
 0x14a   : > { %v618_v26 = vmax.f32 %v558_v14, 0.0  ;;  %v616_v27 = vmax.f32 %v550_v15, 0.0  ;;  %5572 = vmatpush3.bf16.msra.mxu0 %v6710_v24  ;;  %v619_v31 = vmax.f32 %v561_v23, 0.0  ;;  %v1406_v39 = vshll.u32 %v6808_v16, 16  ;;  %v1190_v61 = vld [vmem:[#allocation2 + $0x98] sm:$0x1] }
 0x14b   : > { %v1343_v25 = vsel %vm6619_vm4, %v1338_v17, %v1342_v60  ;;  %v1353_v30 = vsel %vm6619_vm4, %v1348_v21, %v1352_v22  ;;  %5573 = vmatprep.subr.bf16.mxu0 %v6230_v11  ;;  %v617_v35 = vmax.f32 %v553_v29, 0.0  ;;  %v6829_v45 = vrot.slane %v1403_v32, 4  ;;  %v6841_v9 = vld [vmem:[#allocation2 + $0x28] sm:$0xf]  ;;  %v1183_v17 = vld [vmem:[#allocation2 + $0x8c] sm:$0x1] }
 0x14c   : > { %v6822_v33 = vcombine.low %v1343_v25, %v1353_v30  ;;  %v5145_v36 = vpack.c.bf16 %v618_v26, %v618_v26  ;;  %v5143_v34 = vpack.c.bf16 %v616_v27, %v616_v27  ;;  %v5146_v37 = vpack.c.bf16 %v619_v31, %v619_v31  ;;  %v1232_v21 = vld [vmem:[#allocation2 + $0x2c] sm:$0x1]  ;;  %v6852_v25 = vld [vmem:[#allocation2 + $0x48] sm:$0xf]  ;;  %v6854_v30 = vld [vmem:[#allocation2 + $0x30] sm:$0xf] }
 0x14d   : > { %v5144_v44 = vpack.c.bf16 %v617_v35, %v617_v35  ;;  %v6833_v51 = vcombine.low %v6808_v16, %v6824_v38  ;;  %v1412_v55 = vshll.u32 %v6824_v38, 16  ;;  %v1416_v1 = vshrl.u32 %v6824_v38, 16  ;;  %v6860_v35 = vld [vmem:[#allocation2 + $0x4c] sm:$0xf] }
 0x14e   : > { %5543 = vmatprep.mubr.msk.bf16.mxu0 %vm1731_vm5, %v6822_v33  ;;  %v971_v24 = vshrl.u32 %v5145_v36, 16  ;;  %v954_v42 = vshrl.u32 %v5143_v34, 16  ;;  %5574 = vmatpush3.bf16.msra.mxu0 %v6230_v11  ;;  %v974_v40 = vshll.u32 %v5145_v36, 16  ;;  %v979_v43 = vshrl.u32 %v5146_v37, 16 }
 0x14f   : > { %v957_v49 = vshll.u32 %v5143_v34, 16  ;;  %v982_v53 = vshll.u32 %v5146_v37, 16  ;;  %v962_v54 = vshrl.u32 %v5144_v44, 16  ;;  %v965_v0 = vshll.u32 %v5144_v44, 16  ;;  %5655 = vmatprep.mubr.msk.bf16.mxu1 %vm1731_vm5, %v6833_v51 }
 0x150   : > { %v973_v47 = vrot.slane %v971_v24, 7  ;;  %v956_v48 = vrot.slane %v954_v42, 7  ;;  %v981_v52 = vrot.slane %v979_v43, 7  ;;  %v1355_v22 = vshrl.u32 %v6836_v58, 16 }
 0x151   : > { %v964_v8 = vrot.slane %v962_v54, 7  ;;  %v1358_v32 = vshll.u32 %v6836_v58, 16  ;;  %v1364_v36 = vshll.u32 %v6841_v9, 16  ;;  %v1368_v34 = vshrl.u32 %v6841_v9, 16 }
 0x152   : > { %v976_v59 = vor.u32 %v974_v40, %v973_v47  ;;  %v959_v60 = vor.u32 %v957_v49, %v956_v48  ;;  %v977_v2 = vrot.slane %v973_v47, 4  ;;  %v984_v3 = vor.u32 %v982_v53, %v981_v52  ;;  %v6222_v53 = vld [vmem:[%s8022_s3 + $0x48] sm:$0xff]  }
 0x153   : > { %v986_v7 = vrot.slane %v981_v52, 4  ;;  %v960_v14 = vrot.slane %v956_v48, 4  ;;  %v967_v27 = vor.u32 %v965_v0, %v964_v8  ;;  %v969_v29 = vrot.slane %v964_v8, 4 }
 0x154   : > { %v1187_v11 = vsel %vm6652_vm9, %v976_v59, %v1186_v41  ;;  %v1180_v15 = vsel %vm6652_vm9, %v959_v60, %v1179_v50  ;;  %v985_v23 = vsel %vm6659_vm10, %v977_v2, %v984_v3  ;;  %v1357_v31 = vrot.slane %v1355_v22, 4  ;;  %v6868_v41 = vld [vmem:[#allocation2 + $0x34] sm:$0xf]  ;;  %v1235_v59 = vld [vmem:[#allocation2 + $0x38] sm:$0x1] }
 0x155   : > { %1188 = vst [vmem:[#allocation2 + $0x90] sm:$0xf] %v1187_v11  ;;  %1181 = vst [vmem:[#allocation2 + $0x84] sm:$0xf] %v1180_v15  ;;  %v1191_v26 = vsel %vm6665_vm11, %v986_v7, %v1190_v61  ;;  %v968_v37 = vsel %vm6659_vm10, %v960_v14, %v967_v27  ;;  %v1184_v24 = vsel %vm6665_vm11, %v969_v29, %v1183_v17  ;;  %v6866_v42 = vrot.slane %v1406_v39, 5 }
 0x156   : > { %1189 = vst.msk [vmem:[#allocation2 + $0x94] sm:$0xf] %vm628_vm0, %v985_v23  ;;  %1192 = vst [vmem:[#allocation2 + $0x98] sm:$0x1] %v1191_v26  ;;  %v1374_v40 = vshll.u32 %v1232_v21, 16  ;;  %v6871_v43 = vrot.slane %v1412_v55, 5  ;;  %v6878_v52 = vcombine.low %v6852_v25, %v6860_v35  ;;  %v574_v3 = vadd.f32 %v6765_v6, %v6643_v19 }
 0x157   : > { %1182 = vst.msk [vmem:[#allocation2 + $0x88] sm:$0xf] %vm628_vm0, %v968_v37  ;;  %1185 = vst [vmem:[#allocation2 + $0x8c] sm:$0x1] %v1184_v24  ;;  %v1360_v44 = vrot.slane %v1358_v32, 5  ;;  %v1366_v47 = vrot.slane %v1364_v36, 5  ;;  %v566_v22 = vadd.f32 %v6643_v19, %v6767_v12  ;;  %v577_v27 = vadd.f32 %v6769_v20, %v6643_v19 }
 0x158   : > { %v1370_v48 = vrot.slane %v1368_v34, 4  ;;  %v6873_v49 = vrot.slane %v1416_v1, 4  ;;  %v1427_v50 = vshrl.u32 %v6852_v25, 16  ;;  %8076 = vst [vmem:[#allocation10_spill] sm:$0xff] %v6878_v52  ;;  %v1379_v39 = vshrl.u32 %v6854_v30, 16  ;;  %5656 = vmatmul.mubr.msk.bf16.vlgmr.msra.gmra.mrb[0].mxu1 %vm1731_vm5, %v6878_v52  ;;  %v6897_v23 = vld [vmem:[%s8022_s3 + $0x50] sm:$0xff]  }
 0x159   : > { %v1361_v54 = vor.u32 %v1360_v44, %v1357_v31  ;;  %v1382_v60 = vshll.u32 %v6854_v30, 16  ;;  %v1388_v61 = vshll.u32 %v6868_v41, 16  ;;  %v1376_v0 = vrot.slane %v1374_v40, 5  ;;  %5680 = vmatpush3.bf16.msra.mxu1 %v6637_v18 }
 0x15a   : > { %v1371_v55 = vor.u32 %v1370_v48, %v1366_v47  ;;  %v1381_v1 = vrot.slane %v1379_v39, 4  ;;  %v1392_v2 = vshrl.u32 %v6868_v41, 16  ;;  %v1398_v17 = vshll.u32 %v1235_v59, 16  ;;  %5681 = vmatprep.subr.bf16.mxu1 %v6222_v53  ;;  %v6912_v48 = vld [vmem:[#allocation2 + $0x54] sm:$0xf] }
 0x15b   : > { %v1362_v7 = vrot.slane %v1361_v54, 4  ;;  %v1384_v11 = vrot.slane %v1382_v60, 5  ;;  %v1390_v14 = vrot.slane %v1388_v61, 5  ;;  %v622_v21 = vmax.f32 %v574_v3, 0.0  ;;  %v6920_v61 = vld [vmem:[#allocation2 + $0x58] sm:$0xf] }
 0x15c   : > { %v1372_v8 = vrot.slane %v1371_v55, 4  ;;  %v1394_v15 = vrot.slane %v1392_v2, 4  ;;  %v620_v32 = vmax.f32 %v566_v22, 0.0  ;;  %v1430_v36 = vshll.u32 %v6852_v25, 16  ;;  %8077 = vst [vmem:[#allocation11_spill] sm:$0xff] %v6920_v61 }
 0x15d   : > { %v1367_v6 = vsel %vm6619_vm4, %v1362_v7, %v1366_v47  ;;  %v1385_v26 = vor.u32 %v1384_v11, %v1381_v1  ;;  %v5149_v12 = vpack.c.bf16 %v622_v21, %v622_v21  ;;  %v623_v37 = vmax.f32 %v577_v27, 0.0  ;;  %5682 = vmatpush3.bf16.msra.mxu1 %v6222_v53  ;;  %v1200_v1 = vld [vmem:[#allocation2 + $0xa8] sm:$0xf] }
 0x15e   : > { %v1377_v18 = vsel %vm6619_vm4, %v1372_v8, %v1376_v0  ;;  %v1395_v31 = vor.u32 %v1394_v15, %v1390_v14  ;;  %v569_v24 = vadd.f32 %v6643_v19, %v6775_v28  ;;  %v1400_v44 = vrot.slane %v1398_v17, 5  ;;  %5715 = vmatprep.subr.bf16.mxu1 %v6897_v23  ;;  %v1193_v17 = vld [vmem:[#allocation2 + $0x9c] sm:$0xf] }
 0x15f   : > { %v6905_v29 = vcombine.low %v1367_v6, %v1377_v18  ;;  %v1386_v34 = vrot.slane %v1385_v26, 4  ;;  %v1005_v47 = vshrl.u32 %v5149_v12, 16  ;;  %v5147_v20 = vpack.c.bf16 %v620_v32, %v620_v32  ;;  %v6931_v26 = vld [vmem:[#allocation2 + $0x44] sm:$0x1] }
 0x160   : > { %v1396_v40 = vrot.slane %v1395_v31, 4  ;;  %v1440_v39 = vshrl.u32 %v6860_v35, 16  ;;  %v1008_v54 = vshll.u32 %v5149_v12, 16  ;;  %v5150_v55 = vpack.c.bf16 %v623_v37, %v623_v37  ;;  %v1204_v12 = vld [vmem:[#allocation2 + $0xb0] sm:$0x1] }
 0x161   : > { %5544 = vmatmul.mubr.msk.bf16.gmra.mrb[36].mxu0 %vm1731_vm5, %v6905_v29  ;;  %v621_v59 = vmax.f32 %v569_v24, 0.0  ;;  %v1391_v19 = vsel %vm6619_vm4, %v1386_v34, %v1390_v14  ;;  %v1007_v53 = vrot.slane %v1005_v47, 7  ;;  %v988_v60 = vshrl.u32 %v5147_v20, 16 }
 0x162   : > { %v1401_v28 = vsel %vm6619_vm4, %v1396_v40, %v1400_v44  ;;  %v1013_v2 = vshrl.u32 %v5150_v55, 16  ;;  %v1451_v7 = vshrl.u32 %v6912_v48, 16  ;;  %v991_v15 = vshll.u32 %v5147_v20, 16  ;;  %v1197_v44 = vld [vmem:[#allocation2 + $0xa4] sm:$0x1] }
 0x163   : > { %v6922_v0 = vcombine.low %v1391_v19, %v1401_v28  ;;  %v5148_v3 = vpack.c.bf16 %v621_v59, %v621_v59  ;;  %v1010_v8 = vor.u32 %v1008_v54, %v1007_v53  ;;  %v990_v11 = vrot.slane %v988_v60, 7  ;;  %v6944_v20 = vld [vmem:[%s8022_s3 + $0x20] sm:$0xff]   ;;  %v6955_v60 = vld [vmem:[#allocation2 + $0x50] sm:$0x1] }
 0x164   : > { %v1016_v21 = vshll.u32 %v5150_v55, 16  ;;  %v1011_v14 = vrot.slane %v1007_v53, 4  ;;  %v1015_v22 = vrot.slane %v1013_v2, 7  ;;  %v6929_v18 = vcombine.low %v6912_v48, %v6920_v61  ;;  %v6949_v59 = vld [vmem:[#allocation2 + $0x64] sm:$0xf]  ;;  %8080 = vst [vmem:[#allocation14_spill] sm:$0xff] %v6955_v60  ;;  %5607 = vmatprep.subr.bf16.mxu0 %v6944_v20 }
 0x165   : > { %5547 = vmatprep.mubr.msk.bf16.mxu0 %vm1731_vm5, %v6922_v0  ;;  %v996_v6 = vshrl.u32 %v5148_v3, 16  ;;  %v1201_v27 = vsel %vm6652_vm9, %v1010_v8, %v1200_v1  ;;  %v993_v31 = vor.u32 %v991_v15, %v990_v11  ;;  %v999_v32 = vshll.u32 %v5148_v3, 16  ;;  %8079 = vst [vmem:[#allocation13_spill] sm:$0xff] %v6949_v59 }
 0x166   : > { %8078 = vst [vmem:[#allocation12_spill] sm:$0xff] %v6929_v18  ;;  %v1409_v34 = vor.u32 %v6866_v42, %v6829_v45  ;;  %1202 = vst [vmem:[#allocation2 + $0xa8] sm:$0xf] %v1201_v27  ;;  %v1018_v37 = vor.u32 %v1016_v21, %v1015_v22  ;;  %v1020_v24 = vrot.slane %v1015_v22, 4  ;;  %5659 = vmatprep.mubr.msk.bf16.mxu1 %vm1731_vm5, %v6929_v18  ;;  %v994_v54 = vrot.slane %v990_v11, 4 }
 0x167   : > { %v998_v40 = vrot.slane %v996_v6, 7  ;;  %v1419_v47 = vor.u32 %v6873_v49, %v6871_v43  ;;  %v1194_v45 = vsel %vm6652_vm9, %v993_v31, %v1193_v17  ;;  %v1422_v55 = vshll.u32 %v6931_v26, 16  ;;  %v6961_v11 = vld [vmem:[#allocation2 + $0x60] sm:$0xf] }
 0x168   : > { %v1410_v42 = vrot.slane %v1409_v34, 4  ;;  %1195 = vst [vmem:[#allocation2 + $0x9c] sm:$0xf] %v1194_v45  ;;  %v1019_v19 = vsel %vm6659_vm10, %v1011_v14, %v1018_v37  ;;  %v1205_v49 = vsel %vm6665_vm11, %v1020_v24, %v1204_v12  ;;  %v1454_v1 = vshll.u32 %v6912_v48, 16  ;;  %8081 = vst [vmem:[#allocation15_spill] sm:$0xff] %v6961_v11 }
 0x169   : > { %v1001_v28 = vor.u32 %v999_v32, %v998_v40  ;;  %v1003_v53 = vrot.slane %v998_v40, 4  ;;  %1203 = vst.msk [vmem:[#allocation2 + $0xac] sm:$0xf] %vm628_vm0, %v1019_v19  ;;  %1206 = vst [vmem:[#allocation2 + $0xb0] sm:$0x1] %v1205_v49  ;;  %v1464_v2 = vshrl.u32 %v6920_v61, 16  ;;  %v6972_v14 = vcombine.low %v6961_v11, %v6949_v59 }
 0x16a   : > { %v1420_v3 = vrot.slane %v1419_v47, 4  ;;  %v1424_v8 = vrot.slane %v1422_v55, 5  ;;  %v1415_v21 = vsel %vm6619_vm4, %v1410_v42, %v6871_v43  ;;  %v1429_v6 = vrot.slane %v1427_v50, 4  ;;  %v6243_v34 = vld [vmem:[%s8021_s2] ss:$0 sm:$0xff] }
 0x16b   : > { %v1002_v15 = vsel %vm6659_vm10, %v994_v54, %v1001_v28  ;;  %v1198_v17 = vsel %vm6665_vm11, %v1003_v53, %v1197_v44  ;;  %8082 = vst [vmem:[#allocation16_spill] sm:$0xff] %v6972_v14  ;;  %v1432_v27 = vrot.slane %v1430_v36, 5  ;;  %v1436_v31 = vshll.u32 %v6860_v35, 16  ;;  %5660 = vmatmul.mubr.msk.bf16.gmra.mrb[4].mxu1 %vm1731_vm5, %v6972_v14  ;;  %v7000_v42 = vld [vmem:[#allocation2 + $0x70] sm:$0xf] }
 0x16c   : > { %1196 = vst.msk [vmem:[#allocation2 + $0xa0] sm:$0xf] %vm628_vm0, %v1002_v15  ;;  %1199 = vst [vmem:[#allocation2 + $0xa4] sm:$0x1] %v1198_v17  ;;  %v1425_v22 = vsel %vm6619_vm4, %v1420_v3, %v1424_v8  ;;  %v1442_v43 = vrot.slane %v1440_v39, 4  ;;  %v1446_v32 = vshll.u32 %v6955_v60, 16  ;;  %v590_v50 = vadd.f32 %v6243_v34, %v6779_v57 }
 0x16d   : > { %v6982_v12 = vcombine.low %v1415_v21, %v1425_v22  ;;  %v1433_v25 = vor.u32 %v1432_v27, %v1429_v6  ;;  %v1438_v36 = vrot.slane %v1436_v31, 5  ;;  %v582_v37 = vadd.f32 %v6243_v34, %v6783_v63  ;;  %8083 = vst [vmem:[#allocation17_spill] sm:$0xff] %v7000_v42  ;;  %v7005_v8 = vld [vmem:[#allocation2 + $0x6c] sm:$0xf] }
 0x16e   : > { %v593_v24 = vadd.f32 %v6243_v34, %v6793_v4  ;;  %v1475_v35 = vshrl.u32 %v6961_v11, 16  ;;  %v1478_v39 = vshll.u32 %v6961_v11, 16  ;;  %v626_v40 = vmax.f32 %v590_v50, 0.0  ;;  %8084 = vst [vmem:[#allocation18_spill] sm:$0xff] %v7005_v8 }
 0x16f   : > { %5548 = vmatmul.mubr.msk.bf16.gmra.mrb[40].mxu0 %vm1731_vm5, %v6982_v12  ;;  %v585_v44 = vadd.f32 %v6243_v34, %v6799_v13  ;;  %v1434_v47 = vrot.slane %v1433_v25, 4  ;;  %v1443_v54 = vor.u32 %v1442_v43, %v1438_v36  ;;  %v624_v45 = vmax.f32 %v582_v37, 0.0  ;;  %v1214_v34 = vld [vmem:[#allocation2 + $0xc0] sm:$0xf]  ;;  %v1207_v37 = vld [vmem:[#allocation2 + $0xb4] sm:$0xf] }
 0x170   : > { %v627_v57 = vmax.f32 %v593_v24, 0.0  ;;  %v1488_v63 = vshrl.u32 %v6949_v59, 16  ;;  %v1448_v55 = vrot.slane %v1446_v32, 5  ;;  %v5153_v4 = vpack.c.bf16 %v626_v40, %v626_v40 }
 0x171   : > { %v625_v19 = vmax.f32 %v585_v44, 0.0  ;;  %v1439_v49 = vsel %vm6619_vm4, %v1434_v47, %v1438_v36  ;;  %v1444_v28 = vrot.slane %v1443_v54, 4  ;;  %v5151_v53 = vpack.c.bf16 %v624_v45, %v624_v45  ;;  %v1218_v45 = vld [vmem:[#allocation2 + $0xc8] sm:$0x1] }
 0x172   : > { %v5154_v3 = vpack.c.bf16 %v627_v57, %v627_v57  ;;  %v1039_v13 = vshrl.u32 %v5153_v4, 16  ;;  %v1042_v15 = vshll.u32 %v5153_v4, 16  ;;  %v7009_v21 = vcombine.low %v7005_v8, %v7000_v42 }
 0x173   : > { %v5152_v17 = vpack.c.bf16 %v625_v19, %v625_v19  ;;  %v1449_v22 = vsel %vm6619_vm4, %v1444_v28, %v1448_v55  ;;  %v1022_v6 = vshrl.u32 %v5151_v53, 16  ;;  %v1025_v27 = vshll.u32 %v5151_v53, 16  ;;  %v1211_v53 = vld [vmem:[#allocation2 + $0xbc] sm:$0x1] }
 0x174   : > { %8085 = vst [vmem:[#allocation19_spill] sm:$0xff] %v7009_v21  ;;  %v1047_v31 = vshrl.u32 %v5154_v3, 16  ;;  %v7013_v43 = vcombine.low %v1439_v49, %v1449_v22  ;;  %v1041_v32 = vrot.slane %v1039_v13, 7  ;;  %v1050_v50 = vshll.u32 %v5154_v3, 16  ;;  %5663 = vmatprep.mubr.msk.bf16.mxu1 %vm1731_vm5, %v7009_v21 }
 0x175   : > { %v1030_v25 = vshrl.u32 %v5152_v17, 16  ;;  %v1024_v36 = vrot.slane %v1022_v6, 7  ;;  %v1033_v40 = vshll.u32 %v5152_v17, 16  ;;  %v1453_v44 = vrot.slane %v1451_v7, 4  ;;  %v7025_v17 = vld [vmem:[#allocation2 + $0x5c] sm:$0x1] }
 0x176   : > { %v1049_v24 = vrot.slane %v1047_v31, 7  ;;  %5551 = vmatprep.mubr.msk.bf16.mxu0 %vm1731_vm5, %v7013_v43  ;;  %v1044_v47 = vor.u32 %v1042_v15, %v1041_v32  ;;  %v1045_v54 = vrot.slane %v1041_v32, 4  ;;  %v1456_v55 = vrot.slane %v1454_v1, 5  ;;  %8086 = vst [vmem:[#allocation20_spill] sm:$0xff] %v7025_v17 }
 0x177   : > { %v1032_v57 = vrot.slane %v1030_v25, 7  ;;  %v1027_v4 = vor.u32 %v1025_v27, %v1024_v36  ;;  %v1028_v19 = vrot.slane %v1024_v36, 4  ;;  %v1460_v6 = vshll.u32 %v6920_v61, 16  ;;  %v7034_v27 = vld [vmem:[#allocation2 + $0x7c] sm:$0xf] }
 0x178   : > { %v1052_v49 = vor.u32 %v1050_v50, %v1049_v24  ;;  %v1054_v28 = vrot.slane %v1049_v24, 4  ;;  %v1215_v3 = vsel %vm6652_vm9, %v1044_v47, %v1214_v34  ;;  %v1457_v22 = vor.u32 %v1456_v55, %v1453_v44  ;;  %v7044_v50 = vld [vmem:[#allocation2 + $0x78] sm:$0xf]  ;;  %v7049_v24 = vld [vmem:[#allocation2 + $0x68] sm:$0x1] }
 0x179   : > { %v1035_v13 = vor.u32 %v1033_v40, %v1032_v57  ;;  %v1037_v7 = vrot.slane %v1032_v57, 4  ;;  %1216 = vst [vmem:[#allocation2 + $0xc0] sm:$0xf] %v1215_v3  ;;  %v1208_v15 = vsel %vm6652_vm9, %v1027_v4, %v1207_v37  ;;  %v1499_v32 = vshrl.u32 %v7005_v8, 16  ;;  %8087 = vst [vmem:[#allocation21_spill] sm:$0xff] %v7049_v24 }
 0x17a   : > { %v1053_v48 = vsel %vm6659_vm10, %v1045_v54, %v1052_v49  ;;  %v1219_v1 = vsel %vm6665_vm11, %v1054_v28, %v1218_v45  ;;  %1209 = vst [vmem:[#allocation2 + $0xb4] sm:$0xf] %v1208_v15  ;;  %v1466_v34 = vrot.slane %v1464_v2, 4  ;;  %v1502_v25 = vshll.u32 %v7005_v8, 16  ;;  %v7060_v47 = vld [vmem:[#allocation2 + $0x84] sm:$0xf] }
 0x17b   : > { %1217 = vst.msk [vmem:[#allocation2 + $0xc4] sm:$0xf] %vm628_vm0, %v1053_v48  ;;  %1220 = vst [vmem:[#allocation2 + $0xc8] sm:$0x1] %v1219_v1  ;;  %v1036_v31 = vsel %vm6659_vm10, %v1028_v19, %v1035_v13  ;;  %v1212_v46 = vsel %vm6665_vm11, %v1037_v7, %v1211_v53  ;;  %v1458_v36 = vrot.slane %v1457_v22, 4  ;;  %v1462_v37 = vrot.slane %v1460_v6, 5 }
 0x17c   : > { %1210 = vst.msk [vmem:[#allocation2 + $0xb8] sm:$0xf] %vm628_vm0, %v1036_v31  ;;  %1213 = vst [vmem:[#allocation2 + $0xbc] sm:$0x1] %v1212_v46  ;;  %v1470_v56 = vshll.u32 %v7025_v17, 16  ;;  %v1512_v62 = vshrl.u32 %v7000_v42, 16  ;;  %v7054_v40 = vcombine.low %v7044_v50, %v7034_v27 }
 0x17d   : > { %v1477_v2 = vrot.slane %v1475_v35, 4  ;;  %v1480_v44 = vrot.slane %v1478_v39, 5  ;;  %v1467_v54 = vor.u32 %v1466_v34, %v1462_v37  ;;  %v1523_v45 = vshrl.u32 %v7044_v50, 16  ;;  %v7065_v4 = vld [vmem:[#allocation2 + $0x88] sm:$0xf] }
 0x17e   : > { %8088 = vst [vmem:[#allocation22_spill] sm:$0xff] %v7054_v40  ;;  %v1526_v57 = vshll.u32 %v7044_v50, 16  ;;  %v1484_v55 = vshll.u32 %v6949_v59, 16  ;;  %v1536_v19 = vshrl.u32 %v7034_v27, 16  ;;  %5664 = vmatmul.mubr.msk.bf16.gmra.mrb[8].mxu1 %vm1731_vm5, %v7054_v40  ;;  %v1490_v39 = vrot.slane %v1488_v63, 4 }
 0x17f   : > { %v1481_v35 = vor.u32 %v1480_v44, %v1477_v2  ;;  %v1494_v49 = vshll.u32 %v7049_v24, 16  ;;  %v1463_v28 = vsel %vm6619_vm4, %v1458_v36, %v1462_v37  ;;  %v1468_v53 = vrot.slane %v1467_v54, 4  ;;  %v7080_v48 = vld [vmem:[#allocation2 + $0x74] sm:$0x1]  ;;  %v7085_v34 = vld [vmem:[#allocation2 + $0x90] sm:$0xf] }
 0x180   : > { %v1472_v3 = vrot.slane %v1470_v56, 5  ;;  %v1486_v13 = vrot.slane %v1484_v55, 5  ;;  %v1547_v22 = vshrl.u32 %v7060_v47, 16  ;;  %v7078_v15 = vcombine.low %v7060_v47, %v7065_v4  ;;  %8090 = vst [vmem:[#allocation24_spill] sm:$0xff] %v7080_v48  ;;  %v7087_v36 = vld [vmem:[#allocation2 + $0x94] sm:$0xf] }
 0x181   : > { %v1482_v7 = vrot.slane %v1481_v35, 4  ;;  %v1501_v1 = vrot.slane %v1499_v32, 4  ;;  %v1504_v31 = vrot.slane %v1502_v25, 5  ;;  %v1508_v46 = vshll.u32 %v7000_v42, 16  ;;  %v7116_v8 = vld [vmem:[#allocation2 + $0xa0] sm:$0xf] }
 0x182   : > { %8089 = vst [vmem:[#allocation23_spill] sm:$0xff] %v7078_v15  ;;  %v1473_v63 = vsel %vm6619_vm4, %v1468_v53, %v1472_v3  ;;  %v1491_v6 = vor.u32 %v1490_v39, %v1486_v13  ;;  %v1496_v56 = vrot.slane %v1494_v49, 5  ;;  %v1550_v2 = vshll.u32 %v7060_v47, 16  ;;  %5667 = vmatprep.mubr.msk.bf16.mxu1 %vm1731_vm5, %v7078_v15  ;;  %v7155_v61 = vld [vmem:[#allocation2 + $0x98] sm:$0x1] }
 0x183   : > { %v7089_v37 = vcombine.low %v1463_v28, %v1473_v63  ;;  %v1514_v32 = vrot.slane %v1512_v62, 4  ;;  %v1505_v54 = vor.u32 %v1504_v31, %v1501_v1  ;;  %v1510_v55 = vrot.slane %v1508_v46, 5  ;;  %v7107_v1 = vld [vmem:[#allocation2 + $0x80] sm:$0x1] }
 0x184   : > { %v1492_v44 = vrot.slane %v1491_v6, 4  ;;  %v1518_v25 = vshll.u32 %v7080_v48, 16  ;;  %v1487_v35 = vsel %vm6619_vm4, %v1482_v7, %v1486_v13  ;;  %v1560_v39 = vshrl.u32 %v7065_v4, 16  ;;  %v7109_v6 = vld [vmem:[#allocation2 + $0x9c] sm:$0xf] }
 0x185   : > { %5552 = vmatmul.mubr.msk.bf16.gmra.mrb[44].mxu0 %vm1731_vm5, %v7089_v37  ;;  %v1571_v49 = vshrl.u32 %v7085_v34, 16  ;;  %v7103_v28 = vcombine.low %v7085_v34, %v7087_v36  ;;  %v1506_v53 = vrot.slane %v1505_v54, 4  ;;  %v1515_v3 = vor.u32 %v1514_v32, %v1510_v55  ;;  %v7192_v18 = vld [vmem:[#allocation2 + $0xc0] sm:$0xf] }
 0x186   : > { %v1497_v62 = vsel %vm6619_vm4, %v1492_v44, %v1496_v56  ;;  %v1525_v63 = vrot.slane %v1523_v45, 4  ;;  %v1528_v13 = vrot.slane %v1526_v57, 5  ;;  %v1532_v7 = vshll.u32 %v7034_v27, 16 }
 0x187   : > { %8091 = vst [vmem:[#allocation25_spill] sm:$0xff] %v7103_v28  ;;  %v7111_v31 = vcombine.low %v1487_v35, %v1497_v62  ;;  %5668 = vmatmul.mubr.msk.bf16.gmra.mrb[12].mxu1 %vm1731_vm5, %v7103_v28  ;;  %v1538_v46 = vrot.slane %v1536_v19, 4  ;;  %v1516_v11 = vrot.slane %v1515_v3, 4  ;;  %v1520_v56 = vrot.slane %v1518_v25, 5  ;;  %v7132_v3 = vld [vmem:[#allocation2 + $0x8c] sm:$0x1] }
 0x188   : > { %v1574_v32 = vshll.u32 %v7085_v34, 16  ;;  %v1584_v44 = vshrl.u32 %v7087_v36, 16  ;;  %v1511_v45 = vsel %vm6619_vm4, %v1506_v53, %v1510_v55  ;;  %v1529_v54 = vor.u32 %v1528_v13, %v1525_v63  ;;  %v7136_v63 = vld [vmem:[#allocation2 + $0xa8] sm:$0xf]  ;;  %v7138_v13 = vld [vmem:[#allocation2 + $0xac] sm:$0xf] }
 0x189   : > { %5555 = vmatprep.mubr.msk.bf16.mxu0 %vm1731_vm5, %v7111_v31  ;;  %v1534_v35 = vrot.slane %v1532_v7, 5  ;;  %v1542_v57 = vshll.u32 %v7107_v1, 16  ;;  %v1521_v19 = vsel %vm6619_vm4, %v1516_v11, %v1520_v56  ;;  %v1595_v62 = vshrl.u32 %v7109_v6, 16  ;;  %v7166_v28 = vld [vmem:[#allocation2 + $0xb8] sm:$0xf] }
 0x18a   : > { %v7130_v25 = vcombine.low %v7109_v6, %v7116_v8  ;;  %v1549_v48 = vrot.slane %v1547_v22, 4  ;;  %v7134_v24 = vcombine.low %v1511_v45, %v1521_v19  ;;  %v1530_v42 = vrot.slane %v1529_v54, 4 }
 0x18b   : > { %v1539_v55 = vor.u32 %v1538_v46, %v1534_v35  ;;  %v1552_v53 = vrot.slane %v1550_v2, 5  ;;  %v1598_v11 = vshll.u32 %v7109_v6, 16  ;;  %v1608_v7 = vshrl.u32 %v7116_v8, 16 }
 0x18c   : > { %8092 = vst [vmem:[#allocation26_spill] sm:$0xff] %v7130_v25  ;;  %5671 = vmatprep.mubr.msk.bf16.mxu1 %vm1731_vm5, %v7130_v25  ;;  %v1556_v56 = vshll.u32 %v7065_v4, 16  ;;  %v1562_v59 = vrot.slane %v1560_v39, 4  ;;  %v1544_v46 = vrot.slane %v1542_v57, 5  ;;  %v1566_v45 = vshll.u32 %v7132_v3, 16 }
 0x18d   : > { %5556 = vmatmul.mubr.msk.bf16.gmra.mrb[48].mxu0 %vm1731_vm5, %v7134_v24  ;;  %v1540_v22 = vrot.slane %v1539_v55, 4  ;;  %v1553_v2 = vor.u32 %v1552_v53, %v1549_v48  ;;  %v1535_v54 = vsel %vm6619_vm4, %v1530_v42, %v1534_v35  ;;  %v1619_v17 = vshrl.u32 %v7136_v63, 16 }
 0x18e   : > { %v1558_v19 = vrot.slane %v1556_v56, 5  ;;  %v7153_v60 = vcombine.low %v7136_v63, %v7138_v13  ;;  %v1573_v57 = vrot.slane %v1571_v49, 4  ;;  %v1576_v48 = vrot.slane %v1574_v32, 5  ;;  %v7164_v56 = vld [vmem:[#allocation2 + $0xb4] sm:$0xf] }
 0x18f   : > { %v1545_v39 = vsel %vm6619_vm4, %v1540_v22, %v1544_v46  ;;  %v1554_v55 = vrot.slane %v1553_v2, 4  ;;  %v1580_v42 = vshll.u32 %v7087_v36, 16  ;;  %v1586_v35 = vrot.slane %v1584_v44, 4  ;;  %v7175_v2 = vld [vmem:[#allocation2 + $0xa4] sm:$0x1] }
 0x190   : > { %8093 = vst [vmem:[#allocation27_spill] sm:$0xff] %v7153_v60  ;;  %v7159_v53 = vcombine.low %v1535_v54, %v1545_v39  ;;  %v1563_v25 = vor.u32 %v1562_v59, %v1558_v19  ;;  %5672 = vmatmul.mubr.msk.bf16.gmra.mrb[16].mxu1 %vm1731_vm5, %v7153_v60  ;;  %v1568_v15 = vrot.slane %v1566_v45, 5  ;;  %v1622_v40 = vshll.u32 %v7136_v63, 16 }
 0x191   : > { %v1577_v22 = vor.u32 %v1576_v48, %v1573_v57  ;;  %v1590_v49 = vshll.u32 %v7155_v61, 16  ;;  %v1559_v59 = vsel %vm6619_vm4, %v1554_v55, %v1558_v19  ;;  %v1632_v46 = vshrl.u32 %v7138_v13, 16  ;;  %v7182_v48 = vld [vmem:[#allocation2 + $0xc4] sm:$0xf] }
 0x192   : > { %8094 = vst [vmem:[#allocation28_spill] sm:$0xff] %v7159_v53  ;;  %5559 = vmatprep.mubr.msk.bf16.mxu0 %vm1731_vm5, %v7159_v53  ;;  %v1564_v32 = vrot.slane %v1563_v25, 4  ;;  %v1582_v44 = vrot.slane %v1580_v42, 5  ;;  %v1643_v45 = vshrl.u32 %v7164_v56, 16  ;;  %v7180_v39 = vcombine.low %v7164_v56, %v7166_v28 }
 0x193   : > { %v1578_v54 = vrot.slane %v1577_v22, 4  ;;  %v1597_v57 = vrot.slane %v1595_v62, 4  ;;  %v1600_v25 = vrot.slane %v1598_v11, 5  ;;  %v1604_v55 = vshll.u32 %v7116_v8, 16 }
 0x194   : > { %8095 = vst [vmem:[#allocation29_spill] sm:$0xff] %v7180_v39  ;;  %v1569_v60 = vsel %vm6619_vm4, %v1564_v32, %v1568_v15  ;;  %v1587_v19 = vor.u32 %v1586_v35, %v1582_v44  ;;  %v1592_v21 = vrot.slane %v1590_v49, 5  ;;  %5675 = vmatprep.mubr.msk.bf16.mxu1 %vm1731_vm5, %v7180_v39  ;;  %v1610_v22 = vrot.slane %v1608_v7, 4  ;;  %v7204_v35 = vld [vmem:[#allocation2 + $0xb0] sm:$0x1] }
 0x195   : > { %v7187_v42 = vcombine.low %v1559_v59, %v1569_v60  ;;  %v1614_v14 = vshll.u32 %v7175_v2, 16  ;;  %v1601_v53 = vor.u32 %v1600_v25, %v1597_v57  ;;  %v1606_v52 = vrot.slane %v1604_v55, 5 }
 0x196   : > { %v1588_v62 = vrot.slane %v1587_v19, 4  ;;  %v7196_v15 = vcombine.low %v7192_v18, %v7182_v48  ;;  %v1583_v60 = vsel %vm6619_vm4, %v1578_v54, %v1582_v44  ;;  %v1646_v11 = vshll.u32 %v7164_v56, 16 }
 0x197   : > { %8096 = vst [vmem:[#allocation30_spill] sm:$0xff] %v7187_v42  ;;  %5560 = vmatmul.mubr.msk.bf16.gmra.mrb[52].mxu0 %vm1731_vm5, %v7187_v42  ;;  %v1656_v7 = vshrl.u32 %v7166_v28, 16  ;;  %v1602_v59 = vrot.slane %v1601_v53, 4  ;;  %v1611_v32 = vor.u32 %v1610_v22, %v1606_v52  ;;  %v1621_v57 = vrot.slane %v1619_v17, 4  ;;  %v7218_v17 = vld [vmem:[#allocation2 + $0xbc] sm:$0x1] }
 0x198   : > { %8097 = vst [vmem:[#allocation31_spill] sm:$0xff] %v7196_v15  ;;  %v1593_v49 = vsel %vm6619_vm4, %v1588_v62, %v1592_v21  ;;  %5676 = vmatmul.mubr.msk.bf16.gmra.mrb[20].mxu1 %vm1731_vm5, %v7196_v15  ;;  %v1624_v25 = vrot.slane %v1622_v40, 5  ;;  %v1628_v44 = vshll.u32 %v7138_v13, 16  ;;  %v1634_v54 = vrot.slane %v1632_v46, 4 }
 0x199   : > { %v7210_v19 = vcombine.low %v1583_v60, %v1593_v49  ;;  %5683 = vmatprep.mubr.msk.bf16.mxu1 %vm1731_vm5, %v6797_v5  ;;  %v1612_v55 = vrot.slane %v1611_v32, 4  ;;  %v1616_v39 = vrot.slane %v1614_v14, 5  ;;  %v1638_v42 = vshll.u32 %v7204_v35, 16 }
 0x19a   : > { %v1645_v21 = vrot.slane %v1643_v45, 4  ;;  %v1625_v53 = vor.u32 %v1624_v25, %v1621_v57  ;;  %v1630_v22 = vrot.slane %v1628_v44, 5  ;;  %v1648_v62 = vrot.slane %v1646_v11, 5  ;;  %v6231_v11 = vld [vmem:[%s8022_s3 + $0x58] sm:$0xff]  }
 0x19b   : > { %5563 = vmatprep.mubr.msk.bf16.mxu0 %vm1731_vm5, %v7210_v19  ;;  %v1652_v40 = vshll.u32 %v7166_v28, 16  ;;  %v1607_v46 = vsel %vm6619_vm4, %v1602_v59, %v1606_v52  ;;  %v1617_v5 = vsel %vm6619_vm4, %v1612_v55, %v1616_v39  ;;  %v1658_v14 = vrot.slane %v1656_v7, 4 }
 0x19c   : > { %v7225_v60 = vcombine.low %v1607_v46, %v1617_v5  ;;  %v1626_v45 = vrot.slane %v1625_v53, 4  ;;  %v1635_v49 = vor.u32 %v1634_v54, %v1630_v22  ;;  %v1649_v32 = vor.u32 %v1648_v62, %v1645_v21  ;;  %v7247_v21 = vld [vmem:[%s8022_s3 + $0x60] sm:$0xff]  }
 0x19d   : > { %v1654_v15 = vrot.slane %v1652_v40, 5  ;;  %v1662_v57 = vshll.u32 %v7218_v17, 16  ;;  %v1640_v59 = vrot.slane %v1638_v42, 5  ;;  %v7257_v62 = vld [vmem:[#allocation2 + $0x4] sm:$0xf]  ;;  %v4875_v5 = vrot.slane %v6808_v16, 9 }
 0x19e   : > { %v1636_v52 = vrot.slane %v1635_v49, 4  ;;  %v1650_v25 = vrot.slane %v1649_v32, 4  ;;  %v1631_v7 = vsel %vm6619_vm4, %v1626_v45, %v1630_v22  ;;  %v7255_v22 = vld [vmem:[#allocation2] sm:$0xf]  ;;  %v7281_v49 = vld [vmem:[#allocation2 + $0x10] sm:$0xf] }
 0x19f   : > { %5564 = vmatmul.mubr.msk.bf16.gmra.mrb[56].mxu0 %vm1731_vm5, %v7225_v60  ;;  %v1659_v39 = vor.u32 %v1658_v14, %v1654_v15  ;;  %v1664_v42 = vrot.slane %v1662_v57, 5  ;;  %v4836_v40 = vcombine.low %v7255_v22, %v7257_v62 }
 0x1a0   : > { %5684 = vmatmul.mubr.msk.bf16.vlgmr.msra.gmra.mrb[24].mxu1 %vm1731_vm5, %v6822_v33  ;;  %v1641_v44 = vsel %vm6619_vm4, %v1636_v52, %v1640_v59  ;;  %v1655_v53 = vsel %vm6619_vm4, %v1650_v25, %v1654_v15  ;;  %v2298_v15 = vrot.slane %v6824_v38, 5  ;;  %v7279_v38 = vld [vmem:[#allocation2 + $0xc] sm:$0xf]  ;;  %v7289_v52 = vld [vmem:[#allocation2 + $0x1c] sm:$0xf]  ;;  %v2301_v25 = vrot.slane %v6931_v26, 5 }
 0x1a1   : > { %5716 = vmatpush3.bf16.msra.mxu1 %v6897_v23  ;;  %5687 = vmatprep.mubr.msk.bf16.mxu1 %vm1731_vm5, %v6905_v29  ;;  %v7242_v54 = vcombine.low %v1631_v7, %v1641_v44  ;;  %v1660_v55 = vrot.slane %v1659_v39, 4  ;;  %v7285_v32 = vcombine.low %v7279_v38, %v7281_v49  ;;  %v6234_v59 = vld [vmem:[%s8022_s3 + $0x28] sm:$0xff]   ;;  %v7314_v26 = vcombine.low %v6836_v58, %v6841_v9 }
 0x1a2   : > { %5717 = vmatprep.subr.bf16.mxu1 %v6231_v11  ;;  %v2299_v45 = vsel %vm7273_vm14, %v4875_v5, %v2298_v15  ;;  %v2300_v57 = vrot.slane %v2298_v15, 4  ;;  %v4880_v44 = vrot.slane %v7044_v50, 9  ;;  %v2343_v50 = vrot.slane %v7132_v3, 5 }
 0x1a3   : > { %5567 = vmatprep.mubr.msk.bf16.mxu0 %vm1731_vm5, %v7242_v54  ;;  %v1665_v23 = vsel %vm6619_vm4, %v1660_v55, %v1664_v42  ;;  %v2333_v55 = vrot.slane %v7034_v27, 5  ;;  %v7320_v42 = vcombine.low %v6854_v30, %v6868_v41  ;;  %v2336_v27 = vrot.slane %v7107_v1, 5 }
 0x1a4   : > { %v7261_v46 = vcombine.low %v1655_v53, %v1665_v23  ;;  %v2302_v39 = vsel %vm7273_vm14, %v2300_v57, %v2301_v25  ;;  %v4881_v30 = vrot.slane %v7060_v47, 9  ;;  %v2340_v41 = vrot.slane %v7065_v4, 5 }
 0x1a5   : > { %5718 = vmatpush3.bf16.msra.mxu1 %v6231_v11  ;;  %v7287_v11 = vld [vmem:[#allocation2 + $0x18] sm:$0xf]  ;;  %v7310_v7 = vcombine.low %v2299_v45, %v2302_v39  ;;  %v2334_v58 = vsel %vm7273_vm14, %v4880_v44, %v2333_v55  ;;  %v2335_v9 = vrot.slane %v2333_v55, 4  ;;  %v4882_v53 = vrot.slane %v7085_v34, 9 }
 0x1a6   : > { %5751 = vmatprep.subr.bf16.mxu1 %v7247_v21  ;;  %v7293_v16 = vcombine.low %v7287_v11, %v7289_v52  ;;  %v2347_v23 = vrot.slane %v7087_v36, 5  ;;  %v4883_v15 = vrot.slane %v7109_v6, 9  ;;  %v2341_v47 = vsel %vm7273_vm14, %v4881_v30, %v2340_v41 }
 0x1a7   : > { %5568 = vmatmul.mubr.msk.bf16.gmra.mrb[60].mxu0 %vm1731_vm5, %v7261_v46  ;;  %v2337_v1 = vsel %vm7273_vm14, %v2335_v9, %v2336_v27  ;;  %v2342_v4 = vrot.slane %v2340_v41, 4  ;;  %v2354_v34 = vrot.slane %v7116_v8, 5  ;;  %v2357_v57 = vrot.slane %v7175_v2, 5  ;;  %v8101_v41 = vld [vmem:[#allocation28_spill] sm:$0xff] }
 0x1a8   : > { %5575 = vmatprep.mubr.msk.bf16.mxu0 %vm1731_vm5, %v4836_v40  ;;  %5688 = vmatmul.mubr.msk.bf16.gmra.mrb[28].mxu1 %vm1731_vm5, %v6922_v0  ;;  %v2350_v40 = vrot.slane %v7155_v61, 5  ;;  %v7348_v5 = vcombine.low %v2334_v58, %v2337_v1  ;;  %v2348_v3 = vsel %vm7273_vm14, %v4882_v53, %v2347_v23  ;;  %v2349_v45 = vrot.slane %v2347_v23, 4  ;;  %v8102_v23 = vld [vmem:[#allocation30_spill] sm:$0xff] }
 0x1a9   : > { %5691 = vmatprep.mubr.msk.bf16.mxu1 %vm1731_vm5, %v6982_v12  ;;  %v4884_v36 = vrot.slane %v7136_v63, 9  ;;  %v2344_v61 = vsel %vm7273_vm14, %v2342_v4, %v2343_v50  ;;  %v2355_v6 = vsel %vm7273_vm14, %v4883_v15, %v2354_v34  ;;  %v2361_v25 = vrot.slane %v7138_v13, 5  ;;  %v1271_v13 = vld [vmem:[#allocation2 + $0xc8] sm:$0x1] }
 0x1aa   : > { %v7362_v39 = vcombine.low %v2341_v47, %v2344_v61  ;;  %v2351_v8 = vsel %vm7273_vm14, %v2349_v45, %v2350_v40  ;;  %v2364_v44 = vrot.slane %v7204_v35, 5  ;;  %v4885_v27 = vrot.slane %v7164_v56, 9  ;;  %v8100_v35 = vld [vmem:[#allocation10_spill] sm:$0xff] }
 0x1ab   : > { %v7367_v55 = vcombine.low %v2348_v3, %v2351_v8  ;;  %v2362_v2 = vsel %vm7273_vm14, %v4884_v36, %v2361_v25  ;;  %v2363_v58 = vrot.slane %v2361_v25, 4  ;;  %v2368_v30 = vrot.slane %v7166_v28, 5  ;;  %v8103_v25 = vld [vmem:[#allocation12_spill] sm:$0xff] }
 0x1ac   : > { %v4970_v53 = vrot.slane %v7192_v18, 9  ;;  %v3140_v1 = vrot.slane %v7182_v48, 5  ;;  %v2371_v15 = vrot.slane %v7218_v17, 5  ;;  %v2911_v3 = vshrl.u32 %v7182_v48, 16 }
 0x1ad   : > { %v2365_v50 = vsel %vm7273_vm14, %v2363_v58, %v2364_v44  ;;  %v2369_v28 = vsel %vm7273_vm14, %v4885_v27, %v2368_v30  ;;  %v2370_v56 = vrot.slane %v2368_v30, 4  ;;  %v2907_v45 = vshll.u32 %v7182_v48, 16  ;;  %v8104_v48 = vld [vmem:[#allocation16_spill] sm:$0xff] }
 0x1ae   : > { %v7389_v40 = vcombine.low %v2362_v2, %v2365_v50  ;;  %v3141_v47 = vsel %vm7273_vm14, %v4970_v53, %v3140_v1  ;;  %v3142_v4 = vrot.slane %v3140_v1, 4  ;;  %v2901_v17 = vshll.u32 %v7192_v18, 16  ;;  %v8105_v50 = vld [vmem:[#allocation19_spill] sm:$0xff]  ;;  %v8106_v1 = vld [vmem:[#allocation22_spill] sm:$0xff] }
 0x1af   : > { %5576 = vmatmul.mubr.msk.bf16.vlgmr.msra.gmra.mrb[32].mxu0 %vm1731_vm5, %v7285_v32  ;;  %v2909_v8 = vrot.slane %v2907_v45, 5  ;;  %v2913_v44 = vrot.slane %v2911_v3, 4  ;;  %v2917_v30 = vshll.u32 %v1271_v13, 16  ;;  %v6252_v45 = vld [vmem:[#allocation2 + $0x28] sm:$0xf] }
 0x1b0   : > { %5579 = vmatprep.mubr.msk.bf16.mxu0 %vm1731_vm5, %v7293_v16  ;;  %5692 = vmatmul.mubr.msk.bf16.gmra.mrb[0].mxu1 %vm1731_vm5, %v7013_v43  ;;  %v2903_v2 = vrot.slane %v2901_v17, 5 }
 0x1b1   : > { %5695 = vmatprep.mubr.msk.bf16.mxu1 %vm1731_vm5, %v7089_v37  ;;  %5608 = vmatpush3.bf16.msra.mxu0 %v6944_v20  ;;  %v7325_v20 = vld [vmem:[%s8022_s3 + $0x30] sm:$0xff]   ;;  %v2914_v58 = vor.u32 %v2913_v44, %v2909_v8 }
 0x1b2   : > { %5609 = vmatprep.subr.bf16.mxu0 %v6234_v59  ;;  %v8107_v44 = vld [vmem:[#allocation23_spill] sm:$0xff] }
 0x1b3   : > { %v2915_v53 = vrot.slane %v2914_v58, 4  ;;  %v6253_v58 = vld [vmem:[#allocation2 + $0x20] sm:$0x1] }
 0x1b5   : > { %5610 = vmatpush3.bf16.msra.mxu0 %v6234_v59  ;;  %v2356_v59 = vrot.slane %v2354_v34, 4  ;;  %v3143_v34 = vrot.slane %v1271_v13, 5  ;;  %v2277_v13 = vrot.slane %v7289_v52, 5 }
 0x1b6   : > { %5643 = vmatprep.subr.bf16.mxu0 %v7325_v20 }
 0x1b7   : > { %5580 = vmatmul.mubr.msk.bf16.gmra.mrb[36].mxu0 %vm1731_vm5, %v7314_v26  ;;  %v2358_v63 = vsel %vm7273_vm14, %v2356_v59, %v2357_v57  ;;  %v2372_v57 = vsel %vm7273_vm14, %v2370_v56, %v2371_v15  ;;  %v3144_v61 = vsel %vm7273_vm14, %v3142_v4, %v3143_v34  ;;  %v2919_v15 = vrot.slane %v2917_v30, 5 }
 0x1b8   : > { %5583 = vmatprep.mubr.msk.bf16.mxu0 %vm1731_vm5, %v7320_v42  ;;  %5696 = vmatmul.mubr.msk.bf16.gmra.mrb[4].mxu1 %vm1731_vm5, %v7111_v31  ;;  %v7375_v9 = vcombine.low %v2355_v6, %v2358_v63  ;;  %v7400_v36 = vcombine.low %v2369_v28, %v2372_v57  ;;  %v2898_v6 = vshrl.u32 %v7192_v18, 16  ;;  %v7406_v59 = vcombine.low %v3141_v47, %v3144_v61  ;;  %v6251_v47 = vld [vmem:[#allocation2 + $0x14] sm:$0x1] }
 0x1b9   : > { %5699 = vmatprep.mubr.msk.bf16.mxu1 %vm1731_vm5, %v7134_v24  ;;  %v2270_v18 = vrot.slane %v7281_v49, 5  ;;  %v2273_v49 = vrot.slane %v6251_v47, 5  ;;  %v2920_v4 = vsel %vm6619_vm4, %v2915_v53, %v2919_v15  ;;  %v4871_v34 = vrot.slane %v7279_v38, 9  ;;  %v8108_v38 = vld [vmem:[#allocation25_spill] sm:$0xff]  ;;  %v6256_v47 = vld [vmem:[#allocation2 + $0x24] sm:$0xf] }
 0x1ba   : > { %v2900_v63 = vrot.slane %v2898_v6, 4  ;;  %v2284_v57 = vrot.slane %v6252_v45, 5  ;;  %v4872_v53 = vrot.slane %v7287_v11, 9  ;;  %v6257_v45 = vld [vmem:[#allocation2 + $0x8] sm:$0x1] }
 0x1bb   : > { %v2272_v28 = vrot.slane %v2270_v18, 4  ;;  %v2271_v17 = vsel %vm7273_vm14, %v4871_v34, %v2270_v18  ;;  %v2263_v18 = vrot.slane %v7257_v62, 5 }
 0x1bc   : > { %v2904_v27 = vor.u32 %v2903_v2, %v2900_v63  ;;  %v2279_v63 = vrot.slane %v2277_v13, 4  ;;  %v2286_v2 = vrot.slane %v2284_v57, 4  ;;  %v2278_v34 = vsel %vm7273_vm14, %v4872_v53, %v2277_v13  ;;  %v7481_v53 = vld [vmem:[%s8022_s3 + $0x70] sm:$0xff]  }
 0x1bd   : > { %v2274_v3 = vsel %vm7273_vm14, %v2272_v28, %v2273_v49  ;;  %v4873_v49 = vrot.slane %v6256_v47, 9  ;;  %v2265_v62 = vrot.slane %v2263_v18, 4  ;;  %v6260_v47 = vld [vmem:[#allocation2 + $0x4c] sm:$0xf] }
 0x1be   : > { %v2905_v56 = vrot.slane %v2904_v27, 4  ;;  %v7439_v52 = vcombine.low %v2271_v17, %v2274_v3  ;;  %v6254_v27 = vld [vmem:[#allocation2 + $0x2c] sm:$0x1]  ;;  %v4870_v3 = vrot.slane %v7255_v22, 9 }
 0x1bf   : > { %5584 = vmatmul.mubr.msk.bf16.gmra.mrb[40].mxu0 %vm1731_vm5, %v6833_v51  ;;  %v2287_v30 = vrot.slane %v6254_v27, 5  ;;  %v2285_v11 = vsel %vm7273_vm14, %v4873_v49, %v2284_v57  ;;  %v6258_v27 = vld [vmem:[#allocation2 + $0x38] sm:$0x1]  ;;  %v2305_v49 = vrot.slane %v6260_v47, 5 }
 0x1c0   : > { %5587 = vmatprep.mubr.msk.bf16.mxu0 %vm1731_vm5, %v8100_v35  ;;  %5700 = vmatmul.mubr.msk.bf16.gmra.mrb[8].mxu1 %vm1731_vm5, %v8101_v41  ;;  %v2910_v61 = vsel %vm6619_vm4, %v2905_v56, %v2909_v8  ;;  %v2280_v8 = vrot.slane %v6253_v58, 5  ;;  %v6255_v56 = vld [vmem:[#allocation2 + $0x34] sm:$0xf]  ;;  %v8109_v58 = vld [vmem:[#allocation26_spill] sm:$0xff]  ;;  %v2264_v22 = vsel %vm7273_vm14, %v4870_v3, %v2263_v18  ;;  %v8111_v18 = vld [vmem:[#allocation11_spill] sm:$0xff] }
 0x1c1   : > { %5703 = vmatprep.mubr.msk.bf16.mxu1 %vm1731_vm5, %v8102_v23  ;;  %v7433_v6 = vcombine.low %v2910_v61, %v2920_v4  ;;  %v2291_v15 = vrot.slane %v6255_v56, 5  ;;  %v2288_v4 = vsel %vm7273_vm14, %v2286_v2, %v2287_v30  ;;  %v2266_v61 = vrot.slane %v6257_v45, 5  ;;  %v8112_v45 = vld [vmem:[#allocation29_spill] sm:$0xff] }
 0x1c2   : > { %v2281_v28 = vsel %vm7273_vm14, %v2279_v63, %v2280_v8  ;;  %v6235_v63 = vld [vmem:[%s8022_s3 + $0x68] sm:$0xff]   ;;  %v7465_v2 = vcombine.low %v2285_v11, %v2288_v4  ;;  %v2294_v30 = vrot.slane %v6258_v27, 5 }
 0x1c3   : > { %v7456_v17 = vcombine.low %v2278_v34, %v2281_v28  ;;  %v2293_v13 = vrot.slane %v2291_v15, 4  ;;  %v8110_v8 = vld [vmem:[#allocation27_spill] sm:$0xff]  ;;  %v2267_v57 = vsel %vm7273_vm14, %v2265_v62, %v2266_v61  ;;  %v2312_v34 = vrot.slane %v8111_v18, 5  ;;  %v8116_v18 = vld [vmem:[#allocation17_spill] sm:$0xff] }
 0x1c4   : > { %v6259_v28 = vld [vmem:[#allocation2 + $0x30] sm:$0xf]  ;;  %v4890_v4 = vcombine.low %v2264_v22, %v2267_v57  ;;  %v2307_v61 = vrot.slane %v2305_v49, 4  ;;  %v6261_v57 = vld [vmem:[#allocation2 + $0x48] sm:$0xf] }
 0x1c5   : > { %v4874_v56 = vrot.slane %v6259_v28, 9  ;;  %v2314_v11 = vrot.slane %v2312_v34, 4  ;;  %v4876_v27 = vrot.slane %v6261_v57, 9  ;;  %v8115_v28 = vld [vmem:[#allocation13_spill] sm:$0xff]  ;;  %v8119_v57 = vld [vmem:[#allocation15_spill] sm:$0xff] }
 0x1c7   : > { %5588 = vmatmul.mubr.msk.bf16.gmra.mrb[44].mxu0 %vm1731_vm5, %v8103_v25  ;;  %v2292_v3 = vsel %vm7273_vm14, %v4874_v56, %v2291_v15  ;;  %v2319_v56 = vrot.slane %v8115_v28, 5  ;;  %v2306_v10 = vsel %vm7273_vm14, %v4876_v27, %v2305_v49  ;;  %v4878_v27 = vrot.slane %v8119_v57, 9  ;;  %v8120_v28 = vld [vmem:[#allocation18_spill] sm:$0xff] }
 0x1c8   : > { %5591 = vmatprep.mubr.msk.bf16.mxu0 %vm1731_vm5, %v8104_v48  ;;  %5704 = vmatmul.mubr.msk.bf16.gmra.mrb[12].mxu1 %vm1731_vm5, %v7210_v19 }
 0x1c9   : > { %5707 = vmatprep.mubr.msk.bf16.mxu1 %vm1731_vm5, %v7225_v60 }
 0x1cf   : > { %5592 = vmatmul.mubr.msk.bf16.gmra.mrb[48].mxu0 %vm1731_vm5, %v8105_v50 }
 0x1d0   : > { %5595 = vmatprep.mubr.msk.bf16.mxu0 %vm1731_vm5, %v8106_v1  ;;  %5708 = vmatmul.mubr.msk.bf16.gmra.mrb[16].mxu1 %vm1731_vm5, %v7242_v54 }
 0x1d1   : > { %5711 = vmatprep.mubr.msk.bf16.mxu1 %vm1731_vm5, %v7261_v46 }
 0x1d7   : > { %5596 = vmatmul.mubr.msk.bf16.gmra.mrb[52].mxu0 %vm1731_vm5, %v8107_v44 }
 0x1d8   : > { %5599 = vmatprep.mubr.msk.bf16.mxu0 %vm1731_vm5, %v8108_v38  ;;  %5712 = vmatmul.mubr.msk.bf16.gmra.mrb[20].mxu1 %vm1731_vm5, %v7433_v6 }
 0x1d9   : > { %5719 = vmatprep.mubr.msk.bf16.mxu1 %vm1731_vm5, %v7439_v52 }
 0x1df   : > { %5600 = vmatmul.mubr.msk.bf16.gmra.mrb[56].mxu0 %vm1731_vm5, %v8109_v58 }
 0x1e0   : > { %5603 = vmatprep.mubr.msk.bf16.mxu0 %vm1731_vm5, %v8110_v8  ;;  %5720 = vmatmul.mubr.msk.bf16.vlgmr.msra.gmra.mrb[24].mxu1 %vm1731_vm5, %v7456_v17 }
 0x1e1   : > { %5752 = vmatpush3.bf16.msra.mxu1 %v7247_v21  ;;  %5723 = vmatprep.mubr.msk.bf16.mxu1 %vm1731_vm5, %v7465_v2  ;;  %v2295_v21 = vsel %vm7273_vm14, %v2293_v13, %v2294_v30  ;;  %v8113_v13 = vld [vmem:[#allocation14_spill] sm:$0xff] }
 0x1e2   : > { %5753 = vmatprep.subr.bf16.mxu1 %v6235_v63  ;;  %v7488_v62 = vcombine.low %v2292_v3, %v2295_v21  ;;  %v2308_v15 = vrot.slane %v8113_v13, 5  ;;  %v6262_v21 = vld [vmem:[#allocation2 + $0x54] sm:$0xf]  ;;  %v2326_v3 = vrot.slane %v8116_v18, 5 }
 0x1e3   : > { %v4877_v47 = vrot.slane %v6262_v21, 9  ;;  %v4879_v21 = vrot.slane %v8120_v28, 9 }
 0x1e4   : > { %v2309_v30 = vsel %vm7273_vm14, %v2307_v61, %v2308_v15  ;;  %v2321_v15 = vrot.slane %v2319_v56, 4 }
 0x1e5   : > { %5754 = vmatpush3.bf16.msra.mxu1 %v6235_v63  ;;  %v8114_v63 = vld [vmem:[#allocation20_spill] sm:$0xff]  ;;  %v7508_v13 = vcombine.low %v2306_v10, %v2309_v30  ;;  %v8117_v10 = vld [vmem:[#allocation21_spill] sm:$0xff]  ;;  %v2327_v18 = vsel %vm7273_vm14, %v4879_v21, %v2326_v3  ;;  %v6242_v21 = vld [vmem:[%s8024_s5 + $0x8] sm:$0xff]  }
 0x1e6   : > { %5787 = vmatprep.subr.bf16.mxu1 %v7481_v53  ;;  %v2315_v22 = vrot.slane %v8114_v63, 5  ;;  %v2313_v63 = vsel %vm7273_vm14, %v4877_v47, %v2312_v34  ;;  %v2322_v49 = vrot.slane %v8117_v10, 5  ;;  %v8118_v34 = vld [vmem:[#allocation24_spill] sm:$0xff] }
 0x1e7   : > { %5604 = vmatmul.mubr.msk.bf16.gmra.mrb[60].mxu0 %vm1731_vm5, %v8112_v45 }
 0x1e8   : > { %5611 = vmatprep.mubr.msk.bf16.mxu0 %vm1731_vm5, %v4890_v4  ;;  %5724 = vmatmul.mubr.msk.bf16.gmra.mrb[28].mxu1 %vm1731_vm5, %v7488_v62  ;;  %v2316_v4 = vsel %vm7273_vm14, %v2314_v11, %v2315_v22  ;;  %v2328_v11 = vrot.slane %v2326_v3, 4  ;;  %v2329_v22 = vrot.slane %v8118_v34, 5  ;;  %v2323_v30 = vsel %vm7273_vm14, %v2321_v15, %v2322_v49  ;;  %v6239_v3 = vld [vmem:[%s8022_s3 + $0x80] sm:$0xff]  }
 0x1e9   : > { %5727 = vmatprep.mubr.msk.bf16.mxu1 %vm1731_vm5, %v7310_v7  ;;  %v7514_v61 = vcombine.low %v2313_v63, %v2316_v4 }
 0x1ea   : > { %v2330_v47 = vsel %vm7273_vm14, %v2328_v11, %v2329_v22 }
 0x1eb   : > { %v7542_v63 = vcombine.low %v2327_v18, %v2330_v47 }
 0x1ef   : > { %5612 = vmatmul.mubr.msk.bf16.vlgmr.msra.gmra.mrb[32].mxu0 %vm1731_vm5, %v7439_v52  ;;  %v6263_v52 = vld [vmem:[%s8022_s3 + $0x38] sm:$0xff]  }
 0x1f0   : > { %5615 = vmatprep.mubr.msk.bf16.mxu0 %vm1731_vm5, %v7456_v17  ;;  %5728 = vmatmul.mubr.msk.bf16.gmra.mrb[0].mxu1 %vm1731_vm5, %v7508_v13 }
 0x1f1   : > { %5731 = vmatprep.mubr.msk.bf16.mxu1 %vm1731_vm5, %v7514_v61  ;;  %5644 = vmatpush3.bf16.msra.mxu0 %v7325_v20  ;;  %v2320_v20 = vsel %vm7273_vm14, %v4878_v27, %v2319_v56  ;;  %v6237_v56 = vld [vmem:[%s8022_s3 + $0x78] sm:$0xff]  }
 0x1f2   : > { %5645 = vmatprep.subr.bf16.mxu0 %v6263_v52  ;;  %v7536_v4 = vcombine.low %v2320_v20, %v2323_v30 }
 0x1f5   : > { %5646 = vmatpush3.bf16.msra.mxu0 %v6263_v52 }
 0x1f7   : > { %5616 = vmatmul.mubr.msk.bf16.gmra.mrb[36].mxu0 %vm1731_vm5, %v7465_v2 }
 0x1f8   : > { %5619 = vmatprep.mubr.msk.bf16.mxu0 %vm1731_vm5, %v7488_v62  ;;  %5732 = vmatmul.mubr.msk.bf16.gmra.mrb[4].mxu1 %vm1731_vm5, %v7536_v4 }
 0x1f9   : > { %5735 = vmatprep.mubr.msk.bf16.mxu1 %vm1731_vm5, %v7542_v63 }
 0x1ff   : > { %5620 = vmatmul.mubr.msk.bf16.gmra.mrb[40].mxu0 %vm1731_vm5, %v7310_v7 }
 0x200   : > { %5623 = vmatprep.mubr.msk.bf16.mxu0 %vm1731_vm5, %v7508_v13  ;;  %5736 = vmatmul.mubr.msk.bf16.gmra.mrb[8].mxu1 %vm1731_vm5, %v7348_v5 }
 0x201   : > { %5739 = vmatprep.mubr.msk.bf16.mxu1 %vm1731_vm5, %v7362_v39 }
 0x207   : > { %5624 = vmatmul.mubr.msk.bf16.gmra.mrb[44].mxu0 %vm1731_vm5, %v7514_v61 }
 0x208   : > { %5627 = vmatprep.mubr.msk.bf16.mxu0 %vm1731_vm5, %v7536_v4  ;;  %5740 = vmatmul.mubr.msk.bf16.gmra.mrb[12].mxu1 %vm1731_vm5, %v7367_v55 }
 0x209   : > { %5743 = vmatprep.mubr.msk.bf16.mxu1 %vm1731_vm5, %v7375_v9 }
 0x20f   : > { %5628 = vmatmul.mubr.msk.bf16.gmra.mrb[48].mxu0 %vm1731_vm5, %v7542_v63 }
 0x210   : > { %5631 = vmatprep.mubr.msk.bf16.mxu0 %vm1731_vm5, %v7348_v5  ;;  %5744 = vmatmul.mubr.msk.bf16.gmra.mrb[16].mxu1 %vm1731_vm5, %v7389_v40 }
 0x211   : > { %5747 = vmatprep.mubr.msk.bf16.mxu1 %vm1731_vm5, %v7400_v36 }
 0x217   : > { %5632 = vmatmul.mubr.msk.bf16.gmra.mrb[52].mxu0 %vm1731_vm5, %v7362_v39 }
 0x218   : > { %5635 = vmatprep.mubr.msk.bf16.mxu0 %vm1731_vm5, %v7367_v55  ;;  %5748 = vmatmul.mubr.msk.bf16.gmra.mrb[20].mxu1 %vm1731_vm5, %v7406_v59 }
 0x219   : > { %5755 = vmatprep.mubr.msk.bf16.mxu1 %vm1731_vm5, %v7293_v16 }
 0x21f   : > { %5636 = vmatmul.mubr.msk.bf16.gmra.mrb[56].mxu0 %vm1731_vm5, %v7375_v9 }
 0x220   : > { %5639 = vmatprep.mubr.msk.bf16.mxu0 %vm1731_vm5, %v7389_v40  ;;  %5756 = vmatmul.mubr.msk.bf16.vlgmr.msra.gmra.mrb[24].mxu1 %vm1731_vm5, %v7314_v26 }
 0x221   : > { %5788 = vmatpush3.bf16.msra.mxu1 %v7481_v53  ;;  %5759 = vmatprep.mubr.msk.bf16.mxu1 %vm1731_vm5, %v7320_v42 }
 0x222   : > { %5789 = vmatprep.subr.bf16.mxu1 %v6237_v56 }
 0x225   : > { %5790 = vmatpush3.bf16.msra.mxu1 %v6237_v56 }
 0x226   : > { %5823 = vmatprep.subr.bf16.mxu1 %v6239_v3 }
 0x227   : > { %5640 = vmatmul.mubr.msk.bf16.gmra.mrb[60].mxu0 %vm1731_vm5, %v7400_v36 }
 0x228   : > { %5647 = vmatprep.mubr.msk.bf16.mxu0 %vm1731_vm5, %v7285_v32  ;;  %5760 = vmatmul.mubr.msk.bf16.gmra.mrb[28].mxu1 %vm1731_vm5, %v6833_v51  ;;  %v8121_v51 = vld [vmem:[#allocation31_spill] sm:$0xff] }
 0x229   : > { %5763 = vmatprep.mubr.msk.bf16.mxu1 %vm1731_vm5, %v8100_v35  ;;  %v7631_v32 = vld [vmem:[#allocation2 + $0xcc] sm:$0xf]  ;;  %v1274_v35 = vld [vmem:[#allocation2 + $0xd4] sm:$0x1] }
 0x22f   : > { %5648 = vmatmul.mubr.msk.bf16.vlgmr.msra.gmra.mrb[32].mxu0 %vm1731_vm5, %v7293_v16  ;;  %v7633_v16 = vld [vmem:[#allocation2 + $0xd0] sm:$0xf] }
 0x230   : > { %5651 = vmatprep.mubr.msk.bf16.mxu0 %vm1731_vm5, %v7314_v26  ;;  %5764 = vmatmul.mubr.msk.bf16.gmra.mrb[0].mxu1 %vm1731_vm5, %v8103_v25  ;;  %v4998_v26 = vcombine.low %v7631_v32, %v7633_v16  ;;  %v3599_v25 = vshll.u32 %v1274_v35, 16 }
 0x231   : > { %5767 = vmatprep.mubr.msk.bf16.mxu1 %vm1731_vm5, %v8104_v48 }
 0x237   : > { %5652 = vmatmul.mubr.msk.bf16.gmra.mrb[36].mxu0 %vm1731_vm5, %v7320_v42  ;;  %v6240_v42 = vld [vmem:[%s8022_s3 + $0x88] sm:$0xff]  }
 0x238   : > { %5768 = vmatmul.mubr.msk.bf16.gmra.mrb[4].mxu1 %vm1731_vm5, %v8105_v50 }
 0x239   : > { %5771 = vmatprep.mubr.msk.bf16.mxu1 %vm1731_vm5, %v8106_v1  ;;  %v3601_v1 = vrot.slane %v3599_v25, 5 }
 0x240   : > { %5772 = vmatmul.mubr.msk.bf16.gmra.mrb[8].mxu1 %vm1731_vm5, %v8107_v44 }
 0x241   : > { %5775 = vmatprep.mubr.msk.bf16.mxu1 %vm1731_vm5, %v8108_v38 }
 0x248   : > { %5776 = vmatmul.mubr.msk.bf16.gmra.mrb[12].mxu1 %vm1731_vm5, %v8109_v58 }
 0x249   : > { %5779 = vmatprep.mubr.msk.bf16.mxu1 %vm1731_vm5, %v8110_v8 }
 0x250   : > { %5780 = vmatmul.mubr.msk.bf16.gmra.mrb[16].mxu1 %vm1731_vm5, %v8112_v45 }
 0x251   : > { %5783 = vmatprep.mubr.msk.bf16.mxu1 %vm1731_vm5, %v8121_v51 }
 0x258   : > { %5784 = vmatmul.mubr.msk.bf16.gmra.mrb[20].mxu1 %vm1731_vm5, %v4998_v26 }
 0x259   : > { %5791 = vmatprep.mubr.msk.bf16.mxu1 %vm1731_vm5, %v6822_v33  ;;  %v3580_v33 = vshrl.u32 %v7631_v32, 16 }
 0x260   : > { %5792 = vmatmul.mubr.msk.bf16.vlgmr.msra.gmra.mrb[24].mxu1 %vm1731_vm5, %v6905_v29  ;;  %v3583_v29 = vshll.u32 %v7631_v32, 16 }
 0x261   : > { %5824 = vmatpush3.bf16.msra.mxu1 %v6239_v3  ;;  %5795 = vmatprep.mubr.msk.bf16.mxu1 %vm1731_vm5, %v6922_v0  ;;  %v3593_v0 = vshrl.u32 %v7633_v16, 16 }
 0x262   : > { %5825 = vmatprep.subr.bf16.mxu1 %v6240_v42 }
 0x265   : > { %5826 = vmatpush3.bf16.msra.mxu1 %v6240_v42 }
 0x268   : > { %5796 = vmatmul.mubr.msk.bf16.gmra.mrb[28].mxu1 %vm1731_vm5, %v6982_v12  ;;  %v3589_v12 = vshll.u32 %v7633_v16, 16 }
 0x269   : > { %5799 = vmatprep.mubr.msk.bf16.mxu1 %vm1731_vm5, %v7013_v43  ;;  %v3582_v43 = vrot.slane %v3580_v33, 4 }
 0x270   : > { %5800 = vmatmul.mubr.msk.bf16.gmra.mrb[0].mxu1 %vm1731_vm5, %v7089_v37  ;;  %v3585_v37 = vrot.slane %v3583_v29, 5 }
 0x271   : > { %5803 = vmatprep.mubr.msk.bf16.mxu1 %vm1731_vm5, %v7111_v31  ;;  %v3595_v31 = vrot.slane %v3593_v0, 4 }
 0x278   : > { %5804 = vmatmul.mubr.msk.bf16.gmra.mrb[4].mxu1 %vm1731_vm5, %v7134_v24  ;;  %v3591_v24 = vrot.slane %v3589_v12, 5 }
 0x279   : > { %5807 = vmatprep.mubr.msk.bf16.mxu1 %vm1731_vm5, %v8101_v41  ;;  %v3586_v41 = vor.u32 %v3585_v37, %v3582_v43 }
 0x27b   : > { %v3587_v48 = vrot.slane %v3586_v41, 4 }
 0x280   : > { %5808 = vmatmul.mubr.msk.bf16.gmra.mrb[8].mxu1 %vm1731_vm5, %v8102_v23  ;;  %v3596_v23 = vor.u32 %v3595_v31, %v3591_v24 }
 0x281   : > { %5811 = vmatprep.mubr.msk.bf16.mxu1 %vm1731_vm5, %v7210_v19  ;;  %v6241_v19 = vld [vmem:[%s8024_s5] sm:$0xff]  }
 0x282   : > { %v3597_v50 = vrot.slane %v3596_v23, 4  ;;  %5859 = vmatprep.subr.bf16.mxu0 %v6241_v19 }
 0x283   : > { %5860 = vmatpush3.bf16.msra.mxu0 %v6241_v19 }
 0x284   : > { %v3602_v44 = vsel %vm6619_vm4, %v3597_v50, %v3601_v1  ;;  %5861 = vmatprep.subr.bf16.mxu0 %v6242_v21 }
 0x287   : > { %5862 = vmatpush3.bf16.msra.mxu0 %v6242_v21 }
 0x288   : > { %5812 = vmatmul.mubr.msk.bf16.gmra.mrb[12].mxu1 %vm1731_vm5, %v7225_v60 }
 0x289   : > { %5815 = vmatprep.mubr.msk.bf16.mxu1 %vm1731_vm5, %v7242_v54  ;;  %v3592_v54 = vsel %vm6619_vm4, %v3587_v48, %v3591_v24 }
 0x28a   : > { %v5021_v38 = vcombine.low %v3592_v54, %v3602_v44 }
 0x290   : > { %5816 = vmatmul.mubr.msk.bf16.gmra.mrb[16].mxu1 %vm1731_vm5, %v7261_v46  ;;  %v3822_v46 = vrot.slane %v7633_v16, 5  ;;  %v7774_v16 = vld [vmem:[%s8023_s4] ss:$0 sm:$0xff] }
 0x291   : > { %5819 = vmatprep.mubr.msk.bf16.mxu1 %vm1731_vm5, %v7433_v6 }
 0x292   : > { %v3824_v6 = vrot.slane %v3822_v46, 4 }
 0x298   : > { %5820 = vmatmul.mubr.msk.bf16.gmra.mrb[20].mxu1 %vm1731_vm5, %v5021_v38 }
 0x299   : > { %5827 = vmatprep.mubr.msk.bf16.mxu1 %vm1731_vm5, %v7456_v17  ;;  %v3825_v17 = vrot.slane %v1274_v35, 5 }
 0x2a0   : > { %5828 = vmatmul.mubr.msk.bf16.vlgmr.msra.gmra.mrb[24].mxu1 %vm1731_vm5, %v7465_v2 }
 0x2a1   : > { %5831 = vmatprep.mubr.msk.bf16.mxu1 %vm1731_vm5, %v7488_v62 }
 0x2a8   : > { %5832 = vmatmul.mubr.msk.bf16.gmra.mrb[28].mxu1 %vm1731_vm5, %v7310_v7  ;;  %v5040_v7 = vrot.slane %v7631_v32, 9 }
 0x2a9   : > { %5835 = vmatprep.mubr.msk.bf16.mxu1 %vm1731_vm5, %v7508_v13 }
 0x2b0   : > { %5836 = vmatmul.mubr.msk.bf16.gmra.mrb[0].mxu1 %vm1731_vm5, %v7514_v61 }
 0x2b1   : > { %5839 = vmatprep.mubr.msk.bf16.mxu1 %vm1731_vm5, %v7536_v4 }
 0x2b8   : > { %5840 = vmatmul.mubr.msk.bf16.gmra.mrb[4].mxu1 %vm1731_vm5, %v7542_v63 }
 0x2b9   : > { %5843 = vmatprep.mubr.msk.bf16.mxu1 %vm1731_vm5, %v7348_v5  ;;  %v3823_v5 = vsel %vm7273_vm14, %v5040_v7, %v3822_v46 }
 0x2c0   : > { %5844 = vmatmul.mubr.msk.bf16.gmra.mrb[8].mxu1 %vm1731_vm5, %v7362_v39  ;;  %v3826_v39 = vsel %vm7273_vm14, %v3824_v6, %v3825_v17 }
 0x2c1   : > { %5847 = vmatprep.mubr.msk.bf16.mxu1 %vm1731_vm5, %v7367_v55  ;;  %v5045_v58 = vcombine.low %v3823_v5, %v3826_v39 }
 0x2c8   : > { %5848 = vmatmul.mubr.msk.bf16.gmra.mrb[12].mxu1 %vm1731_vm5, %v7375_v9 }
 0x2c9   : > { %5851 = vmatprep.mubr.msk.bf16.mxu1 %vm1731_vm5, %v7389_v40 }
 0x2d0   : > { %5852 = vmatmul.mubr.msk.bf16.gmra.mrb[16].mxu1 %vm1731_vm5, %v7400_v36 }
 0x2d1   : > { %5855 = vmatprep.mubr.msk.bf16.mxu1 %vm1731_vm5, %v7406_v59 }
 0x2d2   : > { %v7719_v55 = vpop.f32.mrb[40].mxu0 }
 0x2d3   : > { %v7721_v9 = vpop.f32.mrb[41].mxu0 }
 0x2d4   : > { %v7723_v40 = vpop.f32.mrb[42].mxu0 }
 0x2d5   : > { %v7725_v2 = vpop.f32.mrb[43].mxu0 }
 0x2d8   : > { %5856 = vmatmul.mubr.msk.bf16.gmra.mrb[20].mxu1 %vm1731_vm5, %v5045_v58 }
 0x2da   : > { %v7728_v36 = vpop.f32.mrb[44].mxu0 }
 0x2db   : > { %v7730_v59 = vpop.f32.mrb[45].mxu0 }
 0x2dc   : > { %v7732_v8 = vpop.f32.mrb[46].mxu0 }
 0x2dd   : > { %v7734_v53 = vpop.f32.mrb[47].mxu0 }
 0x2e2   : > { %v7736_v14 = vpop.f32.mrb[48].mxu0 }
 0x2e3   : > { %v7738_v62 = vpop.f32.mrb[49].mxu0 }
 0x2e4   : > { %v7740_v45 = vpop.f32.mrb[50].mxu0 }
 0x2e5   : > { %v7742_v13 = vpop.f32.mrb[51].mxu0 }
 0x2ea   : > { %v7744_v61 = vpop.f32.mrb[52].mxu0 }
 0x2eb   : > { %v7746_v15 = vpop.f32.mrb[53].mxu0 }
 0x2ec   : > { %v7748_v11 = vpop.f32.mrb[54].mxu0 }
 0x2ed   : > { %v7750_v10 = vpop.f32.mrb[55].mxu0 }
 0x2f2   : > { %v7752_v49 = vpop.f32.mrb[56].mxu0 }
 0x2f3   : > { %v7754_v34 = vpop.f32.mrb[57].mxu0 }
 0x2f4   : > { %v7756_v22 = vpop.f32.mrb[58].mxu0 }
 0x2f5   : > { %v7758_v52 = vpop.f32.mrb[59].mxu0 }
 0x2fa   : > { %v7760_v57 = vpop.f32.mrb[60].mxu0 }
 0x2fb   : > { %v7762_v27 = vpop.f32.mrb[61].mxu0 }
 0x2fc   : > { %v7764_v30 = vpop.f32.mrb[62].mxu0 }
 0x2fd   : > { %v7766_v28 = vpop.f32.mrb[63].mxu0 }
 0x302   : > { %v5649_v47 = vpop.f32.mrb[32].mxu0 }
 0x303   : > { %v2738_v20 = vpop.f32.mrb[33].mxu0 }
 0x304   : > { %v5650_v4 = vpop.f32.mrb[34].mxu0 }
 0x305   : > { %v2741_v18 = vpop.f32.mrb[35].mxu0 }
 0x30a   : > { %v5653_v63 = vpop.f32.mrb[36].mxu0 }
 0x30b   : > { %v2754_v56 = vpop.f32.mrb[37].mxu0 }
 0x30c   : > { %v5654_v3 = vpop.f32.mrb[38].mxu0 }
 0x30d   : > { %v2757_v51 = vpop.f32.mrb[39].mxu0 }
 0x373   : > { %v5829_v32 = vpop.f32.mrb[24].mxu1 }
 0x374   : > { %v5899_v26 = vadd.f32 %v5829_v32, %v5649_v47  ;;  %v3884_v42 = vpop.f32.mrb[25].mxu1 }
 0x375   : > { %v5900_v33 = vadd.f32 %v3884_v42, %v2738_v20  ;;  %v5830_v29 = vpop.f32.mrb[26].mxu1 }
 0x376   : > { %v4052_v0 = vadd.f32 %v5899_v26, %v7774_v16  ;;  %v5901_v12 = vadd.f32 %v5830_v29, %v5650_v4  ;;  %v3887_v43 = vpop.f32.mrb[27].mxu1 }
 0x377   : > { %v4050_v37 = vadd.f32 %v5900_v33, %v7774_v16  ;;  %v5902_v24 = vadd.f32 %v3887_v43, %v2741_v18 }
 0x378   : > { %v4053_v31 = vadd.f32 %v5901_v12, %v7774_v16  ;;  %v4084_v41 = vmax.f32 %v4052_v0, 0.0 }
 0x379   : > { %v4051_v35 = vadd.f32 %v5902_v24, %v7774_v16  ;;  %v4082_v25 = vmax.f32 %v4050_v37, 0.0 }
 0x37a   : > { %v4085_v23 = vmax.f32 %v4053_v31, 0.0 }
 0x37b   : > { %v4083_v48 = vmax.f32 %v4051_v35, 0.0  ;;  %v5833_v50 = vpop.f32.mrb[28].mxu1 }
 0x37c   : > { %v4115_v1 = vpack.c.bf16 %v4085_v23, %v4084_v41  ;;  %v5903_v19 = vadd.f32 %v5833_v50, %v5653_v63  ;;  %v3900_v60 = vpop.f32.mrb[29].mxu1 }
 0x37d   : > { %v4114_v54 = vpack.c.bf16 %v4083_v48, %v4082_v25  ;;  %v5904_v44 = vadd.f32 %v3900_v60, %v2754_v56  ;;  %v5834_v38 = vpop.f32.mrb[30].mxu1 }
 0x37e   : > { %v4056_v46 = vadd.f32 %v5903_v19, %v7774_v16  ;;  %v5905_v7 = vadd.f32 %v5834_v38, %v5654_v3  ;;  %v3903_v6 = vpop.f32.mrb[31].mxu1 }
 0x37f   : > { %v4054_v17 = vadd.f32 %v5904_v44, %v7774_v16  ;;  %v5906_v5 = vadd.f32 %v3903_v6, %v2757_v51  ;;  %5863 = vmatprep.mubr.msk.bf16.mxu0 %vm1731_vm5, %v4114_v54 }
 0x380   : > { %v4057_v39 = vadd.f32 %v5905_v7, %v7774_v16  ;;  %5864 = vmatmul.mubr.msk.bf16.vlgmr.msra.gmra.mrb[64].mxu0 %vm1731_vm5, %v4115_v1  ;;  %v4088_v21 = vmax.f32 %v4056_v46, 0.0 }
 0x381   : > { %v4055_v58 = vadd.f32 %v5906_v5, %v7774_v16  ;;  %v4086_v20 = vmax.f32 %v4054_v17, 0.0 }
 0x382   : > { %v4089_v47 = vmax.f32 %v4057_v39, 0.0 }
 0x383   : > { %v4087_v4 = vmax.f32 %v4055_v58, 0.0  ;;  %v5837_v18 = vpop.f32.mrb[0].mxu1 }
 0x384   : > { %v4117_v63 = vpack.c.bf16 %v4089_v47, %v4088_v21  ;;  %v5907_v56 = vadd.f32 %v5837_v18, %v7719_v55  ;;  %v3916_v3 = vpop.f32.mrb[1].mxu1 }
 0x385   : > { %v4116_v32 = vpack.c.bf16 %v4087_v4, %v4086_v20  ;;  %v5908_v51 = vadd.f32 %v3916_v3, %v7721_v9  ;;  %v5838_v26 = vpop.f32.mrb[2].mxu1 }
 0x386   : > { %v4060_v42 = vadd.f32 %v5907_v56, %v7774_v16  ;;  %v5909_v33 = vadd.f32 %v5838_v26, %v7723_v40  ;;  %v3919_v29 = vpop.f32.mrb[3].mxu1 }
 0x387   : > { %v4058_v0 = vadd.f32 %v5908_v51, %v7774_v16  ;;  %v5910_v12 = vadd.f32 %v3919_v29, %v7725_v2  ;;  %5867 = vmatprep.mubr.msk.bf16.mxu0 %vm1731_vm5, %v4116_v32 }
 0x388   : > { %v4061_v43 = vadd.f32 %v5909_v33, %v7774_v16  ;;  %5868 = vmatmul.mubr.msk.bf16.gmra.mrb[68].mxu0 %vm1731_vm5, %v4117_v63  ;;  %v4092_v37 = vmax.f32 %v4060_v42, 0.0 }
 0x389   : > { %v4059_v55 = vadd.f32 %v5910_v12, %v7774_v16  ;;  %v4090_v24 = vmax.f32 %v4058_v0, 0.0 }
 0x38a   : > { %v4093_v9 = vmax.f32 %v4061_v43, 0.0 }
 0x38b   : > { %v4091_v31 = vmax.f32 %v4059_v55, 0.0  ;;  %v5841_v35 = vpop.f32.mrb[4].mxu1 }
 0x38c   : > { %v4119_v41 = vpack.c.bf16 %v4093_v9, %v4092_v37  ;;  %v5911_v40 = vadd.f32 %v5841_v35, %v7728_v36  ;;  %v3932_v23 = vpop.f32.mrb[5].mxu1 }
 0x38d   : > { %v4118_v25 = vpack.c.bf16 %v4091_v31, %v4090_v24  ;;  %v5912_v2 = vadd.f32 %v3932_v23, %v7730_v59  ;;  %v5842_v48 = vpop.f32.mrb[6].mxu1 }
 0x38e   : > { %v4064_v50 = vadd.f32 %v5911_v40, %v7774_v16  ;;  %v5913_v1 = vadd.f32 %v5842_v48, %v7732_v8  ;;  %v3935_v19 = vpop.f32.mrb[7].mxu1 }
 0x38f   : > { %v4062_v60 = vadd.f32 %v5912_v2, %v7774_v16  ;;  %v5914_v54 = vadd.f32 %v3935_v19, %v7734_v53  ;;  %5871 = vmatprep.mubr.msk.bf16.mxu0 %vm1731_vm5, %v4118_v25 }
 0x390   : > { %v4065_v44 = vadd.f32 %v5913_v1, %v7774_v16  ;;  %5872 = vmatmul.mubr.msk.bf16.gmra.mrb[72].mxu0 %vm1731_vm5, %v4119_v41  ;;  %v4096_v38 = vmax.f32 %v4064_v50, 0.0 }
 0x391   : > { %v4063_v36 = vadd.f32 %v5914_v54, %v7774_v16  ;;  %v4094_v46 = vmax.f32 %v4062_v60, 0.0 }
 0x392   : > { %v4097_v59 = vmax.f32 %v4065_v44, 0.0 }
 0x393   : > { %v4095_v7 = vmax.f32 %v4063_v36, 0.0  ;;  %v5845_v6 = vpop.f32.mrb[8].mxu1 }
 0x394   : > { %v4121_v17 = vpack.c.bf16 %v4097_v59, %v4096_v38  ;;  %v5915_v8 = vadd.f32 %v5845_v6, %v7736_v14  ;;  %v3948_v5 = vpop.f32.mrb[9].mxu1 }
 0x395   : > { %v4120_v39 = vpack.c.bf16 %v4095_v7, %v4094_v46  ;;  %v5916_v53 = vadd.f32 %v3948_v5, %v7738_v62  ;;  %v5846_v58 = vpop.f32.mrb[10].mxu1 }
 0x396   : > { %v4068_v21 = vadd.f32 %v5915_v8, %v7774_v16  ;;  %v5917_v47 = vadd.f32 %v5846_v58, %v7740_v45  ;;  %v3951_v20 = vpop.f32.mrb[11].mxu1 }
 0x397   : > { %v4066_v4 = vadd.f32 %v5916_v53, %v7774_v16  ;;  %v5918_v18 = vadd.f32 %v3951_v20, %v7742_v13  ;;  %5875 = vmatprep.mubr.msk.bf16.mxu0 %vm1731_vm5, %v4120_v39 }
 0x398   : > { %v4069_v63 = vadd.f32 %v5917_v47, %v7774_v16  ;;  %5876 = vmatmul.mubr.msk.bf16.gmra.mrb[76].mxu0 %vm1731_vm5, %v4121_v17  ;;  %v4100_v56 = vmax.f32 %v4068_v21, 0.0 }
 0x399   : > { %v4067_v14 = vadd.f32 %v5918_v18, %v7774_v16  ;;  %v4098_v3 = vmax.f32 %v4066_v4, 0.0 }
 0x39a   : > { %v4101_v62 = vmax.f32 %v4069_v63, 0.0 }
 0x39b   : > { %v4099_v32 = vmax.f32 %v4067_v14, 0.0  ;;  %v5849_v51 = vpop.f32.mrb[12].mxu1 }
 0x39c   : > { %v4123_v26 = vpack.c.bf16 %v4101_v62, %v4100_v56  ;;  %v5919_v45 = vadd.f32 %v5849_v51, %v7744_v61  ;;  %v3964_v42 = vpop.f32.mrb[13].mxu1 }
 0x39d   : > { %v4122_v33 = vpack.c.bf16 %v4099_v32, %v4098_v3  ;;  %v5920_v13 = vadd.f32 %v3964_v42, %v7746_v15  ;;  %v5850_v29 = vpop.f32.mrb[14].mxu1  ;;  %v6264_v3 = vld [vmem:[%s6510_s13 + $0x10] sm:$0xff] }
 0x39e   : > { %v4072_v0 = vadd.f32 %v5919_v45, %v7774_v16  ;;  %v5921_v12 = vadd.f32 %v5850_v29, %v7748_v11  ;;  %v3967_v43 = vpop.f32.mrb[15].mxu1  ;;  %v6265_v45 = vld [vmem:[%s6510_s13] sm:$0xff] }
 0x39f   : > { %v4070_v55 = vadd.f32 %v5920_v13, %v7774_v16  ;;  %v5922_v37 = vadd.f32 %v3967_v43, %v7750_v10  ;;  %5879 = vmatprep.mubr.msk.bf16.mxu0 %vm1731_vm5, %v4122_v33  ;;  %v6266_v13 = vld [vmem:[%s6510_s13 + $0x18] sm:$0xff] }
 0x3a0   : > { %v4073_v9 = vadd.f32 %v5921_v12, %v7774_v16  ;;  %5880 = vmatmul.mubr.msk.bf16.gmra.mrb[80].mxu0 %vm1731_vm5, %v4123_v26  ;;  %v4104_v24 = vmax.f32 %v4072_v0, 0.0  ;;  %v6267_v0 = vld [vmem:[%s6510_s13 + $0x8] sm:$0xff] }
 0x3a1   : > { %v4071_v61 = vadd.f32 %v5922_v37, %v7774_v16  ;;  %v4102_v31 = vmax.f32 %v4070_v55, 0.0 }
 0x3a2   : > { %v4105_v15 = vmax.f32 %v4073_v9, 0.0 }
 0x3a3   : > { %v4103_v35 = vmax.f32 %v4071_v61, 0.0  ;;  %v5853_v41 = vpop.f32.mrb[16].mxu1 }
 0x3a4   : > { %v4125_v40 = vpack.c.bf16 %v4105_v15, %v4104_v24  ;;  %v5923_v11 = vadd.f32 %v5853_v41, %v7752_v49  ;;  %v3980_v23 = vpop.f32.mrb[17].mxu1 }
 0x3a5   : > { %v4124_v25 = vpack.c.bf16 %v4103_v35, %v4102_v31  ;;  %v5924_v10 = vadd.f32 %v3980_v23, %v7754_v34  ;;  %v5854_v2 = vpop.f32.mrb[18].mxu1  ;;  %v6268_v23 = vld [vmem:[%s6510_s13 + $0x30] sm:$0xff] }
 0x3a6   : > { %v4076_v48 = vadd.f32 %v5923_v11, %v7774_v16  ;;  %v5925_v50 = vadd.f32 %v5854_v2, %v7756_v22  ;;  %v3983_v1 = vpop.f32.mrb[19].mxu1 }
 0x3a7   : > { %v4074_v19 = vadd.f32 %v5924_v10, %v7774_v16  ;;  %v5926_v60 = vadd.f32 %v3983_v1, %v7758_v52  ;;  %5883 = vmatprep.mubr.msk.bf16.mxu0 %vm1731_vm5, %v4124_v25 }
 0x3a8   : > { %v4077_v54 = vadd.f32 %v5925_v50, %v7774_v16  ;;  %5884 = vmatmul.mubr.msk.bf16.gmra.mrb[84].mxu0 %vm1731_vm5, %v4125_v40  ;;  %v4108_v44 = vmax.f32 %v4076_v48, 0.0  ;;  %v6269_v50 = vld [vmem:[%s6510_s13 + $0x20] sm:$0xff] }
 0x3a9   : > { %v4075_v49 = vadd.f32 %v5926_v60, %v7774_v16  ;;  %v4106_v36 = vmax.f32 %v4074_v19, 0.0  ;;  %v6270_v60 = vld [vmem:[%s6510_s13 + $0x38] sm:$0xff] }
 0x3aa   : > { %v4109_v34 = vmax.f32 %v4077_v54, 0.0 }
 0x3ab   : > { %v4107_v38 = vmax.f32 %v4075_v49, 0.0  ;;  %v5857_v59 = vpop.f32.mrb[20].mxu1 }
 0x3ac   : > { %v4127_v46 = vpack.c.bf16 %v4109_v34, %v4108_v44  ;;  %v5927_v22 = vadd.f32 %v5857_v59, %v7760_v57  ;;  %v3996_v7 = vpop.f32.mrb[21].mxu1  ;;  %v6271_v34 = vld [vmem:[%s6510_s13 + $0x28] sm:$0xff] }
 0x3ad   : > { %v4126_v6 = vpack.c.bf16 %v4107_v38, %v4106_v36  ;;  %v5928_v52 = vadd.f32 %v3996_v7, %v7762_v27  ;;  %v5858_v17 = vpop.f32.mrb[22].mxu1 }
 0x3ae   : > { %v4080_v8 = vadd.f32 %v5927_v22, %v7774_v16  ;;  %v5929_v5 = vadd.f32 %v5858_v17, %v7764_v30  ;;  %v3999_v39 = vpop.f32.mrb[23].mxu1 }
 0x3af   : > { %v4078_v53 = vadd.f32 %v5928_v52, %v7774_v16  ;;  %v5930_v58 = vadd.f32 %v3999_v39, %v7766_v28  ;;  %5887 = vmatprep.mubr.msk.bf16.mxu0 %vm1731_vm5, %v4126_v6  ;;  %v7851_v28 = vld [vmem:[%s8025_s6] ss:$0 sm:$0xff] }
 0x3b0   : > { %v4081_v21 = vadd.f32 %v5929_v5, %v7774_v16  ;;  %5888 = vmatmul.mubr.msk.bf16.gmra.mrb[88].mxu0 %vm1731_vm5, %v4127_v46  ;;  %v4112_v27 = vmax.f32 %v4080_v8, 0.0 }
 0x3b1   : > { %v4079_v57 = vadd.f32 %v5930_v58, %v7774_v16  ;;  %v4110_v20 = vmax.f32 %v4078_v53, 0.0  ;;  %v6272_v58 = vld [vmem:[%s6510_s13 + $0x50] sm:$0xff] }
 0x3b2   : > { %v4113_v47 = vmax.f32 %v4081_v21, 0.0 }
 0x3b3   : > { %v4111_v4 = vmax.f32 %v4079_v57, 0.0 }
 0x3b4   : > { %v4129_v30 = vpack.c.bf16 %v4113_v47, %v4112_v27 }
 0x3b5   : > { %v4128_v18 = vpack.c.bf16 %v4111_v4, %v4110_v20  ;;  %v6273_v20 = vld [vmem:[%s6510_s13 + $0x40] sm:$0xff] }
 0x3b7   : > { %5891 = vmatprep.mubr.msk.bf16.mxu0 %vm1731_vm5, %v4128_v18  ;;  %v6274_v18 = vld [vmem:[%s6510_s13 + $0x58] sm:$0xff] }
 0x3b8   : > { %5892 = vmatmul.mubr.msk.bf16.gmra.mrb[92].mxu0 %vm1731_vm5, %v4129_v30 }
 0x453   : > { %v5865_v63 = vpop.f32.mrb[64].mxu0 }
 0x454   : > { %v4244_v16 = vadd.f32 %v5865_v63, %v7851_v28  ;;  %v4235_v14 = vpop.f32.mrb[65].mxu0 }
 0x455   : > { %v4236_v56 = vadd.f32 %v7851_v28, %v4235_v14  ;;  %v5866_v62 = vpop.f32.mrb[66].mxu0 }
 0x456   : > { %v4364_v32 = vadd.f32 %v6264_v3, %v4244_v16  ;;  %v4247_v51 = vadd.f32 %v5866_v62, %v7851_v28  ;;  %v4238_v26 = vpop.f32.mrb[67].mxu0 }
 0x457   : > { %v4362_v42 = vadd.f32 %v6265_v45, %v4236_v56  ;;  %v4239_v33 = vadd.f32 %v7851_v28, %v4238_v26  ;;  %v6275_v56 = vld [vmem:[%s6510_s13 + $0x48] sm:$0xff] }
 0x458   : > { %v4365_v29 = vadd.f32 %v6266_v13, %v4247_v51  ;;  %v4396_v43 = vmax.f32 %v4364_v32, 0.0 }
 0x459   : > { %v4363_v12 = vadd.f32 %v6267_v0, %v4239_v33  ;;  %v4394_v37 = vmax.f32 %v4362_v42, 0.0 }
 0x45a   : > { %v4397_v55 = vmax.f32 %v4365_v29, 0.0 }
 0x45b   : > { %v4395_v9 = vmax.f32 %v4363_v12, 0.0  ;;  %v5869_v61 = vpop.f32.mrb[68].mxu0 }
 0x45c   : > { %v5196_v24 = vpack.c.bf16 %v4397_v55, %v4396_v43  ;;  %v4260_v15 = vadd.f32 %v5869_v61, %v7851_v28  ;;  %v4251_v31 = vpop.f32.mrb[69].mxu0 }
 0x45d   : > { %v5191_v35 = vpack.c.bf16 %v4395_v9, %v4394_v37  ;;  %v4586_v41 = vadd.f32 %v4395_v9, %v4394_v37  ;;  %v4252_v40 = vadd.f32 %v7851_v28, %v4251_v31  ;;  %v5870_v11 = vpop.f32.mrb[70].mxu0 }
 0x45e   : > { %5268 = vst [vmem:[%s7867_s22 + $0x8] sm:$0xff] %v5196_v24   ;;  %v4368_v25 = vadd.f32 %v6268_v23, %v4260_v15  ;;  %v4263_v10 = vadd.f32 %v5870_v11, %v7851_v28  ;;  %v4254_v2 = vpop.f32.mrb[71].mxu0  ;;  %v6277_v15 = vld [vmem:[%s6510_s13 + $0x60] sm:$0xff] }
 0x45f   : > { %5192 = vst [vmem:[%s7867_s22] sm:$0xff] %v5191_v35   ;;  %v4587_v48 = vadd.f32 %v4586_v41, %v4396_v43  ;;  %v4366_v1 = vadd.f32 %v6269_v50, %v4252_v40  ;;  %v4255_v19 = vadd.f32 %v7851_v28, %v4254_v2  ;;  %v6278_v41 = vld [vmem:[%s6510_s13 + $0x78] sm:$0xff] }
 0x460   : > { %v4369_v54 = vadd.f32 %v6270_v60, %v4263_v10  ;;  %v4400_v38 = vmax.f32 %v4368_v25, 0.0  ;;  %v6279_v25 = vld [vmem:[%s6510_s13 + $0x68] sm:$0xff] }
 0x461   : > { %v4398_v49 = vmax.f32 %v4366_v1, 0.0  ;;  %v4588_v44 = vadd.f32 %v4587_v48, %v4397_v55  ;;  %v4367_v36 = vadd.f32 %v6271_v34, %v4255_v19  ;;  %v6276_v55 = vld [vmem:[%s6510_s13 + $0x70] sm:$0xff] }
 0x462   : > { %v4401_v59 = vmax.f32 %v4369_v54, 0.0 }
 0x463   : > { %v4589_v46 = vadd.f32 %v4588_v44, %v4398_v49  ;;  %v4399_v22 = vmax.f32 %v4367_v36, 0.0  ;;  %v5873_v7 = vpop.f32.mrb[72].mxu0 }
 0x464   : > { %v5206_v6 = vpack.c.bf16 %v4401_v59, %v4400_v38  ;;  %v4276_v52 = vadd.f32 %v5873_v7, %v7851_v28  ;;  %v4267_v17 = vpop.f32.mrb[73].mxu0 }
 0x465   : > { %v5201_v8 = vpack.c.bf16 %v4399_v22, %v4398_v49  ;;  %v4590_v5 = vadd.f32 %v4589_v46, %v4399_v22  ;;  %v4268_v39 = vadd.f32 %v7851_v28, %v4267_v17  ;;  %v5874_v53 = vpop.f32.mrb[74].mxu0 }
 0x466   : > { %5270 = vst [vmem:[%s7867_s22 + $0x18] sm:$0xff] %v5206_v6   ;;  %v4372_v21 = vadd.f32 %v6272_v58, %v4276_v52  ;;  %v4279_v57 = vadd.f32 %v5874_v53, %v7851_v28  ;;  %v4270_v27 = vpop.f32.mrb[75].mxu0  ;;  %v6281_v52 = vld [vmem:[%s6510_s13 + $0x80] sm:$0xff] }
 0x467   : > { %5269 = vst [vmem:[%s7867_s22 + $0x10] sm:$0xff] %v5201_v8   ;;  %v4591_v47 = vadd.f32 %v4590_v5, %v4400_v38  ;;  %v4370_v4 = vadd.f32 %v6273_v20, %v4268_v39  ;;  %v4271_v30 = vadd.f32 %v7851_v28, %v4270_v27  ;;  %v6282_v5 = vld [vmem:[%s6510_s13 + $0x98] sm:$0xff] }
 0x468   : > { %v4373_v63 = vadd.f32 %v6274_v18, %v4279_v57  ;;  %v4404_v3 = vmax.f32 %v4372_v21, 0.0  ;;  %v6283_v21 = vld [vmem:[%s6510_s13 + $0x88] sm:$0xff] }
 0x469   : > { %v4402_v16 = vmax.f32 %v4370_v4, 0.0  ;;  %v4592_v14 = vadd.f32 %v4591_v47, %v4401_v59  ;;  %v4371_v62 = vadd.f32 %v6275_v56, %v4271_v30  ;;  %v6280_v59 = vld [vmem:[%s6510_s13 + $0x90] sm:$0xff] }
 0x46a   : > { %v4405_v32 = vmax.f32 %v4373_v63, 0.0 }
 0x46b   : > { %v4593_v51 = vadd.f32 %v4592_v14, %v4402_v16  ;;  %v4403_v26 = vmax.f32 %v4371_v62, 0.0  ;;  %v5877_v45 = vpop.f32.mrb[76].mxu0 }
 0x46c   : > { %v5216_v42 = vpack.c.bf16 %v4405_v32, %v4404_v3  ;;  %v4292_v33 = vadd.f32 %v5877_v45, %v7851_v28  ;;  %v4283_v13 = vpop.f32.mrb[77].mxu0 }
 0x46d   : > { %v5211_v29 = vpack.c.bf16 %v4403_v26, %v4402_v16  ;;  %v4594_v0 = vadd.f32 %v4593_v51, %v4403_v26  ;;  %v4284_v12 = vadd.f32 %v7851_v28, %v4283_v13  ;;  %v5878_v43 = vpop.f32.mrb[78].mxu0 }
 0x46e   : > { %5272 = vst [vmem:[%s7867_s22 + $0x28] sm:$0xff] %v5216_v42   ;;  %v4376_v37 = vadd.f32 %v6276_v55, %v4292_v33  ;;  %v4295_v9 = vadd.f32 %v5878_v43, %v7851_v28  ;;  %v4286_v61 = vpop.f32.mrb[79].mxu0  ;;  %v6285_v33 = vld [vmem:[%s6510_s13 + $0xa0] sm:$0xff] }
 0x46f   : > { %5271 = vst [vmem:[%s7867_s22 + $0x20] sm:$0xff] %v5211_v29   ;;  %v4595_v24 = vadd.f32 %v4594_v0, %v4404_v3  ;;  %v4374_v31 = vadd.f32 %v6277_v15, %v4284_v12  ;;  %v4287_v35 = vadd.f32 %v7851_v28, %v4286_v61  ;;  %v6286_v0 = vld [vmem:[%s6510_s13 + $0xb8] sm:$0xff] }
 0x470   : > { %v4377_v40 = vadd.f32 %v6278_v41, %v4295_v9  ;;  %v4408_v2 = vmax.f32 %v4376_v37, 0.0  ;;  %v6287_v37 = vld [vmem:[%s6510_s13 + $0xa8] sm:$0xff] }
 0x471   : > { %v4406_v11 = vmax.f32 %v4374_v31, 0.0  ;;  %v4596_v23 = vadd.f32 %v4595_v24, %v4405_v32  ;;  %v4375_v10 = vadd.f32 %v6279_v25, %v4287_v35  ;;  %v6284_v32 = vld [vmem:[%s6510_s13 + $0xb0] sm:$0xff] }
 0x472   : > { %v4409_v48 = vmax.f32 %v4377_v40, 0.0 }
 0x473   : > { %v4597_v50 = vadd.f32 %v4596_v23, %v4406_v11  ;;  %v4407_v1 = vmax.f32 %v4375_v10, 0.0  ;;  %v5881_v19 = vpop.f32.mrb[80].mxu0 }
 0x474   : > { %v5226_v60 = vpack.c.bf16 %v4409_v48, %v4408_v2  ;;  %v4308_v54 = vadd.f32 %v5881_v19, %v7851_v28  ;;  %v4299_v49 = vpop.f32.mrb[81].mxu0 }
 0x475   : > { %v5221_v44 = vpack.c.bf16 %v4407_v1, %v4406_v11  ;;  %v4598_v34 = vadd.f32 %v4597_v50, %v4407_v1  ;;  %v4300_v36 = vadd.f32 %v7851_v28, %v4299_v49  ;;  %v5882_v38 = vpop.f32.mrb[82].mxu0 }
 0x476   : > { %5274 = vst [vmem:[%s7867_s22 + $0x38] sm:$0xff] %v5226_v60   ;;  %v4380_v46 = vadd.f32 %v6280_v59, %v4308_v54  ;;  %v4311_v22 = vadd.f32 %v5882_v38, %v7851_v28  ;;  %v4302_v7 = vpop.f32.mrb[83].mxu0  ;;  %v6289_v54 = vld [vmem:[%s6510_s13 + $0xc0] sm:$0xff] }
 0x477   : > { %5273 = vst [vmem:[%s7867_s22 + $0x30] sm:$0xff] %v5221_v44   ;;  %v4599_v6 = vadd.f32 %v4598_v34, %v4408_v2  ;;  %v4378_v17 = vadd.f32 %v6281_v52, %v4300_v36  ;;  %v4303_v8 = vadd.f32 %v7851_v28, %v4302_v7  ;;  %v6290_v34 = vld [vmem:[%s6510_s13 + $0xd8] sm:$0xff] }
 0x478   : > { %v4381_v39 = vadd.f32 %v6282_v5, %v4311_v22  ;;  %v4412_v27 = vmax.f32 %v4380_v46, 0.0  ;;  %v6291_v46 = vld [vmem:[%s6510_s13 + $0xc8] sm:$0xff] }
 0x479   : > { %v4410_v53 = vmax.f32 %v4378_v17, 0.0  ;;  %v4600_v58 = vadd.f32 %v4599_v6, %v4409_v48  ;;  %v4379_v57 = vadd.f32 %v6283_v21, %v4303_v8  ;;  %v6288_v48 = vld [vmem:[%s6510_s13 + $0xd0] sm:$0xff] }
 0x47a   : > { %v4413_v47 = vmax.f32 %v4381_v39, 0.0 }
 0x47b   : > { %v4601_v20 = vadd.f32 %v4600_v58, %v4410_v53  ;;  %v4411_v4 = vmax.f32 %v4379_v57, 0.0  ;;  %v5885_v30 = vpop.f32.mrb[84].mxu0 }
 0x47c   : > { %v5236_v18 = vpack.c.bf16 %v4413_v47, %v4412_v27  ;;  %v4324_v63 = vadd.f32 %v5885_v30, %v7851_v28  ;;  %v4315_v16 = vpop.f32.mrb[85].mxu0 }
 0x47d   : > { %v5231_v14 = vpack.c.bf16 %v4411_v4, %v4410_v53  ;;  %v4602_v56 = vadd.f32 %v4601_v20, %v4411_v4  ;;  %v4316_v62 = vadd.f32 %v7851_v28, %v4315_v16  ;;  %v5886_v3 = vpop.f32.mrb[86].mxu0 }
 0x47e   : > { %5276 = vst [vmem:[%s7867_s22 + $0x48] sm:$0xff] %v5236_v18   ;;  %v4384_v51 = vadd.f32 %v6284_v32, %v4324_v63  ;;  %v4327_v26 = vadd.f32 %v5886_v3, %v7851_v28  ;;  %v4318_v45 = vpop.f32.mrb[87].mxu0  ;;  %v6293_v63 = vld [vmem:[%s6510_s13 + $0xe0] sm:$0xff] }
 0x47f   : > { %5275 = vst [vmem:[%s7867_s22 + $0x40] sm:$0xff] %v5231_v14   ;;  %v4603_v42 = vadd.f32 %v4602_v56, %v4412_v27  ;;  %v4382_v13 = vadd.f32 %v6285_v33, %v4316_v62  ;;  %v4319_v29 = vadd.f32 %v7851_v28, %v4318_v45  ;;  %v6294_v56 = vld [vmem:[%s6510_s13 + $0xf8] sm:$0xff] }
 0x480   : > { %v4385_v12 = vadd.f32 %v6286_v0, %v4327_v26  ;;  %v4416_v61 = vmax.f32 %v4384_v51, 0.0  ;;  %v6295_v51 = vld [vmem:[%s6510_s13 + $0xe8] sm:$0xff] }
 0x481   : > { %v4414_v43 = vmax.f32 %v4382_v13, 0.0  ;;  %v4604_v55 = vadd.f32 %v4603_v42, %v4413_v47  ;;  %v4383_v9 = vadd.f32 %v6287_v37, %v4319_v29  ;;  %v6292_v47 = vld [vmem:[%s6510_s13 + $0xf0] sm:$0xff] }
 0x482   : > { %v4417_v24 = vmax.f32 %v4385_v12, 0.0 }
 0x483   : > { %v4605_v15 = vadd.f32 %v4604_v55, %v4414_v43  ;;  %v4415_v31 = vmax.f32 %v4383_v9, 0.0  ;;  %v5889_v35 = vpop.f32.mrb[88].mxu0 }
 0x484   : > { %v5246_v41 = vpack.c.bf16 %v4417_v24, %v4416_v61  ;;  %v4340_v40 = vadd.f32 %v5889_v35, %v7851_v28  ;;  %v4331_v11 = vpop.f32.mrb[89].mxu0 }
 0x485   : > { %v5241_v23 = vpack.c.bf16 %v4415_v31, %v4414_v43  ;;  %v4606_v25 = vadd.f32 %v4605_v15, %v4415_v31  ;;  %v4332_v10 = vadd.f32 %v7851_v28, %v4331_v11  ;;  %v5890_v2 = vpop.f32.mrb[90].mxu0 }
 0x486   : > { %5278 = vst [vmem:[%s7867_s22 + $0x58] sm:$0xff] %v5246_v41   ;;  %v4388_v50 = vadd.f32 %v6288_v48, %v4340_v40  ;;  %v4343_v1 = vadd.f32 %v5890_v2, %v7851_v28  ;;  %v4334_v19 = vpop.f32.mrb[91].mxu0 }
 0x487   : > { %5277 = vst [vmem:[%s7867_s22 + $0x50] sm:$0xff] %v5241_v23   ;;  %v4607_v60 = vadd.f32 %v4606_v25, %v4416_v61  ;;  %v4386_v49 = vadd.f32 %v6289_v54, %v4332_v10  ;;  %v4335_v44 = vadd.f32 %v7851_v28, %v4334_v19 }
 0x488   : > { %v4389_v36 = vadd.f32 %v6290_v34, %v4343_v1  ;;  %v4420_v7 = vmax.f32 %v4388_v50, 0.0 }
 0x489   : > { %v4418_v38 = vmax.f32 %v4386_v49, 0.0  ;;  %v4608_v59 = vadd.f32 %v4607_v60, %v4417_v24  ;;  %v4387_v22 = vadd.f32 %v6291_v46, %v4335_v44 }
 0x48a   : > { %v4421_v6 = vmax.f32 %v4389_v36, 0.0 }
 0x48b   : > { %v4609_v52 = vadd.f32 %v4608_v59, %v4418_v38  ;;  %v4419_v17 = vmax.f32 %v4387_v22, 0.0  ;;  %v5893_v8 = vpop.f32.mrb[92].mxu0 }
 0x48c   : > { %v5256_v5 = vpack.c.bf16 %v4421_v6, %v4420_v7  ;;  %v4356_v39 = vadd.f32 %v5893_v8, %v7851_v28  ;;  %v4347_v53 = vpop.f32.mrb[93].mxu0 }
 0x48d   : > { %v5251_v58 = vpack.c.bf16 %v4419_v17, %v4418_v38  ;;  %v4610_v21 = vadd.f32 %v4609_v52, %v4419_v17  ;;  %v4348_v57 = vadd.f32 %v7851_v28, %v4347_v53  ;;  %v5894_v27 = vpop.f32.mrb[94].mxu0 }
 0x48e   : > { %5280 = vst [vmem:[%s7867_s22 + $0x68] sm:$0xff] %v5256_v5   ;;  %v4392_v20 = vadd.f32 %v6292_v47, %v4356_v39  ;;  %v4359_v4 = vadd.f32 %v5894_v27, %v7851_v28  ;;  %v4350_v30 = vpop.f32.mrb[95].mxu0 }
 0x48f   : > { %5279 = vst [vmem:[%s7867_s22 + $0x60] sm:$0xff] %v5251_v58   ;;  %v4611_v18 = vadd.f32 %v4610_v21, %v4420_v7  ;;  %v4390_v16 = vadd.f32 %v6293_v63, %v4348_v57  ;;  %v4351_v14 = vadd.f32 %v7851_v28, %v4350_v30 }
 0x490   : > { %v4393_v62 = vadd.f32 %v6294_v56, %v4359_v4  ;;  %v4424_v45 = vmax.f32 %v4392_v20, 0.0 }
 0x491   : > { %v4422_v3 = vmax.f32 %v4390_v16, 0.0  ;;  %v4612_v32 = vadd.f32 %v4611_v18, %v4421_v6  ;;  %v4391_v26 = vadd.f32 %v6295_v51, %v4351_v14 }
 0x492   : > { %v4425_v42 = vmax.f32 %v4393_v62, 0.0 }
 0x493   : > { %v4613_v33 = vadd.f32 %v4612_v32, %v4422_v3  ;;  %v4423_v13 = vmax.f32 %v4391_v26, 0.0 }
 0x494   : > { %v5266_v28 = vpack.c.bf16 %v4425_v42, %v4424_v45 }
 0x495   : > { %v5261_v29 = vpack.c.bf16 %v4423_v13, %v4422_v3  ;;  %v4614_v0 = vadd.f32 %v4613_v33, %v4423_v13 }
 0x496   : > { %5282 = vst [vmem:[%s7867_s22 + $0x78] sm:$0xff] %v5266_v28  }
 0x497   : > { %5281 = vst [vmem:[%s7867_s22 + $0x70] sm:$0xff] %v5261_v29   ;;  %v4615_v12 = vadd.f32 %v4614_v0, %v4424_v45 }
 0x498   : > { %6309 = shalt.err (!%p6306_p3)
}
 0x499   : > { %s6324_s23 = scalar_lea.hbm %s4711_s26, 6144  ;;  %s6314_s25 = scalar_lea.hbm %s8027_s8, 16384 }
 0x49a   : > { %p6311_p4 = scmp.ne.s32.totalorder %s7942_s28, %s6324_s23  ;;  %p6315_p9 = scmp.lt.u32.totalorder %s7942_s28, %s8027_s8 }
 0x49b   : > { %p6316_p10 = scmp.lt.u32.totalorder %s6314_s25, %s6324_s23  ;;  %p6318_p12 = scmp.lt.u32.totalorder %s6324_s23, %s7942_s28 }
 0x49c   : > { %p6312_p7 = pnand %p6311_p4, %p6486_p5 }
 0x49d   : > { %p6317_p11 = por %p6316_p10, %p6315_p9 }
 0x49e   : > { %p6313_p8 = pneg %p6312_p7 }
 0x49f   : > { %p6319_p13 = por %p6318_p12, %p6317_p11 }
 0x4a1   : > { %p6320_p0 = pnand %p6319_p13, %p6313_p8 }
 0x4a3   : > { %6323 = shalt.err (!%p6320_p0)
}
 0x4a4   : > { %s6395_s26 = smov 64   ;;  %s6396_s29 = smov 4   ;;  %v4616_v43 = vadd.f32 %v4615_v12, %v4425_v42 }
 0x4a5   : > { %s8123_s16 = scalar_lea.sflag [#allocation4], %s7856_s20  ;;  %s5119_s13 = sshll.u32 %s6469_s7, 4 }
 0x4a6   : > { %6155 = dma.vmem_to_hbm [thread:$0]  (%p6486_p5), %s7944_s27, 2048, %s7942_s28, %s8123_s16, %s6395_s26, %s6395_s26, %s6396_s29   ;;  %v4617_v55 = vrot.slane %v4616_v43, 4 }
 0x4a7   : > { %s309_s21 = scalar_lea.vmem [#allocation5], %s7856_s20  ;;  %s7976_s25 = scalar_lea.hbm %s8028_s9, %s5119_s13 }
 0x4a8   : > { %v4618_v37 = vadd.f32 %v4617_v55, %v4616_v43  ;;  %s4661_s23 = sshll.u32 %s309_s21, 4  ;;  %s4632_s27 = scalar_lea.sflag [#allocation6], %s7856_s20  ;;  %s7978_s23 = int_to_ptr.vmem [resolvable:$true] %s4661_s23 }
 0x4a9   : > { %s6325_s28 = scalar_lea.vmem %s7978_s23, 16  ;;  %s6397_s7 = smov [#allocation5]  }
 0x4aa   : > { %v4619_v9 = vrot.slane %v4618_v37, 2  ;;  %p6326_p1 = scmp.ne.s32.totalorder %s7978_s23, %s6325_s28  ;;  %s6329_s15 = sshll.u32 %s6397_s7, 4  ;;  %s6330_s15 = int_to_ptr.vmem [resolvable:$false] %s6329_s15 }
 0x4ab   : > { %s6331_s26 = scalar_lea.vmem %s6330_s15, 32  ;;  %p6332_p4 = scmp.lt.s32.totalorder %s7978_s23, %s6330_s15 }
 0x4ac   : > { %v4620_v61 = vadd.f32 %v4619_v9, %v4618_v37  ;;  %p6327_p2 = pnand %p6326_p1, %p6486_p5  ;;  %p6333_p7 = scmp.lt.s32.totalorder %s6331_s26, %s6325_s28 }
 0x4ae   : > { %v4621_v24 = vrot.slane %v4620_v61, 1  ;;  %p6328_p3 = pneg %p6327_p2  ;;  %p6334_p8 = por %p6333_p7, %p6332_p4 }
 0x4b0   : > { %v4622_v15 = vadd.f32 %v4621_v24, %v4620_v61  ;;  %p6335_p9 = pnand %p6334_p8, %p6328_p3 }
 0x4b2   : > { %v4624_v31 = vmul.f32 0.00390625, %v4622_v15 }
 0x4b4   : > { %4625 = vst [vmem:[%s309_s21] sm:$0x1] %v4624_v31 }
 0x4b5   : > { %6338 = shalt.err (!%p6335_p9)
}
 0x4b6   : > { %s6339_s20 = scalar_lea.hbm %s7976_s25, 16  ;;  %s6343_s13 = scalar_lea.hbm %s8028_s9, 32 }
 0x4b7   : > { %p6340_p10 = scmp.ne.s32.totalorder %s7976_s25, %s6339_s20  ;;  %p6344_p13 = scmp.lt.u32.totalorder %s7976_s25, %s8028_s9 }
 0x4b8   : > { %p6345_p0 = scmp.lt.u32.totalorder %s6343_s13, %s6339_s20  ;;  %p6347_p2 = scmp.lt.u32.totalorder %s6339_s20, %s7976_s25 }
 0x4b9   : > { %p6341_p11 = pnand %p6340_p10, %p6486_p5 }
 0x4ba   : > { %p6346_p1 = por %p6345_p0, %p6344_p13 }
 0x4bb   : > { %p6342_p12 = pneg %p6341_p11 }
 0x4bc   : > { %p6348_p3 = por %p6347_p2, %p6346_p1 }
 0x4be   : > { %p6349_p4 = pnand %p6348_p3, %p6342_p12 }
 0x4c0   : > { %6352 = shalt.err (!%p6349_p4)
}
 0x4c1   : > { %6156 = dma.vmem_to_hbm [thread:$0]  (%p6486_p5), %s7978_s23, 16, %s7976_s25, %s4632_s27  }
 0x4c2 PF: > { %p6166_p7 = scmp.ge.s32.totalorder %s6391_s12, 2  ;;  %s4673_s24 = sand.u32 1, %s6379_s30  }
 0x4c3   : > { %s4674_s28 = scalar_lea.sflag [#allocation4], %s4673_s24 }
 0x4c4   : > { %p6160_p8 = pnand %p6166_p7, %p6490_p6 }
 0x4c6   : > { %6370 = dma.done.wait (!%p6160_p8), %s4674_s28, 2048  }
 0x4c7   : > { %6372 = vsyncadd (!%p6160_p8), %s4674_s28, 4294965248  ;;  %s4683_s7 = scalar_lea.sflag [#allocation6], %s4673_s24 }
 0x4c8   : > { %6374 = dma.done.wait (!%p6160_p8), %s4683_s7, 16  }
 0x4c9   : > { %6376 = vsyncadd (!%p6160_p8), %s4683_s7, 4294967280  ;;  %p23_p5 = scmp.ge.s32.totalorder %s6473_s14, 4   ;;  %s8124_s30 = smov %s6383_s10 }
 0x4ca   : > { %s8125_s10 = smov %s6387_s11  ;;  %s8126_s11 = smov %s6484_s17 }
 0x4cb   : > { %s8127_s12 = smov %s6473_s14  ;;  %25 = sbr.rel (!%p23_p5) target bundleno = 5 (0x5), region = 109 }
 0x4d2   :  { %4687 = vsyncpa [#allocation4], 1 }
 0x4d3   :  { %4689 = vsyncpa [#allocation4 + $0x1], 1 }
 0x4d4   :  { %4690 = vsyncpa [#allocation6], 1 }
 0x4d5   :  { %4692 = vsyncpa [#allocation6 + $0x1], 1 }

</bundles_post_ra>
